<compile_context>
chip_gen: v5e
topology: v5e:2x2
jax: 0.10.0
libtpu: 0.0.40
codegen_flags: <defaults>
</compile_context>

<pallas_src>
import math
import functools

import jax
import jax.numpy as jnp
from jax.experimental import pallas as pl
from jax.experimental.pallas import tpu as pltpu


# MXU input dtype for the large projections (accumulation is always f32 via
# preferred_element_type).  bf16 runs at full rate on v5e/v6e/v7x MXUs.
MATMUL_DTYPE = jnp.bfloat16


# ------------------------------ in-kernel helpers --------------------------- #

def _add_ln(x, r, g, b, eps=1e-5):
    """LayerNorm(x + residual) over last dim, f32 math.
    mean and mean-of-squares are independent reductions (XLU can pipeline them)."""
    y = x + r
    m1 = jnp.mean(y, axis=-1, keepdims=True)
    m2 = jnp.mean(y * y, axis=-1, keepdims=True)
    var = m2 - m1 * m1
    inv = jax.lax.rsqrt(var + eps)
    return (y - m1) * inv * g + b


def _mha(q, k, v, nhead):
    """Multi-head attention.  q: (BB, L, D), k/v: (BB, S, D), f32, with the
    1/sqrt(head_dim) scale already folded into q (via Wq).  Batch is handled with
    dot_general batch dims (one MXU call per head, not per head*batch); heads are
    static lane slices.  Returns (BB, L, D) f32."""
    D = q.shape[-1]
    hd = D // nhead
    dn_qk = (((2,), (2,)), ((0,), (0,)))   # contract hd, batch over BB
    dn_pv = (((2,), (1,)), ((0,), (0,)))   # contract S,  batch over BB
    outs = []
    for h in range(nhead):
        sl = slice(h * hd, (h + 1) * hd)
        s = jax.lax.dot_general(q[..., sl], k[..., sl], dn_qk,
                                preferred_element_type=jnp.float32)   # (BB, L, S)
        s = s - jnp.max(s, axis=-1, keepdims=True)
        p = jnp.exp(s)
        p = p * pl.reciprocal(jnp.sum(p, axis=-1, keepdims=True), approx=True)
        outs.append(jax.lax.dot_general(p, v[..., sl], dn_pv,
                                        preferred_element_type=jnp.float32))  # (BB, L, hd)
    return jnp.concatenate(outs, axis=-1)                              # (BB, L, D)


def _proj(x_f32, w_ref, b_ref):
    """x_f32 @ W + b with one activation cast to MATMUL_DTYPE; f32 accumulation."""
    return (jnp.dot(x_f32.astype(MATMUL_DTYPE), w_ref,
                    preferred_element_type=jnp.float32) + b_ref)


# ------------------------------ fused stack kernels -------------------------- #

def _encoder_stack_kernel(x_ref,
                          qkv_w, qkv_b, out_w, out_b, ln1_g, ln1_b,
                          w1, b1, w2, b2, ln2_g, ln2_b,
                          o_ref, state_ref, *, nhead, lb, seq):
    l = pl.program_id(1)

    @pl.when(l == 0)
    def _():
        state_ref[...] = x_ref[...]

    x = state_ref[...]                                   # (lb*seq, D) f32
    D = x.shape[-1]

    # --- self attention (fused QKV matmul, heads via lane slices) ---
    qkv = _proj(x, qkv_w[0], qkv_b[0])                   # (rows, 3D) f32
    attn = _mha(qkv[:, :D].reshape(lb, seq, D),
                qkv[:, D:2 * D].reshape(lb, seq, D),
                qkv[:, 2 * D:].reshape(lb, seq, D), nhead).reshape(lb * seq, D)
    attn = _proj(attn, out_w[0], out_b[0])
    x = _add_ln(x, attn, ln1_g[0], ln1_b[0])

    # --- feed forward (w1 + ReLU + w2) + residual LayerNorm ---
    h = jnp.maximum(_proj(x, w1[0], b1[0]), 0.0)
    ff = _proj(h, w2[0], b2[0])
    x = _add_ln(x, ff, ln2_g[0], ln2_b[0])

    state_ref[...] = x

    @pl.when(l == pl.num_programs(1) - 1)
    def _():
        o_ref[...] = x.astype(o_ref.dtype)


def _decoder_stack_kernel(x_ref, mem_ref,
                          sa_qkv_w, sa_qkv_b, sa_out_w, sa_out_b, ln1_g, ln1_b,
                          ca_q_w, ca_q_b, ca_kv_w, ca_kv_b, ca_out_w, ca_out_b,
                          ln2_g, ln2_b,
                          w1, b1, w2, b2, ln3_g, ln3_b,
                          proj_w, proj_b,
                          logits_ref, state_ref, *, nhead, lb, l_tgt, s_src):
    l = pl.program_id(1)

    @pl.when(l == 0)
    def _():
        state_ref[...] = x_ref[...]

    x = state_ref[...]                                   # (lb*l_tgt, D) f32
    mem = mem_ref[...]                                   # (lb*s_src, D) f32
    D = x.shape[-1]

    # --- self attention (non-causal: the reference forward passes no tgt_mask) ---
    qkv = _proj(x, sa_qkv_w[0], sa_qkv_b[0])
    attn = _mha(qkv[:, :D].reshape(lb, l_tgt, D),
                qkv[:, D:2 * D].reshape(lb, l_tgt, D),
                qkv[:, 2 * D:].reshape(lb, l_tgt, D), nhead).reshape(lb * l_tgt, D)
    attn = _proj(attn, sa_out_w[0], sa_out_b[0])
    x = _add_ln(x, attn, ln1_g[0], ln1_b[0])

    # --- cross attention (q from x, fused KV matmul from encoder memory) ---
    q = _proj(x, ca_q_w[0], ca_q_b[0])                   # (rows, D)
    kv = _proj(mem, ca_kv_w[0], ca_kv_b[0])              # (mem_rows, 2D)
    attn = _mha(q.reshape(lb, l_tgt, D),
                kv[:, :D].reshape(lb, s_src, D),
                kv[:, D:].reshape(lb, s_src, D), nhead).reshape(lb * l_tgt, D)
    attn = _proj(attn, ca_out_w[0], ca_out_b[0])
    x = _add_ln(x, attn, ln2_g[0], ln2_b[0])

    # --- feed forward ---
    h = jnp.maximum(_proj(x, w1[0], b1[0]), 0.0)
    ff = _proj(h, w2[0], b2[0])
    x = _add_ln(x, ff, ln3_g[0], ln3_b[0])

    state_ref[...] = x

    # --- fused output projection on the last layer (lane-dense Vp stores) ---
    @pl.when(l == pl.num_programs(1) - 1)
    def _():
        logits_ref[...] = _proj(x, proj_w[...], proj_b[...]).astype(logits_ref.dtype)


# ------------------------------ pallas_call wrappers ------------------------- #

_VMEM_LIMIT = 32 * 1024 * 1024   # explicit scoped-VMEM cap; safe on v5e/v6e/v7x


def encoder_stack(x, p, *, nhead, batch, batch_shards=1):
    """x: (B*L, D) f32.  Runs all encoder layers in one pallas_call."""
    rows, D = x.shape
    NL = p["qkv_w"].shape[0]
    dff = p["w1"].shape[-1]
    NB = batch_shards
    assert batch % NB == 0 and rows % batch == 0
    lb = batch // NB
    seq = rows // batch
    rb = lb * seq

    wmap = lambda b, l: (l, 0, 0)
    xmap = lambda b, l: (b, 0)
    w3 = lambda n2, n3: pl.BlockSpec((1, n2, n3), wmap)

    return pl.pallas_call(
        functools.partial(_encoder_stack_kernel, nhead=nhead, lb=lb, seq=seq),
        out_shape=jax.ShapeDtypeStruct((rows, D), jnp.float32),
        grid=(NB, NL),
        in_specs=[
            pl.BlockSpec((rb, D), xmap),
            w3(D, 3 * D), w3(1, 3 * D),
            w3(D, D), w3(1, D),
            w3(1, D), w3(1, D),
            w3(D, dff), w3(1, dff),
            w3(dff, D), w3(1, D),
            w3(1, D), w3(1, D),
        ],
        out_specs=pl.BlockSpec((rb, D), xmap),
        scratch_shapes=[pltpu.VMEM((rb, D), jnp.float32)],
        compiler_params=pltpu.CompilerParams(
            dimension_semantics=("parallel", "arbitrary"),
            vmem_limit_bytes=_VMEM_LIMIT),
    )(x, p["qkv_w"], p["qkv_b"], p["out_w"], p["out_b"],
      p["ln1_g"], p["ln1_b"],
      p["w1"], p["b1"], p["w2"], p["b2"],
      p["ln2_g"], p["ln2_b"])


def decoder_stack(x, memory, p, proj_w, proj_b, *, nhead, batch, l_tgt, s_src,
                  batch_shards=1):
    """x: (B*Lt, D), memory: (B*Ls, D), f32.  Runs all decoder layers + the output
    projection in one pallas_call; returns (B*Lt, Vp) logits (Vp = padded vocab)."""
    rows, D = x.shape
    NL = p["sa_qkv_w"].shape[0]
    dff = p["w1"].shape[-1]
    Vp = proj_w.shape[-1]
    NB = batch_shards
    assert batch % NB == 0
    lb = batch // NB
    rb = lb * l_tgt
    mb = lb * s_src

    wmap = lambda b, l: (l, 0, 0)
    cmap = lambda b, l: (0, 0)
    xmap = lambda b, l: (b, 0)
    w3 = lambda n2, n3: pl.BlockSpec((1, n2, n3), wmap)

    return pl.pallas_call(
        functools.partial(_decoder_stack_kernel, nhead=nhead, lb=lb,
                          l_tgt=l_tgt, s_src=s_src),
        out_shape=jax.ShapeDtypeStruct((rows, Vp), jnp.float32),
        grid=(NB, NL),
        in_specs=[
            pl.BlockSpec((rb, D), xmap),
            pl.BlockSpec((mb, D), xmap),
            w3(D, 3 * D), w3(1, 3 * D), w3(D, D), w3(1, D), w3(1, D), w3(1, D),
            w3(D, D), w3(1, D), w3(D, 2 * D), w3(1, 2 * D), w3(D, D), w3(1, D),
            w3(1, D), w3(1, D),
            w3(D, dff), w3(1, dff), w3(dff, D), w3(1, D), w3(1, D), w3(1, D),
            pl.BlockSpec((D, Vp), cmap), pl.BlockSpec((1, Vp), cmap),
        ],
        out_specs=pl.BlockSpec((rb, Vp), xmap),
        scratch_shapes=[pltpu.VMEM((rb, D), jnp.float32)],
        compiler_params=pltpu.CompilerParams(
            dimension_semantics=("parallel", "arbitrary"),
            vmem_limit_bytes=_VMEM_LIMIT),
    )(x, memory,
      p["sa_qkv_w"], p["sa_qkv_b"], p["sa_out_w"], p["sa_out_b"],
      p["ln1_g"], p["ln1_b"],
      p["ca_q_w"], p["ca_q_b"], p["ca_kv_w"], p["ca_kv_b"],
      p["ca_out_w"], p["ca_out_b"], p["ln2_g"], p["ln2_b"],
      p["w1"], p["b1"], p["w2"], p["b2"], p["ln3_g"], p["ln3_b"],
      proj_w, proj_b)


# -------------------------------- forward pass ------------------------------- #

def positional_encoding(max_len, d_model):
    position = jnp.arange(max_len, dtype=jnp.float32)[:, None]
    div_term = jnp.exp(jnp.arange(0, d_model, 2, dtype=jnp.float32)
                       * (-math.log(10000.0) / d_model))
    pe = jnp.zeros((max_len, d_model), jnp.float32)
    pe = pe.at[:, 0::2].set(jnp.sin(position * div_term))
    pe = pe.at[:, 1::2].set(jnp.cos(position * div_term))
    return pe


def transformer_simplifier_forward(params, src, tgt, *, d_model, nhead, vocab,
                                   batch_shards=1):
    # src, tgt: int32 token ids (B, L).  Embedding gather + pos-enc stay in XLA (glue).
    B, Ls = src.shape
    _, Lt = tgt.shape
    pe = params["pe"]
    scale = math.sqrt(d_model)
    src_emb = jnp.take(params["embedding"], src, axis=0) * scale + pe[None, :Ls, :]
    tgt_emb = jnp.take(params["embedding"], tgt, axis=0) * scale + pe[None, :Lt, :]

    # Fold batch into the matmul M axis (free reshape outside the kernels).
    src_rows = src_emb.reshape(B * Ls, d_model)
    tgt_rows = tgt_emb.reshape(B * Lt, d_model)

    memory = encoder_stack(src_rows, params["encoder"], nhead=nhead,
                           batch=B, batch_shards=batch_shards)
    logits = decoder_stack(tgt_rows, memory, params["decoder"],
                           params["out_w"], params["out_b"],
                           nhead=nhead, batch=B, l_tgt=Lt, s_src=Ls,
                           batch_shards=batch_shards)
    return logits.reshape(B, Lt, -1)[..., :vocab]        # drop lane padding


# --------------------------- parameters (PyTorch layout) --------------------- #

def init_params(key, vocab, d_model, nhead, num_layers, dff, max_len):
    keys = iter(jax.random.split(key, 256))

    def w(shape, scale=0.02):
        return jax.random.normal(next(keys), shape, jnp.float32) * scale

    def mha_p():
        return dict(in_w=w((3 * d_model, d_model)),
                    in_b=jnp.zeros((3 * d_model,), jnp.float32),
                    out_w=w((d_model, d_model)),
                    out_b=jnp.zeros((d_model,), jnp.float32))

    def ln_p():
        return dict(g=jnp.ones((d_model,), jnp.float32),
                    b=jnp.zeros((d_model,), jnp.float32))

    def ff_p():
        return dict(w1=w((dff, d_model)), b1=jnp.zeros((dff,), jnp.float32),
                    w2=w((d_model, dff)), b2=jnp.zeros((d_model,), jnp.float32))

    return dict(
        embedding=w((vocab, d_model), 1.0),
        pe=positional_encoding(max_len, d_model),
        encoder=[dict(sa=mha_p(), ln1=ln_p(), ff=ff_p(), ln2=ln_p())
                 for _ in range(num_layers)],
        decoder=[dict(sa=mha_p(), ln1=ln_p(), ca=mha_p(), ln2=ln_p(),
                      ff=ff_p(), ln3=ln_p())
                 for _ in range(num_layers)],
        out_w=w((vocab, d_model)),
        out_b=jnp.zeros((vocab,), jnp.float32),
    )


def prepare_params(raw, d_model, nhead, vocab):
    """One-time transform: pre-transpose Linear weights to matmul layout, fold the
    1/sqrt(head_dim) scale into Wq/bq, pre-cast weights to MATMUL_DTYPE (bf16),
    stack per-layer weights along a leading layer axis, and pad the output
    projection to a 128-lane multiple.  Biases / LayerNorm params stay f32."""
    hd = d_model // nhead
    scale = 1.0 / math.sqrt(hd)
    wdt = MATMUL_DTYPE

    def prep_self(p):
        w = jnp.transpose(p["in_w"])                       # (D, 3D), cols = [q|k|v]
        b = p["in_b"].reshape(1, 3 * d_model)
        w = w.at[:, :d_model].multiply(scale)
        b = b.at[:, :d_model].multiply(scale)
        return (w.astype(wdt), b,
                jnp.transpose(p["out_w"]).astype(wdt),
                p["out_b"].reshape(1, d_model))

    def prep_cross(p):
        w = jnp.transpose(p["in_w"])                       # (D, 3D)
        b = p["in_b"]
        return ((w[:, :d_model] * scale).astype(wdt),
                (b[:d_model] * scale).reshape(1, d_model),
                w[:, d_model:].astype(wdt),
                b[d_model:].reshape(1, 2 * d_model),
                jnp.transpose(p["out_w"]).astype(wdt),
                p["out_b"].reshape(1, d_model))

    def prep_ff(p):
        return (jnp.transpose(p["w1"]).astype(wdt), p["b1"].reshape(1, -1),
                jnp.transpose(p["w2"]).astype(wdt), p["b2"].reshape(1, -1))

    def ln(p):
        return p["g"].reshape(1, -1), p["b"].reshape(1, -1)

    enames = ["qkv_w", "qkv_b", "out_w", "out_b", "ln1_g", "ln1_b",
              "w1", "b1", "w2", "b2", "ln2_g", "ln2_b"]
    ecols = {n: [] for n in enames}
    for lp in raw["encoder"]:
        sa = prep_self(lp["sa"])
        ff = prep_ff(lp["ff"])
        g1, bb1 = ln(lp["ln1"])
        g2, bb2 = ln(lp["ln2"])
        vals = list(sa) + [g1, bb1] + list(ff) + [g2, bb2]
        for n, v in zip(enames, vals):
            ecols[n].append(v)
    enc = {n: jnp.stack(v, axis=0) for n, v in ecols.items()}

    dnames = ["sa_qkv_w", "sa_qkv_b", "sa_out_w", "sa_out_b", "ln1_g", "ln1_b",
              "ca_q_w", "ca_q_b", "ca_kv_w", "ca_kv_b", "ca_out_w", "ca_out_b",
              "ln2_g", "ln2_b",
              "w1", "b1", "w2", "b2", "ln3_g", "ln3_b"]
    dcols = {n: [] for n in dnames}
    for lp in raw["decoder"]:
        sa = prep_self(lp["sa"])
        ca = prep_cross(lp["ca"])
        ff = prep_ff(lp["ff"])
        g1, bb1 = ln(lp["ln1"])
        g2, bb2 = ln(lp["ln2"])
        g3, bb3 = ln(lp["ln3"])
        vals = list(sa) + [g1, bb1] + list(ca) + [g2, bb2] + list(ff) + [g3, bb3]
        for n, v in zip(dnames, vals):
            dcols[n].append(v)
    dec = {n: jnp.stack(v, axis=0) for n, v in dcols.items()}

    vocab_pad = ((vocab + 127) // 128) * 128
    ow = jnp.pad(jnp.transpose(raw["out_w"]),
                 ((0, 0), (0, vocab_pad - vocab))).astype(wdt)
    ob = jnp.pad(raw["out_b"], (0, vocab_pad - vocab)).reshape(1, vocab_pad)

    return dict(embedding=raw["embedding"], pe=raw["pe"],
                encoder=enc, decoder=dec, out_w=ow, out_b=ob)


# ---------------------------------- main ------------------------------------- #

if __name__ == "__main__":
    VOCAB = 64
    D_MODEL = 128
    NHEAD = 4
    NUM_LAYERS = 2
    DFF = 256
    MAX_LEN = 64
    B, L_SRC, L_TGT = 2, 8, 8
    BATCH_SHARDS = 1   # set to 2 on v7x so the "parallel" grid axis feeds both TCs

    key = jax.random.PRNGKey(0)
    kp, ks, kt = jax.random.split(key, 3)
    raw = init_params(kp, VOCAB, D_MODEL, NHEAD, NUM_LAYERS, DFF, MAX_LEN)
    params = prepare_params(raw, D_MODEL, NHEAD, VOCAB)

    src = jax.random.randint(ks, (B, L_SRC), 0, VOCAB, dtype=jnp.int32)
    tgt = jax.random.randint(kt, (B, L_TGT), 0, VOCAB, dtype=jnp.int32)

    fwd = jax.jit(functools.partial(transformer_simplifier_forward,
                                    d_model=D_MODEL, nhead=NHEAD, vocab=VOCAB,
                                    batch_shards=BATCH_SHARDS))
    out = fwd(params, src, tgt)
    out = jax.block_until_ready(out)

    assert out.shape == (B, L_TGT, VOCAB), out.shape
    assert bool(jnp.all(jnp.isfinite(out)))
    print("KERNEL_OK")
</pallas_src>

<mosaic_0001>
module attributes {stable_mosaic.version = 11 : i64} {
  func.func @_encoder_stack_kernel(%arg0: i32, %arg1: i32, %arg2: memref<16x128xf32, #tpu.memory_space<vmem>>, %arg3: memref<1x128x384xbf16, #tpu.memory_space<vmem>>, %arg4: memref<1x1x384xf32, #tpu.memory_space<vmem>>, %arg5: memref<1x128x128xbf16, #tpu.memory_space<vmem>>, %arg6: memref<1x1x128xf32, #tpu.memory_space<vmem>>, %arg7: memref<1x1x128xf32, #tpu.memory_space<vmem>>, %arg8: memref<1x1x128xf32, #tpu.memory_space<vmem>>, %arg9: memref<1x128x256xbf16, #tpu.memory_space<vmem>>, %arg10: memref<1x1x256xf32, #tpu.memory_space<vmem>>, %arg11: memref<1x256x128xbf16, #tpu.memory_space<vmem>>, %arg12: memref<1x1x128xf32, #tpu.memory_space<vmem>>, %arg13: memref<1x1x128xf32, #tpu.memory_space<vmem>>, %arg14: memref<1x1x128xf32, #tpu.memory_space<vmem>>, %arg15: memref<16x128xf32, #tpu.memory_space<vmem>>, %arg16: memref<16x128xf32, #tpu.memory_space<vmem>>) attributes {dimension_semantics = [#tpu.dimension_semantics<parallel>, #tpu.dimension_semantics<arbitrary>], iteration_bounds = array<i64: 1, 2>, scalar_prefetch = 0 : i64, scratch_operands = 1 : i64, tpu.core_type = #tpu.core_type<tc>, window_params = [{transform_indices = @transform_0, window_bounds = array<i64: 16, 128>}, {transform_indices = @transform_1, window_bounds = array<i64: 1, 128, 384>}, {transform_indices = @transform_2, window_bounds = array<i64: 1, 1, 384>}, {transform_indices = @transform_3, window_bounds = array<i64: 1, 128, 128>}, {transform_indices = @transform_4, window_bounds = array<i64: 1, 1, 128>}, {transform_indices = @transform_5, window_bounds = array<i64: 1, 1, 128>}, {transform_indices = @transform_6, window_bounds = array<i64: 1, 1, 128>}, {transform_indices = @transform_7, window_bounds = array<i64: 1, 128, 256>}, {transform_indices = @transform_8, window_bounds = array<i64: 1, 1, 256>}, {transform_indices = @transform_9, window_bounds = array<i64: 1, 256, 128>}, {transform_indices = @transform_10, window_bounds = array<i64: 1, 1, 128>}, {transform_indices = @transform_11, window_bounds = array<i64: 1, 1, 128>}, {transform_indices = @transform_12, window_bounds = array<i64: 1, 1, 128>}, {transform_indices = @transform_13, window_bounds = array<i64: 16, 128>}]} {
    %c0_i32 = arith.constant 0 : i32
    %0 = arith.cmpi eq, %arg1, %c0_i32 : i32
    %1 = arith.extui %0 : i1 to i32
    %c0_i32_0 = arith.constant 0 : i32
    %2 = arith.cmpi ne, %1, %c0_i32_0 : i32
    scf.if %2 {
      %c0_71 = arith.constant 0 : index
      %c0_72 = arith.constant 0 : index
      %164 = vector.load %arg2[%c0_71, %c0_72] : memref<16x128xf32, #tpu.memory_space<vmem>>, vector<16x128xf32>
      %c0_73 = arith.constant 0 : index
      %c0_74 = arith.constant 0 : index
      %165 = vector.load %arg16[%c0_73, %c0_74] : memref<16x128xf32, #tpu.memory_space<vmem>>, vector<16x128xf32>
      tpu.vector_store %arg16[%c0_73, %c0_74], %164 {strides = array<i32>} : memref<16x128xf32, #tpu.memory_space<vmem>>, vector<16x128xf32>,
    } else {
    }
    %c0 = arith.constant 0 : index
    %c0_1 = arith.constant 0 : index
    %3 = vector.load %arg16[%c0, %c0_1] : memref<16x128xf32, #tpu.memory_space<vmem>>, vector<16x128xf32>
    %c0_2 = arith.constant 0 : index
    %c0_3 = arith.constant 0 : index
    %c0_4 = arith.constant 0 : index
    %4 = vector.load %arg3[%c0_2, %c0_3, %c0_4] : memref<1x128x384xbf16, #tpu.memory_space<vmem>>, vector<1x128x384xbf16>
    %5 = vector.shape_cast %4 : vector<1x128x384xbf16> to vector<128x384xbf16>
    %c0_5 = arith.constant 0 : index
    %c0_6 = arith.constant 0 : index
    %c0_7 = arith.constant 0 : index
    %6 = vector.load %arg4[%c0_5, %c0_6, %c0_7] : memref<1x1x384xf32, #tpu.memory_space<vmem>>, vector<1x1x384xf32>
    %7 = vector.shape_cast %6 : vector<1x1x384xf32> to vector<1x384xf32>
    %8 = arith.truncf %3 : vector<16x128xf32> to vector<16x128xbf16>
    %cst = arith.constant dense<0.000000e+00> : vector<16x384xf32>
    %9 = tpu.matmul %8, %5, %cst {dimension_numbers = #tpu.dot_dimension_numbers<[1], [0], [0], [1], [0, 0, 1, 1], [], []>} : vector<16x128xbf16>, vector<128x384xbf16>, vector<16x384xf32> -> vector<16x384xf32>
    %10 = vector.broadcast %7 : vector<1x384xf32> to vector<16x384xf32>
    %11 = arith.addf %9, %10 : vector<16x384xf32>
    %12 = vector.extract_strided_slice %11 {offsets = [0, 0], sizes = [16, 128], strides = [1, 1]} : vector<16x384xf32> to vector<16x128xf32>
    %13 = vector.shape_cast %12 : vector<16x128xf32> to vector<2x8x128xf32>
    %14 = vector.extract_strided_slice %11 {offsets = [0, 128], sizes = [16, 128], strides = [1, 1]} : vector<16x384xf32> to vector<16x128xf32>
    %15 = vector.shape_cast %14 : vector<16x128xf32> to vector<2x8x128xf32>
    %16 = vector.extract_strided_slice %11 {offsets = [0, 256], sizes = [16, 128], strides = [1, 1]} : vector<16x384xf32> to vector<16x128xf32>
    %17 = vector.shape_cast %16 : vector<16x128xf32> to vector<2x8x128xf32>
    %18 = vector.extract_strided_slice %13 {offsets = [0, 0, 0], sizes = [2, 8, 32], strides = [1, 1, 1]} : vector<2x8x128xf32> to vector<2x8x32xf32>
    %19 = vector.extract_strided_slice %15 {offsets = [0, 0, 0], sizes = [2, 8, 32], strides = [1, 1, 1]} : vector<2x8x128xf32> to vector<2x8x32xf32>
    %cst_8 = arith.constant dense<0.000000e+00> : vector<2x8x8xf32>
    %20 = tpu.matmul %18, %19, %cst_8 {dimension_numbers = #tpu.dot_dimension_numbers<[2], [2], [1], [1], [0, 0, 0, 1, 1, 1], [0], [0]>} : vector<2x8x32xf32>, vector<2x8x32xf32>, vector<2x8x8xf32> -> vector<2x8x8xf32>
    %cst_9 = arith.constant dense<0xFF800000> : vector<2x8xf32>
    %21 = vector.multi_reduction <maximumf>, %20, %cst_9 [2] : vector<2x8x8xf32> to vector<2x8xf32>
    %22 = vector.shape_cast %21 : vector<2x8xf32> to vector<2x8x1xf32>
    %23 = vector.broadcast %22 : vector<2x8x1xf32> to vector<2x8x8xf32>
    %24 = arith.subf %20, %23 : vector<2x8x8xf32>
    %25 = math.exp %24 : vector<2x8x8xf32>
    %cst_10 = arith.constant dense<0.000000e+00> : vector<2x8xf32>
    %26 = vector.multi_reduction <add>, %25, %cst_10 [2] : vector<2x8x8xf32> to vector<2x8xf32>
    %27 = vector.shape_cast %26 : vector<2x8xf32> to vector<2x8x1xf32>
    %28 = tpu.reciprocal %27 {approx = true} : vector<2x8x1xf32> -> vector<2x8x1xf32>
    %29 = vector.broadcast %28 : vector<2x8x1xf32> to vector<2x8x8xf32>
    %30 = arith.mulf %25, %29 : vector<2x8x8xf32>
    %31 = vector.extract_strided_slice %17 {offsets = [0, 0, 0], sizes = [2, 8, 32], strides = [1, 1, 1]} : vector<2x8x128xf32> to vector<2x8x32xf32>
    %cst_11 = arith.constant dense<0.000000e+00> : vector<2x8x32xf32>
    %32 = tpu.matmul %30, %31, %cst_11 {dimension_numbers = #tpu.dot_dimension_numbers<[2], [1], [1], [2], [0, 0, 0, 1, 1, 2], [0], [0]>} : vector<2x8x8xf32>, vector<2x8x32xf32>, vector<2x8x32xf32> -> vector<2x8x32xf32>
    %33 = vector.extract_strided_slice %13 {offsets = [0, 0, 32], sizes = [2, 8, 32], strides = [1, 1, 1]} : vector<2x8x128xf32> to vector<2x8x32xf32>
    %34 = vector.extract_strided_slice %15 {offsets = [0, 0, 32], sizes = [2, 8, 32], strides = [1, 1, 1]} : vector<2x8x128xf32> to vector<2x8x32xf32>
    %cst_12 = arith.constant dense<0.000000e+00> : vector<2x8x8xf32>
    %35 = tpu.matmul %33, %34, %cst_12 {dimension_numbers = #tpu.dot_dimension_numbers<[2], [2], [1], [1], [0, 0, 0, 1, 1, 1], [0], [0]>} : vector<2x8x32xf32>, vector<2x8x32xf32>, vector<2x8x8xf32> -> vector<2x8x8xf32>
    %cst_13 = arith.constant dense<0xFF800000> : vector<2x8xf32>
    %36 = vector.multi_reduction <maximumf>, %35, %cst_13 [2] : vector<2x8x8xf32> to vector<2x8xf32>
    %37 = vector.shape_cast %36 : vector<2x8xf32> to vector<2x8x1xf32>
    %38 = vector.broadcast %37 : vector<2x8x1xf32> to vector<2x8x8xf32>
    %39 = arith.subf %35, %38 : vector<2x8x8xf32>
    %40 = math.exp %39 : vector<2x8x8xf32>
    %cst_14 = arith.constant dense<0.000000e+00> : vector<2x8xf32>
    %41 = vector.multi_reduction <add>, %40, %cst_14 [2] : vector<2x8x8xf32> to vector<2x8xf32>
    %42 = vector.shape_cast %41 : vector<2x8xf32> to vector<2x8x1xf32>
    %43 = tpu.reciprocal %42 {approx = true} : vector<2x8x1xf32> -> vector<2x8x1xf32>
    %44 = vector.broadcast %43 : vector<2x8x1xf32> to vector<2x8x8xf32>
    %45 = arith.mulf %40, %44 : vector<2x8x8xf32>
    %46 = vector.extract_strided_slice %17 {offsets = [0, 0, 32], sizes = [2, 8, 32], strides = [1, 1, 1]} : vector<2x8x128xf32> to vector<2x8x32xf32>
    %cst_15 = arith.constant dense<0.000000e+00> : vector<2x8x32xf32>
    %47 = tpu.matmul %45, %46, %cst_15 {dimension_numbers = #tpu.dot_dimension_numbers<[2], [1], [1], [2], [0, 0, 0, 1, 1, 2], [0], [0]>} : vector<2x8x8xf32>, vector<2x8x32xf32>, vector<2x8x32xf32> -> vector<2x8x32xf32>
    %48 = vector.extract_strided_slice %13 {offsets = [0, 0, 64], sizes = [2, 8, 32], strides = [1, 1, 1]} : vector<2x8x128xf32> to vector<2x8x32xf32>
    %49 = vector.extract_strided_slice %15 {offsets = [0, 0, 64], sizes = [2, 8, 32], strides = [1, 1, 1]} : vector<2x8x128xf32> to vector<2x8x32xf32>
    %cst_16 = arith.constant dense<0.000000e+00> : vector<2x8x8xf32>
    %50 = tpu.matmul %48, %49, %cst_16 {dimension_numbers = #tpu.dot_dimension_numbers<[2], [2], [1], [1], [0, 0, 0, 1, 1, 1], [0], [0]>} : vector<2x8x32xf32>, vector<2x8x32xf32>, vector<2x8x8xf32> -> vector<2x8x8xf32>
    %cst_17 = arith.constant dense<0xFF800000> : vector<2x8xf32>
    %51 = vector.multi_reduction <maximumf>, %50, %cst_17 [2] : vector<2x8x8xf32> to vector<2x8xf32>
    %52 = vector.shape_cast %51 : vector<2x8xf32> to vector<2x8x1xf32>
    %53 = vector.broadcast %52 : vector<2x8x1xf32> to vector<2x8x8xf32>
    %54 = arith.subf %50, %53 : vector<2x8x8xf32>
    %55 = math.exp %54 : vector<2x8x8xf32>
    %cst_18 = arith.constant dense<0.000000e+00> : vector<2x8xf32>
    %56 = vector.multi_reduction <add>, %55, %cst_18 [2] : vector<2x8x8xf32> to vector<2x8xf32>
    %57 = vector.shape_cast %56 : vector<2x8xf32> to vector<2x8x1xf32>
    %58 = tpu.reciprocal %57 {approx = true} : vector<2x8x1xf32> -> vector<2x8x1xf32>
    %59 = vector.broadcast %58 : vector<2x8x1xf32> to vector<2x8x8xf32>
    %60 = arith.mulf %55, %59 : vector<2x8x8xf32>
    %61 = vector.extract_strided_slice %17 {offsets = [0, 0, 64], sizes = [2, 8, 32], strides = [1, 1, 1]} : vector<2x8x128xf32> to vector<2x8x32xf32>
    %cst_19 = arith.constant dense<0.000000e+00> : vector<2x8x32xf32>
    %62 = tpu.matmul %60, %61, %cst_19 {dimension_numbers = #tpu.dot_dimension_numbers<[2], [1], [1], [2], [0, 0, 0, 1, 1, 2], [0], [0]>} : vector<2x8x8xf32>, vector<2x8x32xf32>, vector<2x8x32xf32> -> vector<2x8x32xf32>
    %63 = vector.extract_strided_slice %13 {offsets = [0, 0, 96], sizes = [2, 8, 32], strides = [1, 1, 1]} : vector<2x8x128xf32> to vector<2x8x32xf32>
    %64 = vector.extract_strided_slice %15 {offsets = [0, 0, 96], sizes = [2, 8, 32], strides = [1, 1, 1]} : vector<2x8x128xf32> to vector<2x8x32xf32>
    %cst_20 = arith.constant dense<0.000000e+00> : vector<2x8x8xf32>
    %65 = tpu.matmul %63, %64, %cst_20 {dimension_numbers = #tpu.dot_dimension_numbers<[2], [2], [1], [1], [0, 0, 0, 1, 1, 1], [0], [0]>} : vector<2x8x32xf32>, vector<2x8x32xf32>, vector<2x8x8xf32> -> vector<2x8x8xf32>
    %cst_21 = arith.constant dense<0xFF800000> : vector<2x8xf32>
    %66 = vector.multi_reduction <maximumf>, %65, %cst_21 [2] : vector<2x8x8xf32> to vector<2x8xf32>
    %67 = vector.shape_cast %66 : vector<2x8xf32> to vector<2x8x1xf32>
    %68 = vector.broadcast %67 : vector<2x8x1xf32> to vector<2x8x8xf32>
    %69 = arith.subf %65, %68 : vector<2x8x8xf32>
    %70 = math.exp %69 : vector<2x8x8xf32>
    %cst_22 = arith.constant dense<0.000000e+00> : vector<2x8xf32>
    %71 = vector.multi_reduction <add>, %70, %cst_22 [2] : vector<2x8x8xf32> to vector<2x8xf32>
    %72 = vector.shape_cast %71 : vector<2x8xf32> to vector<2x8x1xf32>
    %73 = tpu.reciprocal %72 {approx = true} : vector<2x8x1xf32> -> vector<2x8x1xf32>
    %74 = vector.broadcast %73 : vector<2x8x1xf32> to vector<2x8x8xf32>
    %75 = arith.mulf %70, %74 : vector<2x8x8xf32>
    %76 = vector.extract_strided_slice %17 {offsets = [0, 0, 96], sizes = [2, 8, 32], strides = [1, 1, 1]} : vector<2x8x128xf32> to vector<2x8x32xf32>
    %cst_23 = arith.constant dense<0.000000e+00> : vector<2x8x32xf32>
    %77 = tpu.matmul %75, %76, %cst_23 {dimension_numbers = #tpu.dot_dimension_numbers<[2], [1], [1], [2], [0, 0, 0, 1, 1, 2], [0], [0]>} : vector<2x8x8xf32>, vector<2x8x32xf32>, vector<2x8x32xf32> -> vector<2x8x32xf32>
    %78 = tpu.concatenate %32, %47, %62, %77 in 2 : vector<2x8x32xf32>, vector<2x8x32xf32>, vector<2x8x32xf32>, vector<2x8x32xf32> -> vector<2x8x128xf32>
    %79 = vector.shape_cast %78 : vector<2x8x128xf32> to vector<16x128xf32>
    %c0_24 = arith.constant 0 : index
    %c0_25 = arith.constant 0 : index
    %c0_26 = arith.constant 0 : index
    %80 = vector.load %arg5[%c0_24, %c0_25, %c0_26] : memref<1x128x128xbf16, #tpu.memory_space<vmem>>, vector<1x128x128xbf16>
    %81 = vector.shape_cast %80 : vector<1x128x128xbf16> to vector<128x128xbf16>
    %c0_27 = arith.constant 0 : index
    %c0_28 = arith.constant 0 : index
    %c0_29 = arith.constant 0 : index
    %82 = vector.load %arg6[%c0_27, %c0_28, %c0_29] : memref<1x1x128xf32, #tpu.memory_space<vmem>>, vector<1x1x128xf32>
    %83 = vector.shape_cast %82 : vector<1x1x128xf32> to vector<1x128xf32>
    %84 = arith.truncf %79 : vector<16x128xf32> to vector<16x128xbf16>
    %cst_30 = arith.constant dense<0.000000e+00> : vector<16x128xf32>
    %85 = tpu.matmul %84, %81, %cst_30 {dimension_numbers = #tpu.dot_dimension_numbers<[1], [0], [0], [1], [0, 0, 1, 1], [], []>} : vector<16x128xbf16>, vector<128x128xbf16>, vector<16x128xf32> -> vector<16x128xf32>
    %86 = vector.broadcast %83 : vector<1x128xf32> to vector<16x128xf32>
    %87 = arith.addf %85, %86 : vector<16x128xf32>
    %c0_31 = arith.constant 0 : index
    %c0_32 = arith.constant 0 : index
    %c0_33 = arith.constant 0 : index
    %88 = vector.load %arg7[%c0_31, %c0_32, %c0_33] : memref<1x1x128xf32, #tpu.memory_space<vmem>>, vector<1x1x128xf32>
    %89 = vector.shape_cast %88 : vector<1x1x128xf32> to vector<1x128xf32>
    %c0_34 = arith.constant 0 : index
    %c0_35 = arith.constant 0 : index
    %c0_36 = arith.constant 0 : index
    %90 = vector.load %arg8[%c0_34, %c0_35, %c0_36] : memref<1x1x128xf32, #tpu.memory_space<vmem>>, vector<1x1x128xf32>
    %91 = vector.shape_cast %90 : vector<1x1x128xf32> to vector<1x128xf32>
    %92 = arith.addf %3, %87 : vector<16x128xf32>
    %cst_37 = arith.constant dense<0.000000e+00> : vector<16xf32>
    %93 = vector.multi_reduction <add>, %92, %cst_37 [1] : vector<16x128xf32> to vector<16xf32>
    %94 = vector.shape_cast %93 : vector<16xf32> to vector<16x1xf32>
    %cst_38 = arith.constant 1.280000e+02 : f32
    %95 = vector.broadcast %cst_38 : f32 to vector<16x1xf32>
    %96 = arith.divf %94, %95 : vector<16x1xf32>
    %97 = arith.mulf %92, %92 : vector<16x128xf32>
    %cst_39 = arith.constant dense<0.000000e+00> : vector<16xf32>
    %98 = vector.multi_reduction <add>, %97, %cst_39 [1] : vector<16x128xf32> to vector<16xf32>
    %99 = vector.shape_cast %98 : vector<16xf32> to vector<16x1xf32>
    %cst_40 = arith.constant 1.280000e+02 : f32
    %100 = vector.broadcast %cst_40 : f32 to vector<16x1xf32>
    %101 = arith.divf %99, %100 : vector<16x1xf32>
    %102 = arith.mulf %96, %96 : vector<16x1xf32>
    %103 = arith.subf %101, %102 : vector<16x1xf32>
    %cst_41 = arith.constant 9.99999974E-6 : f32
    %104 = vector.broadcast %cst_41 : f32 to vector<16x1xf32>
    %105 = arith.addf %103, %104 : vector<16x1xf32>
    %106 = math.rsqrt %105 : vector<16x1xf32>
    %107 = vector.broadcast %96 : vector<16x1xf32> to vector<16x128xf32>
    %108 = arith.subf %92, %107 : vector<16x128xf32>
    %109 = vector.broadcast %106 : vector<16x1xf32> to vector<16x128xf32>
    %110 = arith.mulf %108, %109 : vector<16x128xf32>
    %111 = vector.broadcast %89 : vector<1x128xf32> to vector<16x128xf32>
    %112 = arith.mulf %110, %111 : vector<16x128xf32>
    %113 = vector.broadcast %91 : vector<1x128xf32> to vector<16x128xf32>
    %114 = arith.addf %112, %113 : vector<16x128xf32>
    %c0_42 = arith.constant 0 : index
    %c0_43 = arith.constant 0 : index
    %c0_44 = arith.constant 0 : index
    %115 = vector.load %arg9[%c0_42, %c0_43, %c0_44] : memref<1x128x256xbf16, #tpu.memory_space<vmem>>, vector<1x128x256xbf16>
    %116 = vector.shape_cast %115 : vector<1x128x256xbf16> to vector<128x256xbf16>
    %c0_45 = arith.constant 0 : index
    %c0_46 = arith.constant 0 : index
    %c0_47 = arith.constant 0 : index
    %117 = vector.load %arg10[%c0_45, %c0_46, %c0_47] : memref<1x1x256xf32, #tpu.memory_space<vmem>>, vector<1x1x256xf32>
    %118 = vector.shape_cast %117 : vector<1x1x256xf32> to vector<1x256xf32>
    %119 = arith.truncf %114 : vector<16x128xf32> to vector<16x128xbf16>
    %cst_48 = arith.constant dense<0.000000e+00> : vector<16x256xf32>
    %120 = tpu.matmul %119, %116, %cst_48 {dimension_numbers = #tpu.dot_dimension_numbers<[1], [0], [0], [1], [0, 0, 1, 1], [], []>} : vector<16x128xbf16>, vector<128x256xbf16>, vector<16x256xf32> -> vector<16x256xf32>
    %121 = vector.broadcast %118 : vector<1x256xf32> to vector<16x256xf32>
    %122 = arith.addf %120, %121 : vector<16x256xf32>
    %cst_49 = arith.constant 0.000000e+00 : f32
    %123 = vector.broadcast %cst_49 : f32 to vector<16x256xf32>
    %124 = arith.maximumf %122, %123 : vector<16x256xf32>
    %c0_50 = arith.constant 0 : index
    %c0_51 = arith.constant 0 : index
    %c0_52 = arith.constant 0 : index
    %125 = vector.load %arg11[%c0_50, %c0_51, %c0_52] : memref<1x256x128xbf16, #tpu.memory_space<vmem>>, vector<1x256x128xbf16>
    %126 = vector.shape_cast %125 : vector<1x256x128xbf16> to vector<256x128xbf16>
    %c0_53 = arith.constant 0 : index
    %c0_54 = arith.constant 0 : index
    %c0_55 = arith.constant 0 : index
    %127 = vector.load %arg12[%c0_53, %c0_54, %c0_55] : memref<1x1x128xf32, #tpu.memory_space<vmem>>, vector<1x1x128xf32>
    %128 = vector.shape_cast %127 : vector<1x1x128xf32> to vector<1x128xf32>
    %129 = arith.truncf %124 : vector<16x256xf32> to vector<16x256xbf16>
    %cst_56 = arith.constant dense<0.000000e+00> : vector<16x128xf32>
    %130 = tpu.matmul %129, %126, %cst_56 {dimension_numbers = #tpu.dot_dimension_numbers<[1], [0], [0], [1], [0, 0, 1, 1], [], []>} : vector<16x256xbf16>, vector<256x128xbf16>, vector<16x128xf32> -> vector<16x128xf32>
    %131 = vector.broadcast %128 : vector<1x128xf32> to vector<16x128xf32>
    %132 = arith.addf %130, %131 : vector<16x128xf32>
    %c0_57 = arith.constant 0 : index
    %c0_58 = arith.constant 0 : index
    %c0_59 = arith.constant 0 : index
    %133 = vector.load %arg13[%c0_57, %c0_58, %c0_59] : memref<1x1x128xf32, #tpu.memory_space<vmem>>, vector<1x1x128xf32>
    %134 = vector.shape_cast %133 : vector<1x1x128xf32> to vector<1x128xf32>
    %c0_60 = arith.constant 0 : index
    %c0_61 = arith.constant 0 : index
    %c0_62 = arith.constant 0 : index
    %135 = vector.load %arg14[%c0_60, %c0_61, %c0_62] : memref<1x1x128xf32, #tpu.memory_space<vmem>>, vector<1x1x128xf32>
    %136 = vector.shape_cast %135 : vector<1x1x128xf32> to vector<1x128xf32>
    %137 = arith.addf %114, %132 : vector<16x128xf32>
    %cst_63 = arith.constant dense<0.000000e+00> : vector<16xf32>
    %138 = vector.multi_reduction <add>, %137, %cst_63 [1] : vector<16x128xf32> to vector<16xf32>
    %139 = vector.shape_cast %138 : vector<16xf32> to vector<16x1xf32>
    %cst_64 = arith.constant 1.280000e+02 : f32
    %140 = vector.broadcast %cst_64 : f32 to vector<16x1xf32>
    %141 = arith.divf %139, %140 : vector<16x1xf32>
    %142 = arith.mulf %137, %137 : vector<16x128xf32>
    %cst_65 = arith.constant dense<0.000000e+00> : vector<16xf32>
    %143 = vector.multi_reduction <add>, %142, %cst_65 [1] : vector<16x128xf32> to vector<16xf32>
    %144 = vector.shape_cast %143 : vector<16xf32> to vector<16x1xf32>
    %cst_66 = arith.constant 1.280000e+02 : f32
    %145 = vector.broadcast %cst_66 : f32 to vector<16x1xf32>
    %146 = arith.divf %144, %145 : vector<16x1xf32>
    %147 = arith.mulf %141, %141 : vector<16x1xf32>
    %148 = arith.subf %146, %147 : vector<16x1xf32>
    %cst_67 = arith.constant 9.99999974E-6 : f32
    %149 = vector.broadcast %cst_67 : f32 to vector<16x1xf32>
    %150 = arith.addf %148, %149 : vector<16x1xf32>
    %151 = math.rsqrt %150 : vector<16x1xf32>
    %152 = vector.broadcast %141 : vector<16x1xf32> to vector<16x128xf32>
    %153 = arith.subf %137, %152 : vector<16x128xf32>
    %154 = vector.broadcast %151 : vector<16x1xf32> to vector<16x128xf32>
    %155 = arith.mulf %153, %154 : vector<16x128xf32>
    %156 = vector.broadcast %134 : vector<1x128xf32> to vector<16x128xf32>
    %157 = arith.mulf %155, %156 : vector<16x128xf32>
    %158 = vector.broadcast %136 : vector<1x128xf32> to vector<16x128xf32>
    %159 = arith.addf %157, %158 : vector<16x128xf32>
    %c0_68 = arith.constant 0 : index
    %c0_69 = arith.constant 0 : index
    %160 = vector.load %arg16[%c0_68, %c0_69] : memref<16x128xf32, #tpu.memory_space<vmem>>, vector<16x128xf32>
    tpu.vector_store %arg16[%c0_68, %c0_69], %159 {strides = array<i32>} : memref<16x128xf32, #tpu.memory_space<vmem>>, vector<16x128xf32>,
    %c1_i32 = arith.constant 1 : i32
    %161 = arith.cmpi eq, %arg1, %c1_i32 : i32
    %162 = arith.extui %161 : i1 to i32
    %c0_i32_70 = arith.constant 0 : i32
    %163 = arith.cmpi ne, %162, %c0_i32_70 : i32
    scf.if %163 {
      %c0_71 = arith.constant 0 : index
      %c0_72 = arith.constant 0 : index
      %164 = vector.load %arg15[%c0_71, %c0_72] : memref<16x128xf32, #tpu.memory_space<vmem>>, vector<16x128xf32>
      tpu.vector_store %arg15[%c0_71, %c0_72], %159 {strides = array<i32>} : memref<16x128xf32, #tpu.memory_space<vmem>>, vector<16x128xf32>,
    } else {
    }
    return
  }
  func.func @transform_0(%arg0: i32, %arg1: i32) -> (i32, i32) {
    %c0_i32 = arith.constant 0 : i32
    %c0_i32_0 = arith.constant 0 : i32
    return %arg0, %c0_i32 : i32, i32
  }
  func.func @transform_1(%arg0: i32, %arg1: i32) -> (i32, i32, i32) {
    %c0_i32 = arith.constant 0 : i32
    %c0_i32_0 = arith.constant 0 : i32
    %c0_i32_1 = arith.constant 0 : i32
    return %arg1, %c0_i32, %c0_i32_0 : i32, i32, i32
  }
  func.func @transform_2(%arg0: i32, %arg1: i32) -> (i32, i32, i32) {
    %c0_i32 = arith.constant 0 : i32
    %c0_i32_0 = arith.constant 0 : i32
    %c0_i32_1 = arith.constant 0 : i32
    return %arg1, %c0_i32, %c0_i32_0 : i32, i32, i32
  }
  func.func @transform_3(%arg0: i32, %arg1: i32) -> (i32, i32, i32) {
    %c0_i32 = arith.constant 0 : i32
    %c0_i32_0 = arith.constant 0 : i32
    %c0_i32_1 = arith.constant 0 : i32
    return %arg1, %c0_i32, %c0_i32_0 : i32, i32, i32
  }
  func.func @transform_4(%arg0: i32, %arg1: i32) -> (i32, i32, i32) {
    %c0_i32 = arith.constant 0 : i32
    %c0_i32_0 = arith.constant 0 : i32
    %c0_i32_1 = arith.constant 0 : i32
    return %arg1, %c0_i32, %c0_i32_0 : i32, i32, i32
  }
  func.func @transform_5(%arg0: i32, %arg1: i32) -> (i32, i32, i32) {
    %c0_i32 = arith.constant 0 : i32
    %c0_i32_0 = arith.constant 0 : i32
    %c0_i32_1 = arith.constant 0 : i32
    return %arg1, %c0_i32, %c0_i32_0 : i32, i32, i32
  }
  func.func @transform_6(%arg0: i32, %arg1: i32) -> (i32, i32, i32) {
    %c0_i32 = arith.constant 0 : i32
    %c0_i32_0 = arith.constant 0 : i32
    %c0_i32_1 = arith.constant 0 : i32
    return %arg1, %c0_i32, %c0_i32_0 : i32, i32, i32
  }
  func.func @transform_7(%arg0: i32, %arg1: i32) -> (i32, i32, i32) {
    %c0_i32 = arith.constant 0 : i32
    %c0_i32_0 = arith.constant 0 : i32
    %c0_i32_1 = arith.constant 0 : i32
    return %arg1, %c0_i32, %c0_i32_0 : i32, i32, i32
  }
  func.func @transform_8(%arg0: i32, %arg1: i32) -> (i32, i32, i32) {
    %c0_i32 = arith.constant 0 : i32
    %c0_i32_0 = arith.constant 0 : i32
    %c0_i32_1 = arith.constant 0 : i32
    return %arg1, %c0_i32, %c0_i32_0 : i32, i32, i32
  }
  func.func @transform_9(%arg0: i32, %arg1: i32) -> (i32, i32, i32) {
    %c0_i32 = arith.constant 0 : i32
    %c0_i32_0 = arith.constant 0 : i32
    %c0_i32_1 = arith.constant 0 : i32
    return %arg1, %c0_i32, %c0_i32_0 : i32, i32, i32
  }
  func.func @transform_10(%arg0: i32, %arg1: i32) -> (i32, i32, i32) {
    %c0_i32 = arith.constant 0 : i32
    %c0_i32_0 = arith.constant 0 : i32
    %c0_i32_1 = arith.constant 0 : i32
    return %arg1, %c0_i32, %c0_i32_0 : i32, i32, i32
  }
  func.func @transform_11(%arg0: i32, %arg1: i32) -> (i32, i32, i32) {
    %c0_i32 = arith.constant 0 : i32
    %c0_i32_0 = arith.constant 0 : i32
    %c0_i32_1 = arith.constant 0 : i32
    return %arg1, %c0_i32, %c0_i32_0 : i32, i32, i32
  }
  func.func @transform_12(%arg0: i32, %arg1: i32) -> (i32, i32, i32) {
    %c0_i32 = arith.constant 0 : i32
    %c0_i32_0 = arith.constant 0 : i32
    %c0_i32_1 = arith.constant 0 : i32
    return %arg1, %c0_i32, %c0_i32_0 : i32, i32, i32
  }
  func.func @transform_13(%arg0: i32, %arg1: i32) -> (i32, i32) {
    %c0_i32 = arith.constant 0 : i32
    %c0_i32_0 = arith.constant 0 : i32
    return %arg0, %c0_i32 : i32, i32
  }
}

module attributes {stable_mosaic.version = 11 : i64} {
  func.func @_decoder_stack_kernel(%arg0: i32, %arg1: i32, %arg2: memref<16x128xf32, #tpu.memory_space<vmem>>, %arg3: memref<16x128xf32, #tpu.memory_space<vmem>>, %arg4: memref<1x128x384xbf16, #tpu.memory_space<vmem>>, %arg5: memref<1x1x384xf32, #tpu.memory_space<vmem>>, %arg6: memref<1x128x128xbf16, #tpu.memory_space<vmem>>, %arg7: memref<1x1x128xf32, #tpu.memory_space<vmem>>, %arg8: memref<1x1x128xf32, #tpu.memory_space<vmem>>, %arg9: memref<1x1x128xf32, #tpu.memory_space<vmem>>, %arg10: memref<1x128x128xbf16, #tpu.memory_space<vmem>>, %arg11: memref<1x1x128xf32, #tpu.memory_space<vmem>>, %arg12: memref<1x128x256xbf16, #tpu.memory_space<vmem>>, %arg13: memref<1x1x256xf32, #tpu.memory_space<vmem>>, %arg14: memref<1x128x128xbf16, #tpu.memory_space<vmem>>, %arg15: memref<1x1x128xf32, #tpu.memory_space<vmem>>, %arg16: memref<1x1x128xf32, #tpu.memory_space<vmem>>, %arg17: memref<1x1x128xf32, #tpu.memory_space<vmem>>, %arg18: memref<1x128x256xbf16, #tpu.memory_space<vmem>>, %arg19: memref<1x1x256xf32, #tpu.memory_space<vmem>>, %arg20: memref<1x256x128xbf16, #tpu.memory_space<vmem>>, %arg21: memref<1x1x128xf32, #tpu.memory_space<vmem>>, %arg22: memref<1x1x128xf32, #tpu.memory_space<vmem>>, %arg23: memref<1x1x128xf32, #tpu.memory_space<vmem>>, %arg24: memref<128x128xbf16, #tpu.memory_space<vmem>>, %arg25: memref<1x128xf32, #tpu.memory_space<vmem>>, %arg26: memref<16x128xf32, #tpu.memory_space<vmem>>, %arg27: memref<16x128xf32, #tpu.memory_space<vmem>>) attributes {dimension_semantics = [#tpu.dimension_semantics<parallel>, #tpu.dimension_semantics<arbitrary>], iteration_bounds = array<i64: 1, 2>, scalar_prefetch = 0 : i64, scratch_operands = 1 : i64, tpu.core_type = #tpu.core_type<tc>, window_params = [{transform_indices = @transform_0, window_bounds = array<i64: 16, 128>}, {transform_indices = @transform_1, window_bounds = array<i64: 16, 128>}, {transform_indices = @transform_2, window_bounds = array<i64: 1, 128, 384>}, {transform_indices = @transform_3, window_bounds = array<i64: 1, 1, 384>}, {transform_indices = @transform_4, window_bounds = array<i64: 1, 128, 128>}, {transform_indices = @transform_5, window_bounds = array<i64: 1, 1, 128>}, {transform_indices = @transform_6, window_bounds = array<i64: 1, 1, 128>}, {transform_indices = @transform_7, window_bounds = array<i64: 1, 1, 128>}, {transform_indices = @transform_8, window_bounds = array<i64: 1, 128, 128>}, {transform_indices = @transform_9, window_bounds = array<i64: 1, 1, 128>}, {transform_indices = @transform_10, window_bounds = array<i64: 1, 128, 256>}, {transform_indices = @transform_11, window_bounds = array<i64: 1, 1, 256>}, {transform_indices = @transform_12, window_bounds = array<i64: 1, 128, 128>}, {transform_indices = @transform_13, window_bounds = array<i64: 1, 1, 128>}, {transform_indices = @transform_14, window_bounds = array<i64: 1, 1, 128>}, {transform_indices = @transform_15, window_bounds = array<i64: 1, 1, 128>}, {transform_indices = @transform_16, window_bounds = array<i64: 1, 128, 256>}, {transform_indices = @transform_17, window_bounds = array<i64: 1, 1, 256>}, {transform_indices = @transform_18, window_bounds = array<i64: 1, 256, 128>}, {transform_indices = @transform_19, window_bounds = array<i64: 1, 1, 128>}, {transform_indices = @transform_20, window_bounds = array<i64: 1, 1, 128>}, {transform_indices = @transform_21, window_bounds = array<i64: 1, 1, 128>}, {pipeline_mode = #tpu.pipeline_mode<synchronous>, transform_indices = @transform_22, window_bounds = array<i64: 128, 128>}, {pipeline_mode = #tpu.pipeline_mode<synchronous>, transform_indices = @transform_23, window_bounds = array<i64: 1, 128>}, {transform_indices = @transform_24, window_bounds = array<i64: 16, 128>}]} {
    %c0_i32 = arith.constant 0 : i32
    %0 = arith.cmpi eq, %arg1, %c0_i32 : i32
    %1 = arith.extui %0 : i1 to i32
    %c0_i32_0 = arith.constant 0 : i32
    %2 = arith.cmpi ne, %1, %c0_i32_0 : i32
    scf.if %2 {
      %c0_121 = arith.constant 0 : index
      %c0_122 = arith.constant 0 : index
      %283 = vector.load %arg2[%c0_121, %c0_122] : memref<16x128xf32, #tpu.memory_space<vmem>>, vector<16x128xf32>
      %c0_123 = arith.constant 0 : index
      %c0_124 = arith.constant 0 : index
      %284 = vector.load %arg27[%c0_123, %c0_124] : memref<16x128xf32, #tpu.memory_space<vmem>>, vector<16x128xf32>
      tpu.vector_store %arg27[%c0_123, %c0_124], %283 {strides = array<i32>} : memref<16x128xf32, #tpu.memory_space<vmem>>, vector<16x128xf32>,
    } else {
    }
    %c0 = arith.constant 0 : index
    %c0_1 = arith.constant 0 : index
    %3 = vector.load %arg27[%c0, %c0_1] : memref<16x128xf32, #tpu.memory_space<vmem>>, vector<16x128xf32>
    %c0_2 = arith.constant 0 : index
    %c0_3 = arith.constant 0 : index
    %4 = vector.load %arg3[%c0_2, %c0_3] : memref<16x128xf32, #tpu.memory_space<vmem>>, vector<16x128xf32>
    %c0_4 = arith.constant 0 : index
    %c0_5 = arith.constant 0 : index
    %c0_6 = arith.constant 0 : index
    %5 = vector.load %arg4[%c0_4, %c0_5, %c0_6] : memref<1x128x384xbf16, #tpu.memory_space<vmem>>, vector<1x128x384xbf16>
    %6 = vector.shape_cast %5 : vector<1x128x384xbf16> to vector<128x384xbf16>
    %c0_7 = arith.constant 0 : index
    %c0_8 = arith.constant 0 : index
    %c0_9 = arith.constant 0 : index
    %7 = vector.load %arg5[%c0_7, %c0_8, %c0_9] : memref<1x1x384xf32, #tpu.memory_space<vmem>>, vector<1x1x384xf32>
    %8 = vector.shape_cast %7 : vector<1x1x384xf32> to vector<1x384xf32>
    %9 = arith.truncf %3 : vector<16x128xf32> to vector<16x128xbf16>
    %cst = arith.constant dense<0.000000e+00> : vector<16x384xf32>
    %10 = tpu.matmul %9, %6, %cst {dimension_numbers = #tpu.dot_dimension_numbers<[1], [0], [0], [1], [0, 0, 1, 1], [], []>} : vector<16x128xbf16>, vector<128x384xbf16>, vector<16x384xf32> -> vector<16x384xf32>
    %11 = vector.broadcast %8 : vector<1x384xf32> to vector<16x384xf32>
    %12 = arith.addf %10, %11 : vector<16x384xf32>
    %13 = vector.extract_strided_slice %12 {offsets = [0, 0], sizes = [16, 128], strides = [1, 1]} : vector<16x384xf32> to vector<16x128xf32>
    %14 = vector.shape_cast %13 : vector<16x128xf32> to vector<2x8x128xf32>
    %15 = vector.extract_strided_slice %12 {offsets = [0, 128], sizes = [16, 128], strides = [1, 1]} : vector<16x384xf32> to vector<16x128xf32>
    %16 = vector.shape_cast %15 : vector<16x128xf32> to vector<2x8x128xf32>
    %17 = vector.extract_strided_slice %12 {offsets = [0, 256], sizes = [16, 128], strides = [1, 1]} : vector<16x384xf32> to vector<16x128xf32>
    %18 = vector.shape_cast %17 : vector<16x128xf32> to vector<2x8x128xf32>
    %19 = vector.extract_strided_slice %14 {offsets = [0, 0, 0], sizes = [2, 8, 32], strides = [1, 1, 1]} : vector<2x8x128xf32> to vector<2x8x32xf32>
    %20 = vector.extract_strided_slice %16 {offsets = [0, 0, 0], sizes = [2, 8, 32], strides = [1, 1, 1]} : vector<2x8x128xf32> to vector<2x8x32xf32>
    %cst_10 = arith.constant dense<0.000000e+00> : vector<2x8x8xf32>
    %21 = tpu.matmul %19, %20, %cst_10 {dimension_numbers = #tpu.dot_dimension_numbers<[2], [2], [1], [1], [0, 0, 0, 1, 1, 1], [0], [0]>} : vector<2x8x32xf32>, vector<2x8x32xf32>, vector<2x8x8xf32> -> vector<2x8x8xf32>
    %cst_11 = arith.constant dense<0xFF800000> : vector<2x8xf32>
    %22 = vector.multi_reduction <maximumf>, %21, %cst_11 [2] : vector<2x8x8xf32> to vector<2x8xf32>
    %23 = vector.shape_cast %22 : vector<2x8xf32> to vector<2x8x1xf32>
    %24 = vector.broadcast %23 : vector<2x8x1xf32> to vector<2x8x8xf32>
    %25 = arith.subf %21, %24 : vector<2x8x8xf32>
    %26 = math.exp %25 : vector<2x8x8xf32>
    %cst_12 = arith.constant dense<0.000000e+00> : vector<2x8xf32>
    %27 = vector.multi_reduction <add>, %26, %cst_12 [2] : vector<2x8x8xf32> to vector<2x8xf32>
    %28 = vector.shape_cast %27 : vector<2x8xf32> to vector<2x8x1xf32>
    %29 = tpu.reciprocal %28 {approx = true} : vector<2x8x1xf32> -> vector<2x8x1xf32>
    %30 = vector.broadcast %29 : vector<2x8x1xf32> to vector<2x8x8xf32>
    %31 = arith.mulf %26, %30 : vector<2x8x8xf32>
    %32 = vector.extract_strided_slice %18 {offsets = [0, 0, 0], sizes = [2, 8, 32], strides = [1, 1, 1]} : vector<2x8x128xf32> to vector<2x8x32xf32>
    %cst_13 = arith.constant dense<0.000000e+00> : vector<2x8x32xf32>
    %33 = tpu.matmul %31, %32, %cst_13 {dimension_numbers = #tpu.dot_dimension_numbers<[2], [1], [1], [2], [0, 0, 0, 1, 1, 2], [0], [0]>} : vector<2x8x8xf32>, vector<2x8x32xf32>, vector<2x8x32xf32> -> vector<2x8x32xf32>
    %34 = vector.extract_strided_slice %14 {offsets = [0, 0, 32], sizes = [2, 8, 32], strides = [1, 1, 1]} : vector<2x8x128xf32> to vector<2x8x32xf32>
    %35 = vector.extract_strided_slice %16 {offsets = [0, 0, 32], sizes = [2, 8, 32], strides = [1, 1, 1]} : vector<2x8x128xf32> to vector<2x8x32xf32>
    %cst_14 = arith.constant dense<0.000000e+00> : vector<2x8x8xf32>
    %36 = tpu.matmul %34, %35, %cst_14 {dimension_numbers = #tpu.dot_dimension_numbers<[2], [2], [1], [1], [0, 0, 0, 1, 1, 1], [0], [0]>} : vector<2x8x32xf32>, vector<2x8x32xf32>, vector<2x8x8xf32> -> vector<2x8x8xf32>
    %cst_15 = arith.constant dense<0xFF800000> : vector<2x8xf32>
    %37 = vector.multi_reduction <maximumf>, %36, %cst_15 [2] : vector<2x8x8xf32> to vector<2x8xf32>
    %38 = vector.shape_cast %37 : vector<2x8xf32> to vector<2x8x1xf32>
    %39 = vector.broadcast %38 : vector<2x8x1xf32> to vector<2x8x8xf32>
    %40 = arith.subf %36, %39 : vector<2x8x8xf32>
    %41 = math.exp %40 : vector<2x8x8xf32>
    %cst_16 = arith.constant dense<0.000000e+00> : vector<2x8xf32>
    %42 = vector.multi_reduction <add>, %41, %cst_16 [2] : vector<2x8x8xf32> to vector<2x8xf32>
    %43 = vector.shape_cast %42 : vector<2x8xf32> to vector<2x8x1xf32>
    %44 = tpu.reciprocal %43 {approx = true} : vector<2x8x1xf32> -> vector<2x8x1xf32>
    %45 = vector.broadcast %44 : vector<2x8x1xf32> to vector<2x8x8xf32>
    %46 = arith.mulf %41, %45 : vector<2x8x8xf32>
    %47 = vector.extract_strided_slice %18 {offsets = [0, 0, 32], sizes = [2, 8, 32], strides = [1, 1, 1]} : vector<2x8x128xf32> to vector<2x8x32xf32>
    %cst_17 = arith.constant dense<0.000000e+00> : vector<2x8x32xf32>
    %48 = tpu.matmul %46, %47, %cst_17 {dimension_numbers = #tpu.dot_dimension_numbers<[2], [1], [1], [2], [0, 0, 0, 1, 1, 2], [0], [0]>} : vector<2x8x8xf32>, vector<2x8x32xf32>, vector<2x8x32xf32> -> vector<2x8x32xf32>
    %49 = vector.extract_strided_slice %14 {offsets = [0, 0, 64], sizes = [2, 8, 32], strides = [1, 1, 1]} : vector<2x8x128xf32> to vector<2x8x32xf32>
    %50 = vector.extract_strided_slice %16 {offsets = [0, 0, 64], sizes = [2, 8, 32], strides = [1, 1, 1]} : vector<2x8x128xf32> to vector<2x8x32xf32>
    %cst_18 = arith.constant dense<0.000000e+00> : vector<2x8x8xf32>
    %51 = tpu.matmul %49, %50, %cst_18 {dimension_numbers = #tpu.dot_dimension_numbers<[2], [2], [1], [1], [0, 0, 0, 1, 1, 1], [0], [0]>} : vector<2x8x32xf32>, vector<2x8x32xf32>, vector<2x8x8xf32> -> vector<2x8x8xf32>
    %cst_19 = arith.constant dense<0xFF800000> : vector<2x8xf32>
    %52 = vector.multi_reduction <maximumf>, %51, %cst_19 [2] : vector<2x8x8xf32> to vector<2x8xf32>
    %53 = vector.shape_cast %52 : vector<2x8xf32> to vector<2x8x1xf32>
    %54 = vector.broadcast %53 : vector<2x8x1xf32> to vector<2x8x8xf32>
    %55 = arith.subf %51, %54 : vector<2x8x8xf32>
    %56 = math.exp %55 : vector<2x8x8xf32>
    %cst_20 = arith.constant dense<0.000000e+00> : vector<2x8xf32>
    %57 = vector.multi_reduction <add>, %56, %cst_20 [2] : vector<2x8x8xf32> to vector<2x8xf32>
    %58 = vector.shape_cast %57 : vector<2x8xf32> to vector<2x8x1xf32>
    %59 = tpu.reciprocal %58 {approx = true} : vector<2x8x1xf32> -> vector<2x8x1xf32>
    %60 = vector.broadcast %59 : vector<2x8x1xf32> to vector<2x8x8xf32>
    %61 = arith.mulf %56, %60 : vector<2x8x8xf32>
    %62 = vector.extract_strided_slice %18 {offsets = [0, 0, 64], sizes = [2, 8, 32], strides = [1, 1, 1]} : vector<2x8x128xf32> to vector<2x8x32xf32>
    %cst_21 = arith.constant dense<0.000000e+00> : vector<2x8x32xf32>
    %63 = tpu.matmul %61, %62, %cst_21 {dimension_numbers = #tpu.dot_dimension_numbers<[2], [1], [1], [2], [0, 0, 0, 1, 1, 2], [0], [0]>} : vector<2x8x8xf32>, vector<2x8x32xf32>, vector<2x8x32xf32> -> vector<2x8x32xf32>
    %64 = vector.extract_strided_slice %14 {offsets = [0, 0, 96], sizes = [2, 8, 32], strides = [1, 1, 1]} : vector<2x8x128xf32> to vector<2x8x32xf32>
    %65 = vector.extract_strided_slice %16 {offsets = [0, 0, 96], sizes = [2, 8, 32], strides = [1, 1, 1]} : vector<2x8x128xf32> to vector<2x8x32xf32>
    %cst_22 = arith.constant dense<0.000000e+00> : vector<2x8x8xf32>
    %66 = tpu.matmul %64, %65, %cst_22 {dimension_numbers = #tpu.dot_dimension_numbers<[2], [2], [1], [1], [0, 0, 0, 1, 1, 1], [0], [0]>} : vector<2x8x32xf32>, vector<2x8x32xf32>, vector<2x8x8xf32> -> vector<2x8x8xf32>
    %cst_23 = arith.constant dense<0xFF800000> : vector<2x8xf32>
    %67 = vector.multi_reduction <maximumf>, %66, %cst_23 [2] : vector<2x8x8xf32> to vector<2x8xf32>
    %68 = vector.shape_cast %67 : vector<2x8xf32> to vector<2x8x1xf32>
    %69 = vector.broadcast %68 : vector<2x8x1xf32> to vector<2x8x8xf32>
    %70 = arith.subf %66, %69 : vector<2x8x8xf32>
    %71 = math.exp %70 : vector<2x8x8xf32>
    %cst_24 = arith.constant dense<0.000000e+00> : vector<2x8xf32>
    %72 = vector.multi_reduction <add>, %71, %cst_24 [2] : vector<2x8x8xf32> to vector<2x8xf32>
    %73 = vector.shape_cast %72 : vector<2x8xf32> to vector<2x8x1xf32>
    %74 = tpu.reciprocal %73 {approx = true} : vector<2x8x1xf32> -> vector<2x8x1xf32>
    %75 = vector.broadcast %74 : vector<2x8x1xf32> to vector<2x8x8xf32>
    %76 = arith.mulf %71, %75 : vector<2x8x8xf32>
    %77 = vector.extract_strided_slice %18 {offsets = [0, 0, 96], sizes = [2, 8, 32], strides = [1, 1, 1]} : vector<2x8x128xf32> to vector<2x8x32xf32>
    %cst_25 = arith.constant dense<0.000000e+00> : vector<2x8x32xf32>
    %78 = tpu.matmul %76, %77, %cst_25 {dimension_numbers = #tpu.dot_dimension_numbers<[2], [1], [1], [2], [0, 0, 0, 1, 1, 2], [0], [0]>} : vector<2x8x8xf32>, vector<2x8x32xf32>, vector<2x8x32xf32> -> vector<2x8x32xf32>
    %79 = tpu.concatenate %33, %48, %63, %78 in 2 : vector<2x8x32xf32>, vector<2x8x32xf32>, vector<2x8x32xf32>, vector<2x8x32xf32> -> vector<2x8x128xf32>
    %80 = vector.shape_cast %79 : vector<2x8x128xf32> to vector<16x128xf32>
    %c0_26 = arith.constant 0 : index
    %c0_27 = arith.constant 0 : index
    %c0_28 = arith.constant 0 : index
    %81 = vector.load %arg6[%c0_26, %c0_27, %c0_28] : memref<1x128x128xbf16, #tpu.memory_space<vmem>>, vector<1x128x128xbf16>
    %82 = vector.shape_cast %81 : vector<1x128x128xbf16> to vector<128x128xbf16>
    %c0_29 = arith.constant 0 : index
    %c0_30 = arith.constant 0 : index
    %c0_31 = arith.constant 0 : index
    %83 = vector.load %arg7[%c0_29, %c0_30, %c0_31] : memref<1x1x128xf32, #tpu.memory_space<vmem>>, vector<1x1x128xf32>
    %84 = vector.shape_cast %83 : vector<1x1x128xf32> to vector<1x128xf32>
    %85 = arith.truncf %80 : vector<16x128xf32> to vector<16x128xbf16>
    %cst_32 = arith.constant dense<0.000000e+00> : vector<16x128xf32>
    %86 = tpu.matmul %85, %82, %cst_32 {dimension_numbers = #tpu.dot_dimension_numbers<[1], [0], [0], [1], [0, 0, 1, 1], [], []>} : vector<16x128xbf16>, vector<128x128xbf16>, vector<16x128xf32> -> vector<16x128xf32>
    %87 = vector.broadcast %84 : vector<1x128xf32> to vector<16x128xf32>
    %88 = arith.addf %86, %87 : vector<16x128xf32>
    %c0_33 = arith.constant 0 : index
    %c0_34 = arith.constant 0 : index
    %c0_35 = arith.constant 0 : index
    %89 = vector.load %arg8[%c0_33, %c0_34, %c0_35] : memref<1x1x128xf32, #tpu.memory_space<vmem>>, vector<1x1x128xf32>
    %90 = vector.shape_cast %89 : vector<1x1x128xf32> to vector<1x128xf32>
    %c0_36 = arith.constant 0 : index
    %c0_37 = arith.constant 0 : index
    %c0_38 = arith.constant 0 : index
    %91 = vector.load %arg9[%c0_36, %c0_37, %c0_38] : memref<1x1x128xf32, #tpu.memory_space<vmem>>, vector<1x1x128xf32>
    %92 = vector.shape_cast %91 : vector<1x1x128xf32> to vector<1x128xf32>
    %93 = arith.addf %3, %88 : vector<16x128xf32>
    %cst_39 = arith.constant dense<0.000000e+00> : vector<16xf32>
    %94 = vector.multi_reduction <add>, %93, %cst_39 [1] : vector<16x128xf32> to vector<16xf32>
    %95 = vector.shape_cast %94 : vector<16xf32> to vector<16x1xf32>
    %cst_40 = arith.constant 1.280000e+02 : f32
    %96 = vector.broadcast %cst_40 : f32 to vector<16x1xf32>
    %97 = arith.divf %95, %96 : vector<16x1xf32>
    %98 = arith.mulf %93, %93 : vector<16x128xf32>
    %cst_41 = arith.constant dense<0.000000e+00> : vector<16xf32>
    %99 = vector.multi_reduction <add>, %98, %cst_41 [1] : vector<16x128xf32> to vector<16xf32>
    %100 = vector.shape_cast %99 : vector<16xf32> to vector<16x1xf32>
    %cst_42 = arith.constant 1.280000e+02 : f32
    %101 = vector.broadcast %cst_42 : f32 to vector<16x1xf32>
    %102 = arith.divf %100, %101 : vector<16x1xf32>
    %103 = arith.mulf %97, %97 : vector<16x1xf32>
    %104 = arith.subf %102, %103 : vector<16x1xf32>
    %cst_43 = arith.constant 9.99999974E-6 : f32
    %105 = vector.broadcast %cst_43 : f32 to vector<16x1xf32>
    %106 = arith.addf %104, %105 : vector<16x1xf32>
    %107 = math.rsqrt %106 : vector<16x1xf32>
    %108 = vector.broadcast %97 : vector<16x1xf32> to vector<16x128xf32>
    %109 = arith.subf %93, %108 : vector<16x128xf32>
    %110 = vector.broadcast %107 : vector<16x1xf32> to vector<16x128xf32>
    %111 = arith.mulf %109, %110 : vector<16x128xf32>
    %112 = vector.broadcast %90 : vector<1x128xf32> to vector<16x128xf32>
    %113 = arith.mulf %111, %112 : vector<16x128xf32>
    %114 = vector.broadcast %92 : vector<1x128xf32> to vector<16x128xf32>
    %115 = arith.addf %113, %114 : vector<16x128xf32>
    %c0_44 = arith.constant 0 : index
    %c0_45 = arith.constant 0 : index
    %c0_46 = arith.constant 0 : index
    %116 = vector.load %arg10[%c0_44, %c0_45, %c0_46] : memref<1x128x128xbf16, #tpu.memory_space<vmem>>, vector<1x128x128xbf16>
    %117 = vector.shape_cast %116 : vector<1x128x128xbf16> to vector<128x128xbf16>
    %c0_47 = arith.constant 0 : index
    %c0_48 = arith.constant 0 : index
    %c0_49 = arith.constant 0 : index
    %118 = vector.load %arg11[%c0_47, %c0_48, %c0_49] : memref<1x1x128xf32, #tpu.memory_space<vmem>>, vector<1x1x128xf32>
    %119 = vector.shape_cast %118 : vector<1x1x128xf32> to vector<1x128xf32>
    %120 = arith.truncf %115 : vector<16x128xf32> to vector<16x128xbf16>
    %cst_50 = arith.constant dense<0.000000e+00> : vector<16x128xf32>
    %121 = tpu.matmul %120, %117, %cst_50 {dimension_numbers = #tpu.dot_dimension_numbers<[1], [0], [0], [1], [0, 0, 1, 1], [], []>} : vector<16x128xbf16>, vector<128x128xbf16>, vector<16x128xf32> -> vector<16x128xf32>
    %122 = vector.broadcast %119 : vector<1x128xf32> to vector<16x128xf32>
    %123 = arith.addf %121, %122 : vector<16x128xf32>
    %c0_51 = arith.constant 0 : index
    %c0_52 = arith.constant 0 : index
    %c0_53 = arith.constant 0 : index
    %124 = vector.load %arg12[%c0_51, %c0_52, %c0_53] : memref<1x128x256xbf16, #tpu.memory_space<vmem>>, vector<1x128x256xbf16>
    %125 = vector.shape_cast %124 : vector<1x128x256xbf16> to vector<128x256xbf16>
    %c0_54 = arith.constant 0 : index
    %c0_55 = arith.constant 0 : index
    %c0_56 = arith.constant 0 : index
    %126 = vector.load %arg13[%c0_54, %c0_55, %c0_56] : memref<1x1x256xf32, #tpu.memory_space<vmem>>, vector<1x1x256xf32>
    %127 = vector.shape_cast %126 : vector<1x1x256xf32> to vector<1x256xf32>
    %128 = arith.truncf %4 : vector<16x128xf32> to vector<16x128xbf16>
    %cst_57 = arith.constant dense<0.000000e+00> : vector<16x256xf32>
    %129 = tpu.matmul %128, %125, %cst_57 {dimension_numbers = #tpu.dot_dimension_numbers<[1], [0], [0], [1], [0, 0, 1, 1], [], []>} : vector<16x128xbf16>, vector<128x256xbf16>, vector<16x256xf32> -> vector<16x256xf32>
    %130 = vector.broadcast %127 : vector<1x256xf32> to vector<16x256xf32>
    %131 = arith.addf %129, %130 : vector<16x256xf32>
    %132 = vector.shape_cast %123 : vector<16x128xf32> to vector<2x8x128xf32>
    %133 = vector.extract_strided_slice %131 {offsets = [0, 0], sizes = [16, 128], strides = [1, 1]} : vector<16x256xf32> to vector<16x128xf32>
    %134 = vector.shape_cast %133 : vector<16x128xf32> to vector<2x8x128xf32>
    %135 = vector.extract_strided_slice %131 {offsets = [0, 128], sizes = [16, 128], strides = [1, 1]} : vector<16x256xf32> to vector<16x128xf32>
    %136 = vector.shape_cast %135 : vector<16x128xf32> to vector<2x8x128xf32>
    %137 = vector.extract_strided_slice %132 {offsets = [0, 0, 0], sizes = [2, 8, 32], strides = [1, 1, 1]} : vector<2x8x128xf32> to vector<2x8x32xf32>
    %138 = vector.extract_strided_slice %134 {offsets = [0, 0, 0], sizes = [2, 8, 32], strides = [1, 1, 1]} : vector<2x8x128xf32> to vector<2x8x32xf32>
    %cst_58 = arith.constant dense<0.000000e+00> : vector<2x8x8xf32>
    %139 = tpu.matmul %137, %138, %cst_58 {dimension_numbers = #tpu.dot_dimension_numbers<[2], [2], [1], [1], [0, 0, 0, 1, 1, 1], [0], [0]>} : vector<2x8x32xf32>, vector<2x8x32xf32>, vector<2x8x8xf32> -> vector<2x8x8xf32>
    %cst_59 = arith.constant dense<0xFF800000> : vector<2x8xf32>
    %140 = vector.multi_reduction <maximumf>, %139, %cst_59 [2] : vector<2x8x8xf32> to vector<2x8xf32>
    %141 = vector.shape_cast %140 : vector<2x8xf32> to vector<2x8x1xf32>
    %142 = vector.broadcast %141 : vector<2x8x1xf32> to vector<2x8x8xf32>
    %143 = arith.subf %139, %142 : vector<2x8x8xf32>
    %144 = math.exp %143 : vector<2x8x8xf32>
    %cst_60 = arith.constant dense<0.000000e+00> : vector<2x8xf32>
    %145 = vector.multi_reduction <add>, %144, %cst_60 [2] : vector<2x8x8xf32> to vector<2x8xf32>
    %146 = vector.shape_cast %145 : vector<2x8xf32> to vector<2x8x1xf32>
    %147 = tpu.reciprocal %146 {approx = true} : vector<2x8x1xf32> -> vector<2x8x1xf32>
    %148 = vector.broadcast %147 : vector<2x8x1xf32> to vector<2x8x8xf32>
    %149 = arith.mulf %144, %148 : vector<2x8x8xf32>
    %150 = vector.extract_strided_slice %136 {offsets = [0, 0, 0], sizes = [2, 8, 32], strides = [1, 1, 1]} : vector<2x8x128xf32> to vector<2x8x32xf32>
    %cst_61 = arith.constant dense<0.000000e+00> : vector<2x8x32xf32>
    %151 = tpu.matmul %149, %150, %cst_61 {dimension_numbers = #tpu.dot_dimension_numbers<[2], [1], [1], [2], [0, 0, 0, 1, 1, 2], [0], [0]>} : vector<2x8x8xf32>, vector<2x8x32xf32>, vector<2x8x32xf32> -> vector<2x8x32xf32>
    %152 = vector.extract_strided_slice %132 {offsets = [0, 0, 32], sizes = [2, 8, 32], strides = [1, 1, 1]} : vector<2x8x128xf32> to vector<2x8x32xf32>
    %153 = vector.extract_strided_slice %134 {offsets = [0, 0, 32], sizes = [2, 8, 32], strides = [1, 1, 1]} : vector<2x8x128xf32> to vector<2x8x32xf32>
    %cst_62 = arith.constant dense<0.000000e+00> : vector<2x8x8xf32>
    %154 = tpu.matmul %152, %153, %cst_62 {dimension_numbers = #tpu.dot_dimension_numbers<[2], [2], [1], [1], [0, 0, 0, 1, 1, 1], [0], [0]>} : vector<2x8x32xf32>, vector<2x8x32xf32>, vector<2x8x8xf32> -> vector<2x8x8xf32>
    %cst_63 = arith.constant dense<0xFF800000> : vector<2x8xf32>
    %155 = vector.multi_reduction <maximumf>, %154, %cst_63 [2] : vector<2x8x8xf32> to vector<2x8xf32>
    %156 = vector.shape_cast %155 : vector<2x8xf32> to vector<2x8x1xf32>
    %157 = vector.broadcast %156 : vector<2x8x1xf32> to vector<2x8x8xf32>
    %158 = arith.subf %154, %157 : vector<2x8x8xf32>
    %159 = math.exp %158 : vector<2x8x8xf32>
    %cst_64 = arith.constant dense<0.000000e+00> : vector<2x8xf32>
    %160 = vector.multi_reduction <add>, %159, %cst_64 [2] : vector<2x8x8xf32> to vector<2x8xf32>
    %161 = vector.shape_cast %160 : vector<2x8xf32> to vector<2x8x1xf32>
    %162 = tpu.reciprocal %161 {approx = true} : vector<2x8x1xf32> -> vector<2x8x1xf32>
    %163 = vector.broadcast %162 : vector<2x8x1xf32> to vector<2x8x8xf32>
    %164 = arith.mulf %159, %163 : vector<2x8x8xf32>
    %165 = vector.extract_strided_slice %136 {offsets = [0, 0, 32], sizes = [2, 8, 32], strides = [1, 1, 1]} : vector<2x8x128xf32> to vector<2x8x32xf32>
    %cst_65 = arith.constant dense<0.000000e+00> : vector<2x8x32xf32>
    %166 = tpu.matmul %164, %165, %cst_65 {dimension_numbers = #tpu.dot_dimension_numbers<[2], [1], [1], [2], [0, 0, 0, 1, 1, 2], [0], [0]>} : vector<2x8x8xf32>, vector<2x8x32xf32>, vector<2x8x32xf32> -> vector<2x8x32xf32>
    %167 = vector.extract_strided_slice %132 {offsets = [0, 0, 64], sizes = [2, 8, 32], strides = [1, 1, 1]} : vector<2x8x128xf32> to vector<2x8x32xf32>
    %168 = vector.extract_strided_slice %134 {offsets = [0, 0, 64], sizes = [2, 8, 32], strides = [1, 1, 1]} : vector<2x8x128xf32> to vector<2x8x32xf32>
    %cst_66 = arith.constant dense<0.000000e+00> : vector<2x8x8xf32>
    %169 = tpu.matmul %167, %168, %cst_66 {dimension_numbers = #tpu.dot_dimension_numbers<[2], [2], [1], [1], [0, 0, 0, 1, 1, 1], [0], [0]>} : vector<2x8x32xf32>, vector<2x8x32xf32>, vector<2x8x8xf32> -> vector<2x8x8xf32>
    %cst_67 = arith.constant dense<0xFF800000> : vector<2x8xf32>
    %170 = vector.multi_reduction <maximumf>, %169, %cst_67 [2] : vector<2x8x8xf32> to vector<2x8xf32>
    %171 = vector.shape_cast %170 : vector<2x8xf32> to vector<2x8x1xf32>
    %172 = vector.broadcast %171 : vector<2x8x1xf32> to vector<2x8x8xf32>
    %173 = arith.subf %169, %172 : vector<2x8x8xf32>
    %174 = math.exp %173 : vector<2x8x8xf32>
    %cst_68 = arith.constant dense<0.000000e+00> : vector<2x8xf32>
    %175 = vector.multi_reduction <add>, %174, %cst_68 [2] : vector<2x8x8xf32> to vector<2x8xf32>
    %176 = vector.shape_cast %175 : vector<2x8xf32> to vector<2x8x1xf32>
    %177 = tpu.reciprocal %176 {approx = true} : vector<2x8x1xf32> -> vector<2x8x1xf32>
    %178 = vector.broadcast %177 : vector<2x8x1xf32> to vector<2x8x8xf32>
    %179 = arith.mulf %174, %178 : vector<2x8x8xf32>
    %180 = vector.extract_strided_slice %136 {offsets = [0, 0, 64], sizes = [2, 8, 32], strides = [1, 1, 1]} : vector<2x8x128xf32> to vector<2x8x32xf32>
    %cst_69 = arith.constant dense<0.000000e+00> : vector<2x8x32xf32>
    %181 = tpu.matmul %179, %180, %cst_69 {dimension_numbers = #tpu.dot_dimension_numbers<[2], [1], [1], [2], [0, 0, 0, 1, 1, 2], [0], [0]>} : vector<2x8x8xf32>, vector<2x8x32xf32>, vector<2x8x32xf32> -> vector<2x8x32xf32>
    %182 = vector.extract_strided_slice %132 {offsets = [0, 0, 96], sizes = [2, 8, 32], strides = [1, 1, 1]} : vector<2x8x128xf32> to vector<2x8x32xf32>
    %183 = vector.extract_strided_slice %134 {offsets = [0, 0, 96], sizes = [2, 8, 32], strides = [1, 1, 1]} : vector<2x8x128xf32> to vector<2x8x32xf32>
    %cst_70 = arith.constant dense<0.000000e+00> : vector<2x8x8xf32>
    %184 = tpu.matmul %182, %183, %cst_70 {dimension_numbers = #tpu.dot_dimension_numbers<[2], [2], [1], [1], [0, 0, 0, 1, 1, 1], [0], [0]>} : vector<2x8x32xf32>, vector<2x8x32xf32>, vector<2x8x8xf32> -> vector<2x8x8xf32>
    %cst_71 = arith.constant dense<0xFF800000> : vector<2x8xf32>
    %185 = vector.multi_reduction <maximumf>, %184, %cst_71 [2] : vector<2x8x8xf32> to vector<2x8xf32>
    %186 = vector.shape_cast %185 : vector<2x8xf32> to vector<2x8x1xf32>
    %187 = vector.broadcast %186 : vector<2x8x1xf32> to vector<2x8x8xf32>
    %188 = arith.subf %184, %187 : vector<2x8x8xf32>
    %189 = math.exp %188 : vector<2x8x8xf32>
    %cst_72 = arith.constant dense<0.000000e+00> : vector<2x8xf32>
    %190 = vector.multi_reduction <add>, %189, %cst_72 [2] : vector<2x8x8xf32> to vector<2x8xf32>
    %191 = vector.shape_cast %190 : vector<2x8xf32> to vector<2x8x1xf32>
    %192 = tpu.reciprocal %191 {approx = true} : vector<2x8x1xf32> -> vector<2x8x1xf32>
    %193 = vector.broadcast %192 : vector<2x8x1xf32> to vector<2x8x8xf32>
    %194 = arith.mulf %189, %193 : vector<2x8x8xf32>
    %195 = vector.extract_strided_slice %136 {offsets = [0, 0, 96], sizes = [2, 8, 32], strides = [1, 1, 1]} : vector<2x8x128xf32> to vector<2x8x32xf32>
    %cst_73 = arith.constant dense<0.000000e+00> : vector<2x8x32xf32>
    %196 = tpu.matmul %194, %195, %cst_73 {dimension_numbers = #tpu.dot_dimension_numbers<[2], [1], [1], [2], [0, 0, 0, 1, 1, 2], [0], [0]>} : vector<2x8x8xf32>, vector<2x8x32xf32>, vector<2x8x32xf32> -> vector<2x8x32xf32>
    %197 = tpu.concatenate %151, %166, %181, %196 in 2 : vector<2x8x32xf32>, vector<2x8x32xf32>, vector<2x8x32xf32>, vector<2x8x32xf32> -> vector<2x8x128xf32>
    %198 = vector.shape_cast %197 : vector<2x8x128xf32> to vector<16x128xf32>
    %c0_74 = arith.constant 0 : index
    %c0_75 = arith.constant 0 : index
    %c0_76 = arith.constant 0 : index
    %199 = vector.load %arg14[%c0_74, %c0_75, %c0_76] : memref<1x128x128xbf16, #tpu.memory_space<vmem>>, vector<1x128x128xbf16>
    %200 = vector.shape_cast %199 : vector<1x128x128xbf16> to vector<128x128xbf16>
    %c0_77 = arith.constant 0 : index
    %c0_78 = arith.constant 0 : index
    %c0_79 = arith.constant 0 : index
    %201 = vector.load %arg15[%c0_77, %c0_78, %c0_79] : memref<1x1x128xf32, #tpu.memory_space<vmem>>, vector<1x1x128xf32>
    %202 = vector.shape_cast %201 : vector<1x1x128xf32> to vector<1x128xf32>
    %203 = arith.truncf %198 : vector<16x128xf32> to vector<16x128xbf16>
    %cst_80 = arith.constant dense<0.000000e+00> : vector<16x128xf32>
    %204 = tpu.matmul %203, %200, %cst_80 {dimension_numbers = #tpu.dot_dimension_numbers<[1], [0], [0], [1], [0, 0, 1, 1], [], []>} : vector<16x128xbf16>, vector<128x128xbf16>, vector<16x128xf32> -> vector<16x128xf32>
    %205 = vector.broadcast %202 : vector<1x128xf32> to vector<16x128xf32>
    %206 = arith.addf %204, %205 : vector<16x128xf32>
    %c0_81 = arith.constant 0 : index
    %c0_82 = arith.constant 0 : index
    %c0_83 = arith.constant 0 : index
    %207 = vector.load %arg16[%c0_81, %c0_82, %c0_83] : memref<1x1x128xf32, #tpu.memory_space<vmem>>, vector<1x1x128xf32>
    %208 = vector.shape_cast %207 : vector<1x1x128xf32> to vector<1x128xf32>
    %c0_84 = arith.constant 0 : index
    %c0_85 = arith.constant 0 : index
    %c0_86 = arith.constant 0 : index
    %209 = vector.load %arg17[%c0_84, %c0_85, %c0_86] : memref<1x1x128xf32, #tpu.memory_space<vmem>>, vector<1x1x128xf32>
    %210 = vector.shape_cast %209 : vector<1x1x128xf32> to vector<1x128xf32>
    %211 = arith.addf %115, %206 : vector<16x128xf32>
    %cst_87 = arith.constant dense<0.000000e+00> : vector<16xf32>
    %212 = vector.multi_reduction <add>, %211, %cst_87 [1] : vector<16x128xf32> to vector<16xf32>
    %213 = vector.shape_cast %212 : vector<16xf32> to vector<16x1xf32>
    %cst_88 = arith.constant 1.280000e+02 : f32
    %214 = vector.broadcast %cst_88 : f32 to vector<16x1xf32>
    %215 = arith.divf %213, %214 : vector<16x1xf32>
    %216 = arith.mulf %211, %211 : vector<16x128xf32>
    %cst_89 = arith.constant dense<0.000000e+00> : vector<16xf32>
    %217 = vector.multi_reduction <add>, %216, %cst_89 [1] : vector<16x128xf32> to vector<16xf32>
    %218 = vector.shape_cast %217 : vector<16xf32> to vector<16x1xf32>
    %cst_90 = arith.constant 1.280000e+02 : f32
    %219 = vector.broadcast %cst_90 : f32 to vector<16x1xf32>
    %220 = arith.divf %218, %219 : vector<16x1xf32>
    %221 = arith.mulf %215, %215 : vector<16x1xf32>
    %222 = arith.subf %220, %221 : vector<16x1xf32>
    %cst_91 = arith.constant 9.99999974E-6 : f32
    %223 = vector.broadcast %cst_91 : f32 to vector<16x1xf32>
    %224 = arith.addf %222, %223 : vector<16x1xf32>
    %225 = math.rsqrt %224 : vector<16x1xf32>
    %226 = vector.broadcast %215 : vector<16x1xf32> to vector<16x128xf32>
    %227 = arith.subf %211, %226 : vector<16x128xf32>
    %228 = vector.broadcast %225 : vector<16x1xf32> to vector<16x128xf32>
    %229 = arith.mulf %227, %228 : vector<16x128xf32>
    %230 = vector.broadcast %208 : vector<1x128xf32> to vector<16x128xf32>
    %231 = arith.mulf %229, %230 : vector<16x128xf32>
    %232 = vector.broadcast %210 : vector<1x128xf32> to vector<16x128xf32>
    %233 = arith.addf %231, %232 : vector<16x128xf32>
    %c0_92 = arith.constant 0 : index
    %c0_93 = arith.constant 0 : index
    %c0_94 = arith.constant 0 : index
    %234 = vector.load %arg18[%c0_92, %c0_93, %c0_94] : memref<1x128x256xbf16, #tpu.memory_space<vmem>>, vector<1x128x256xbf16>
    %235 = vector.shape_cast %234 : vector<1x128x256xbf16> to vector<128x256xbf16>
    %c0_95 = arith.constant 0 : index
    %c0_96 = arith.constant 0 : index
    %c0_97 = arith.constant 0 : index
    %236 = vector.load %arg19[%c0_95, %c0_96, %c0_97] : memref<1x1x256xf32, #tpu.memory_space<vmem>>, vector<1x1x256xf32>
    %237 = vector.shape_cast %236 : vector<1x1x256xf32> to vector<1x256xf32>
    %238 = arith.truncf %233 : vector<16x128xf32> to vector<16x128xbf16>
    %cst_98 = arith.constant dense<0.000000e+00> : vector<16x256xf32>
    %239 = tpu.matmul %238, %235, %cst_98 {dimension_numbers = #tpu.dot_dimension_numbers<[1], [0], [0], [1], [0, 0, 1, 1], [], []>} : vector<16x128xbf16>, vector<128x256xbf16>, vector<16x256xf32> -> vector<16x256xf32>
    %240 = vector.broadcast %237 : vector<1x256xf32> to vector<16x256xf32>
    %241 = arith.addf %239, %240 : vector<16x256xf32>
    %cst_99 = arith.constant 0.000000e+00 : f32
    %242 = vector.broadcast %cst_99 : f32 to vector<16x256xf32>
    %243 = arith.maximumf %241, %242 : vector<16x256xf32>
    %c0_100 = arith.constant 0 : index
    %c0_101 = arith.constant 0 : index
    %c0_102 = arith.constant 0 : index
    %244 = vector.load %arg20[%c0_100, %c0_101, %c0_102] : memref<1x256x128xbf16, #tpu.memory_space<vmem>>, vector<1x256x128xbf16>
    %245 = vector.shape_cast %244 : vector<1x256x128xbf16> to vector<256x128xbf16>
    %c0_103 = arith.constant 0 : index
    %c0_104 = arith.constant 0 : index
    %c0_105 = arith.constant 0 : index
    %246 = vector.load %arg21[%c0_103, %c0_104, %c0_105] : memref<1x1x128xf32, #tpu.memory_space<vmem>>, vector<1x1x128xf32>
    %247 = vector.shape_cast %246 : vector<1x1x128xf32> to vector<1x128xf32>
    %248 = arith.truncf %243 : vector<16x256xf32> to vector<16x256xbf16>
    %cst_106 = arith.constant dense<0.000000e+00> : vector<16x128xf32>
    %249 = tpu.matmul %248, %245, %cst_106 {dimension_numbers = #tpu.dot_dimension_numbers<[1], [0], [0], [1], [0, 0, 1, 1], [], []>} : vector<16x256xbf16>, vector<256x128xbf16>, vector<16x128xf32> -> vector<16x128xf32>
    %250 = vector.broadcast %247 : vector<1x128xf32> to vector<16x128xf32>
    %251 = arith.addf %249, %250 : vector<16x128xf32>
    %c0_107 = arith.constant 0 : index
    %c0_108 = arith.constant 0 : index
    %c0_109 = arith.constant 0 : index
    %252 = vector.load %arg22[%c0_107, %c0_108, %c0_109] : memref<1x1x128xf32, #tpu.memory_space<vmem>>, vector<1x1x128xf32>
    %253 = vector.shape_cast %252 : vector<1x1x128xf32> to vector<1x128xf32>
    %c0_110 = arith.constant 0 : index
    %c0_111 = arith.constant 0 : index
    %c0_112 = arith.constant 0 : index
    %254 = vector.load %arg23[%c0_110, %c0_111, %c0_112] : memref<1x1x128xf32, #tpu.memory_space<vmem>>, vector<1x1x128xf32>
    %255 = vector.shape_cast %254 : vector<1x1x128xf32> to vector<1x128xf32>
    %256 = arith.addf %233, %251 : vector<16x128xf32>
    %cst_113 = arith.constant dense<0.000000e+00> : vector<16xf32>
    %257 = vector.multi_reduction <add>, %256, %cst_113 [1] : vector<16x128xf32> to vector<16xf32>
    %258 = vector.shape_cast %257 : vector<16xf32> to vector<16x1xf32>
    %cst_114 = arith.constant 1.280000e+02 : f32
    %259 = vector.broadcast %cst_114 : f32 to vector<16x1xf32>
    %260 = arith.divf %258, %259 : vector<16x1xf32>
    %261 = arith.mulf %256, %256 : vector<16x128xf32>
    %cst_115 = arith.constant dense<0.000000e+00> : vector<16xf32>
    %262 = vector.multi_reduction <add>, %261, %cst_115 [1] : vector<16x128xf32> to vector<16xf32>
    %263 = vector.shape_cast %262 : vector<16xf32> to vector<16x1xf32>
    %cst_116 = arith.constant 1.280000e+02 : f32
    %264 = vector.broadcast %cst_116 : f32 to vector<16x1xf32>
    %265 = arith.divf %263, %264 : vector<16x1xf32>
    %266 = arith.mulf %260, %260 : vector<16x1xf32>
    %267 = arith.subf %265, %266 : vector<16x1xf32>
    %cst_117 = arith.constant 9.99999974E-6 : f32
    %268 = vector.broadcast %cst_117 : f32 to vector<16x1xf32>
    %269 = arith.addf %267, %268 : vector<16x1xf32>
    %270 = math.rsqrt %269 : vector<16x1xf32>
    %271 = vector.broadcast %260 : vector<16x1xf32> to vector<16x128xf32>
    %272 = arith.subf %256, %271 : vector<16x128xf32>
    %273 = vector.broadcast %270 : vector<16x1xf32> to vector<16x128xf32>
    %274 = arith.mulf %272, %273 : vector<16x128xf32>
    %275 = vector.broadcast %253 : vector<1x128xf32> to vector<16x128xf32>
    %276 = arith.mulf %274, %275 : vector<16x128xf32>
    %277 = vector.broadcast %255 : vector<1x128xf32> to vector<16x128xf32>
    %278 = arith.addf %276, %277 : vector<16x128xf32>
    %c0_118 = arith.constant 0 : index
    %c0_119 = arith.constant 0 : index
    %279 = vector.load %arg27[%c0_118, %c0_119] : memref<16x128xf32, #tpu.memory_space<vmem>>, vector<16x128xf32>
    tpu.vector_store %arg27[%c0_118, %c0_119], %278 {strides = array<i32>} : memref<16x128xf32, #tpu.memory_space<vmem>>, vector<16x128xf32>,
    %c1_i32 = arith.constant 1 : i32
    %280 = arith.cmpi eq, %arg1, %c1_i32 : i32
    %281 = arith.extui %280 : i1 to i32
    %c0_i32_120 = arith.constant 0 : i32
    %282 = arith.cmpi ne, %281, %c0_i32_120 : i32
    scf.if %282 {
      %c0_121 = arith.constant 0 : index
      %c0_122 = arith.constant 0 : index
      %283 = vector.load %arg24[%c0_121, %c0_122] : memref<128x128xbf16, #tpu.memory_space<vmem>>, vector<128x128xbf16>
      %c0_123 = arith.constant 0 : index
      %c0_124 = arith.constant 0 : index
      %284 = vector.load %arg25[%c0_123, %c0_124] : memref<1x128xf32, #tpu.memory_space<vmem>>, vector<1x128xf32>
      %285 = arith.truncf %278 : vector<16x128xf32> to vector<16x128xbf16>
      %cst_125 = arith.constant dense<0.000000e+00> : vector<16x128xf32>
      %286 = tpu.matmul %285, %283, %cst_125 {dimension_numbers = #tpu.dot_dimension_numbers<[1], [0], [0], [1], [0, 0, 1, 1], [], []>} : vector<16x128xbf16>, vector<128x128xbf16>, vector<16x128xf32> -> vector<16x128xf32>
      %287 = vector.broadcast %284 : vector<1x128xf32> to vector<16x128xf32>
      %288 = arith.addf %286, %287 : vector<16x128xf32>
      %c0_126 = arith.constant 0 : index
      %c0_127 = arith.constant 0 : index
      %289 = vector.load %arg26[%c0_126, %c0_127] : memref<16x128xf32, #tpu.memory_space<vmem>>, vector<16x128xf32>
      tpu.vector_store %arg26[%c0_126, %c0_127], %288 {strides = array<i32>} : memref<16x128xf32, #tpu.memory_space<vmem>>, vector<16x128xf32>,
    } else {
    }
    return
  }
  func.func @transform_0(%arg0: i32, %arg1: i32) -> (i32, i32) {
    %c0_i32 = arith.constant 0 : i32
    %c0_i32_0 = arith.constant 0 : i32
    return %arg0, %c0_i32 : i32, i32
  }
  func.func @transform_1(%arg0: i32, %arg1: i32) -> (i32, i32) {
    %c0_i32 = arith.constant 0 : i32
    %c0_i32_0 = arith.constant 0 : i32
    return %arg0, %c0_i32 : i32, i32
  }
  func.func @transform_2(%arg0: i32, %arg1: i32) -> (i32, i32, i32) {
    %c0_i32 = arith.constant 0 : i32
    %c0_i32_0 = arith.constant 0 : i32
    %c0_i32_1 = arith.constant 0 : i32
    return %arg1, %c0_i32, %c0_i32_0 : i32, i32, i32
  }
  func.func @transform_3(%arg0: i32, %arg1: i32) -> (i32, i32, i32) {
    %c0_i32 = arith.constant 0 : i32
    %c0_i32_0 = arith.constant 0 : i32
    %c0_i32_1 = arith.constant 0 : i32
    return %arg1, %c0_i32, %c0_i32_0 : i32, i32, i32
  }
  func.func @transform_4(%arg0: i32, %arg1: i32) -> (i32, i32, i32) {
    %c0_i32 = arith.constant 0 : i32
    %c0_i32_0 = arith.constant 0 : i32
    %c0_i32_1 = arith.constant 0 : i32
    return %arg1, %c0_i32, %c0_i32_0 : i32, i32, i32
  }
  func.func @transform_5(%arg0: i32, %arg1: i32) -> (i32, i32, i32) {
    %c0_i32 = arith.constant 0 : i32
    %c0_i32_0 = arith.constant 0 : i32
    %c0_i32_1 = arith.constant 0 : i32
    return %arg1, %c0_i32, %c0_i32_0 : i32, i32, i32
  }
  func.func @transform_6(%arg0: i32, %arg1: i32) -> (i32, i32, i32) {
    %c0_i32 = arith.constant 0 : i32
    %c0_i32_0 = arith.constant 0 : i32
    %c0_i32_1 = arith.constant 0 : i32
    return %arg1, %c0_i32, %c0_i32_0 : i32, i32, i32
  }
  func.func @transform_7(%arg0: i32, %arg1: i32) -> (i32, i32, i32) {
    %c0_i32 = arith.constant 0 : i32
    %c0_i32_0 = arith.constant 0 : i32
    %c0_i32_1 = arith.constant 0 : i32
    return %arg1, %c0_i32, %c0_i32_0 : i32, i32, i32
  }
  func.func @transform_8(%arg0: i32, %arg1: i32) -> (i32, i32, i32) {
    %c0_i32 = arith.constant 0 : i32
    %c0_i32_0 = arith.constant 0 : i32
    %c0_i32_1 = arith.constant 0 : i32
    return %arg1, %c0_i32, %c0_i32_0 : i32, i32, i32
  }
  func.func @transform_9(%arg0: i32, %arg1: i32) -> (i32, i32, i32) {
    %c0_i32 = arith.constant 0 : i32
    %c0_i32_0 = arith.constant 0 : i32
    %c0_i32_1 = arith.constant 0 : i32
    return %arg1, %c0_i32, %c0_i32_0 : i32, i32, i32
  }
  func.func @transform_10(%arg0: i32, %arg1: i32) -> (i32, i32, i32) {
    %c0_i32 = arith.constant 0 : i32
    %c0_i32_0 = arith.constant 0 : i32
    %c0_i32_1 = arith.constant 0 : i32
    return %arg1, %c0_i32, %c0_i32_0 : i32, i32, i32
  }
  func.func @transform_11(%arg0: i32, %arg1: i32) -> (i32, i32, i32) {
    %c0_i32 = arith.constant 0 : i32
    %c0_i32_0 = arith.constant 0 : i32
    %c0_i32_1 = arith.constant 0 : i32
    return %arg1, %c0_i32, %c0_i32_0 : i32, i32, i32
  }
  func.func @transform_12(%arg0: i32, %arg1: i32) -> (i32, i32, i32) {
    %c0_i32 = arith.constant 0 : i32
    %c0_i32_0 = arith.constant 0 : i32
    %c0_i32_1 = arith.constant 0 : i32
    return %arg1, %c0_i32, %c0_i32_0 : i32, i32, i32
  }
  func.func @transform_13(%arg0: i32, %arg1: i32) -> (i32, i32, i32) {
    %c0_i32 = arith.constant 0 : i32
    %c0_i32_0 = arith.constant 0 : i32
    %c0_i32_1 = arith.constant 0 : i32
    return %arg1, %c0_i32, %c0_i32_0 : i32, i32, i32
  }
  func.func @transform_14(%arg0: i32, %arg1: i32) -> (i32, i32, i32) {
    %c0_i32 = arith.constant 0 : i32
    %c0_i32_0 = arith.constant 0 : i32
    %c0_i32_1 = arith.constant 0 : i32
    return %arg1, %c0_i32, %c0_i32_0 : i32, i32, i32
  }
  func.func @transform_15(%arg0: i32, %arg1: i32) -> (i32, i32, i32) {
    %c0_i32 = arith.constant 0 : i32
    %c0_i32_0 = arith.constant 0 : i32
    %c0_i32_1 = arith.constant 0 : i32
    return %arg1, %c0_i32, %c0_i32_0 : i32, i32, i32
  }
  func.func @transform_16(%arg0: i32, %arg1: i32) -> (i32, i32, i32) {
    %c0_i32 = arith.constant 0 : i32
    %c0_i32_0 = arith.constant 0 : i32
    %c0_i32_1 = arith.constant 0 : i32
    return %arg1, %c0_i32, %c0_i32_0 : i32, i32, i32
  }
  func.func @transform_17(%arg0: i32, %arg1: i32) -> (i32, i32, i32) {
    %c0_i32 = arith.constant 0 : i32
    %c0_i32_0 = arith.constant 0 : i32
    %c0_i32_1 = arith.constant 0 : i32
    return %arg1, %c0_i32, %c0_i32_0 : i32, i32, i32
  }
  func.func @transform_18(%arg0: i32, %arg1: i32) -> (i32, i32, i32) {
    %c0_i32 = arith.constant 0 : i32
    %c0_i32_0 = arith.constant 0 : i32
    %c0_i32_1 = arith.constant 0 : i32
    return %arg1, %c0_i32, %c0_i32_0 : i32, i32, i32
  }
  func.func @transform_19(%arg0: i32, %arg1: i32) -> (i32, i32, i32) {
    %c0_i32 = arith.constant 0 : i32
    %c0_i32_0 = arith.constant 0 : i32
    %c0_i32_1 = arith.constant 0 : i32
    return %arg1, %c0_i32, %c0_i32_0 : i32, i32, i32
  }
  func.func @transform_20(%arg0: i32, %arg1: i32) -> (i32, i32, i32) {
    %c0_i32 = arith.constant 0 : i32
    %c0_i32_0 = arith.constant 0 : i32
    %c0_i32_1 = arith.constant 0 : i32
    return %arg1, %c0_i32, %c0_i32_0 : i32, i32, i32
  }
  func.func @transform_21(%arg0: i32, %arg1: i32) -> (i32, i32, i32) {
    %c0_i32 = arith.constant 0 : i32
    %c0_i32_0 = arith.constant 0 : i32
    %c0_i32_1 = arith.constant 0 : i32
    return %arg1, %c0_i32, %c0_i32_0 : i32, i32, i32
  }
  func.func @transform_22(%arg0: i32, %arg1: i32) -> (i32, i32) {
    %c0_i32 = arith.constant 0 : i32
    %c0_i32_0 = arith.constant 0 : i32
    %c0_i32_1 = arith.constant 0 : i32
    return %c0_i32, %c0_i32_0 : i32, i32
  }
  func.func @transform_23(%arg0: i32, %arg1: i32) -> (i32, i32) {
    %c0_i32 = arith.constant 0 : i32
    %c0_i32_0 = arith.constant 0 : i32
    %c0_i32_1 = arith.constant 0 : i32
    return %c0_i32, %c0_i32_0 : i32, i32
  }
  func.func @transform_24(%arg0: i32, %arg1: i32) -> (i32, i32) {
    %c0_i32 = arith.constant 0 : i32
    %c0_i32_0 = arith.constant 0 : i32
    return %arg0, %c0_i32 : i32, i32
  }
}

</mosaic_0001>

<bundles_post_ra>
// kernel: transformer_simplifier_forward.2
= control target key start
LH: loop header
LB: loop body
LE: loop exit
PB: predicated region body
PF: predicated region fallthrough
CT: control target
= control target key end

     0   :  { %s3429_s0 = inlined_call_operand.vmem [shape: f32[16,128], index: 0, kind: input, shape index: {}]   ;;  %s3430_s1 = inlined_call_operand.hbm [shape: bf16[2,128,384], index: 1, kind: input, shape index: {}]   ;;  %s3431_s2 = inlined_call_operand.vmem [shape: f32[2,1,384], index: 2, kind: input, shape index: {}]   ;;  %s3432_s3 = inlined_call_operand.hbm [shape: bf16[2,128,128], index: 3, kind: input, shape index: {}]   ;;  %s3433_s4 = inlined_call_operand.vmem [shape: f32[2,1,128], index: 4, kind: input, shape index: {}]   ;;  %s3434_s5 = inlined_call_operand.vmem [shape: f32[2,1,128], index: 5, kind: input, shape index: {}]   ;;  %s3435_s6 = inlined_call_operand.vmem [shape: f32[2,1,128], index: 6, kind: input, shape index: {}]   ;;  %s3436_s7 = inlined_call_operand.vmem [shape: bf16[2,128,256], index: 7, kind: input, shape index: {}]   ;;  %s3437_s8 = inlined_call_operand.vmem [shape: f32[2,1,256], index: 8, kind: input, shape index: {}]   ;;  %s3438_s9 = inlined_call_operand.hbm [shape: bf16[2,256,128], index: 9, kind: input, shape index: {}]   ;;  %s3439_s10 = inlined_call_operand.vmem [shape: f32[2,1,128], index: 10, kind: input, shape index: {}]   ;;  %s3440_s11 = inlined_call_operand.vmem [shape: f32[2,1,128], index: 11, kind: input, shape index: {}]   ;;  %s3441_s12 = inlined_call_operand.vmem [shape: f32[2,1,128], index: 12, kind: input, shape index: {}]   ;;  %s3442_s13 = inlined_call_operand.vmem [shape: f32[16,128], index: 13, kind: output, shape index: {}]  }
   0x1   :  { %3449 = sst [smem:[#allocation14_spill]] %s3429_s0 }
   0x2   :  { %3450 = sst [smem:[#allocation15_spill]] %s3430_s1 }
   0x3   :  { %3451 = sst [smem:[#allocation16_spill]] %s3431_s2 }
   0x4   :  { %3452 = sst [smem:[#allocation17_spill]] %s3432_s3 }
   0x5   :  { %3453 = sst [smem:[#allocation18_spill]] %s3435_s6 }
   0x6   :  { %3454 = sst [smem:[#allocation19_spill]] %s3436_s7 }
   0x7   :  { %3455 = sst [smem:[#allocation20_spill]] %s3437_s8 }
   0x8   :  { %3456 = sst [smem:[#allocation21_spill]] %s3438_s9 }
   0x9   :  { %3457 = sst [smem:[#allocation22_spill]] %s3439_s10 }
   0xa   :  { %3458 = sst [smem:[#allocation23_spill]] %s3440_s11 }
   0xb   :  { %3459 = sst [smem:[#allocation24_spill]] %s3441_s12 }
   0xc   :  { %3460 = sst [smem:[#allocation25_spill]] %s3442_s13 }
   0xd   :  { %18 = vsyncpa [#allocation4], 0 }
   0xe   :  { %20 = vsyncpa [#allocation4 + $0x1], 0 }
   0xf   :  { %21 = vsyncpa [#allocation6], 0 }
  0x10   :  { %23 = vsyncpa [#allocation6 + $0x1], 0  ;;  %s2955_s25 = smov 0   ;;  %s2957_s26 = smov 0  }
  0x11   :  { %s2959_s27 = smov 0   ;;  %s2961_s28 = smov 0  }
  0x12   :  { %s2963_s29 = smov 0   ;;  %s2965_s30 = smov 0  }
  0x13 LB: > { %3461 = sst [smem:[#allocation10_spill]] %s2863_s27  ;;  %s3443_s14 = sadd.s32 4294967295, %s2875_s30   ;;  %s2875_s30 = sphi %s2965_s30, %s29_s30   ;;  %s2871_s29 = sphi %s2963_s29, %s3491_s29   ;;  %s2867_s28 = sphi %s2961_s28, %s3490_s28   ;;  %s2863_s27 = sphi %s2959_s27, %s3489_s27   ;;  %s2859_s26 = sphi %s2957_s26, %s3493_s26   ;;  %s2855_s25 = sphi %s2955_s25, %s3492_s25  }
  0x14   : > { %3462 = sst [smem:[#allocation11_spill]] %s2871_s29  ;;  %s38_s15 = sadd.s32 1, %s2871_s29 }
  0x15   : > { %p39_p0 = scmp.ge.s32.totalorder %s38_s15, 2  ;;  %s74_s16 = sadd.s32 1, %s2863_s27 }
  0x16   : > { %p81_p1 = scmp.ne.s32.totalorder %s2863_s27, %s2859_s26  ;;  %p82_p2 = scmp.eq.s32.totalorder %s2875_s30, 0 }
  0x17   : > { %s3495_s15 = smov (%p39_p0, %s38_s15), 0  ;;  %p87_p4 = scmp.ne.s32.totalorder %s2859_s26, %s2855_s25 }
  0x18   : > { %3463 = sst [smem:[#allocation12_spill]] %s3495_s15  ;;  %p83_p3 = por %p82_p2, %p81_p1 }
  0x19   : > { %s71_s17 = ssub.s32 %s2871_s29, %s3495_s15  ;;  %p88_p5 = scmp.eq.s32.totalorder %s3443_s14, 0 }
  0x1a   : > { %p72_p6 = scmp.eq.s32.totalorder %s71_s17, 0  ;;  %p2606_p8 = scmp.lt.s32.totalorder %s2875_s30, 2 }
  0x1b   : > { %p2996_p7 = por %p88_p5, %p87_p4  ;;  %s3005_s20 = sand.u32 1, %s2863_s27  }
  0x1c   : > { %s3002_s19 = scalar_select %p72_p6, %s2863_s27, %s74_s16  }
  0x1d   : > { %p3007_p9 = pnand %p2606_p8, %p83_p3  ;;  %s461_s22 = sand.u32 1, %s2875_s30  }
  0x1e   : > { %3465 = sst [smem:[#allocation13_spill]] %s3002_s19  ;;  %s2221_s23 = sshll.u32 %s3005_s20, 6 }
  0x1f   : > { %s2519_s24 = sshll.u32 %s2871_s29, 6  ;;  %s3467_s3 = sld [smem:[#allocation17_spill]] }
  0x20   : > { %s465_s16 = scalar_lea.vmem [#allocation5], %s2221_s23  ;;  %p2227_p10 = scmp.ge.s32.totalorder %s2875_s30, 1 }
  0x21   : > { %s473_s15 = sshll.u32 %s465_s16, 4  ;;  %s3018_s27 = scalar_lea.sflag [#allocation6], %s461_s22  ;;  %s474_s15 = int_to_ptr.vmem [resolvable:$true] %s473_s15 }
  0x22   : > { %s2877_s13 = smov 64   ;;  %s2878_s0 = smov 4  }
  0x23   : > { %p554_p11 = scmp.lt.s32.totalorder %s2875_s30, 3  ;;  %s2587_s23 = smul.u32 192, %s2871_s29 }
  0x24   : > { %s3469_s1 = sld [smem:[#allocation15_spill]]  ;;  %s2879_s11 = smov 192  }
  0x25   : > { %s470_s14 = scalar_lea.hbm %s3467_s3, %s2519_s24  ;;  %p3024_p12 = pnand %p2227_p10, %p554_p11 }
  0x26   : > { %s471_s19 = sshll.u32 %s470_s14, 4  ;;  %s2586_s14 = smul.u32 192, %s3005_s20  ;;  %s472_s19 = int_to_ptr.hbm [resolvable:$true] %s471_s19 }
  0x27   : > { %2602 = dma.hbm_to_vmem [thread:$0]  (!%p3007_p9), %s472_s19, 1024, %s474_s15, %s3018_s27, %s2877_s13, %s2877_s13, %s2878_s0  }
  0x28   : > { %s436_s22 = scalar_lea.vmem [#allocation3], %s2586_s14  ;;  %s2224_s15 = sshll.u32 %s3005_s20, 7 }
  0x29   : > { %s444_s3 = sshll.u32 %s436_s22, 4  ;;  %s433_s19 = scalar_lea.sflag [#allocation4], %s3005_s20  ;;  %s445_s3 = int_to_ptr.vmem [resolvable:$true] %s444_s3 }
  0x2a   : > { %s441_s16 = scalar_lea.hbm %s3469_s1, %s2587_s23  ;;  %s2880_s10 = smov 12  }
  0x2b   : > { %s442_s12 = sshll.u32 %s441_s16, 4  ;;  %s2520_s8 = sshll.u32 %s2871_s29, 7  ;;  %s443_s12 = int_to_ptr.hbm [resolvable:$true] %s442_s12 }
  0x2c   : > { %2599 = dma.hbm_to_vmem [thread:$0]  (!%p3007_p9), %s443_s12, 3072, %s445_s3, %s433_s19, %s2879_s11, %s2879_s11, %s2880_s10  }
  0x2d   : > { %s3470_s9 = sld [smem:[#allocation21_spill]]  ;;  %s520_s25 = scalar_lea.vmem [#allocation7], %s2224_s15 }
  0x2e   : > { %s528_s23 = sshll.u32 %s520_s25, 4  ;;  %s560_s20 = sand.u32 (!%p3024_p12), 1, %s2859_s26   ;;  %s529_s23 = int_to_ptr.vmem [resolvable:$true] %s528_s23 }
  0x2f   : > { %s2588_s17 = smul.u32 (!%p3024_p12), 192, %s560_s20  ;;  %s561_s3 = scalar_lea.sflag (!%p3024_p12), [#allocation4], %s560_s20 }
  0x31   : > { %558 = sbr.rel (%p3024_p12) target bundleno = 2439 (0x987), region = 72  ;;  %s3047_s10 = scalar_lea.vmem (!%p3024_p12), [#allocation3], %s2588_s17 }
  0x33   : > { %s525_s6 = scalar_lea.hbm %s3470_s9, %s2520_s8 }
  0x34   : > { %s526_s14 = sshll.u32 %s525_s6, 4  ;;  %s527_s14 = int_to_ptr.hbm [resolvable:$true] %s526_s14 }
  0x35   : > { %2605 = dma.hbm_to_vmem [thread:$0]  (!%p3007_p9), %s527_s14, 2048, %s529_s23, %s3018_s27, %s2877_s13, %s2877_s13, %s2878_s0  }
  0x36   : > { %2846 = dma.done.wait (%p2996_p7), %s561_s3, 3072  }
  0x37   : > { %2848 = vsyncadd (%p2996_p7), %s561_s3, 4294964224  ;;  %s3471_s2 = sadd.s32 4294967295, %s2875_s30   ;;  %s2228_s0 = sshll.u32 %s560_s20, 6 }
  0x38   : > { %s570_s6 = sand.u32 1, %s3471_s2   ;;  %s3055_s8 = scalar_lea.vmem [#allocation5], %s2228_s0 }
  0x39   : > { %s571_s7 = scalar_lea.sflag [#allocation6], %s570_s6 }
  0x3a   : > { %2850 = dma.done.wait (%p2996_p7), %s571_s7, 3072  }
  0x3b   : > { %2852 = vsyncadd (%p2996_p7), %s571_s7, 4294964224  ;;  %s2229_s11 = sshll.u32 %s560_s20, 7  ;;  %p680_p13 = scmp.lt.s32.totalorder %s2867_s28, 1 }
  0x3c   : > { %s3473_s17 = sld [smem:[#allocation16_spill]]  ;;  %p2233_p0 = scmp.ne.s32.totalorder %s2867_s28, 0 }
  0x3d   : > { %s3063_s12 = scalar_select %p680_p13, %s2867_s28, 1 }
  0x3e   : > { %s3474_s7 = sld [smem:[#allocation19_spill]] }
  0x3f   : > { %s2589_s13 = smul.u32 3, %s3063_s12  ;;  %s2521_s2 = sshll.u32 %s3063_s12, 7 }
  0x40   : > { %s2232_s27 = sshll.u32 %s3063_s12, 1  ;;  %s3475_s24 = sld [smem:[#allocation20_spill]] }
  0x41   : > { %s3476_s19 = sld [smem:[#allocation22_spill]] }
  0x42   : > { %s3081_s3 = scalar_lea.vmem %s3473_s17, %s2589_s13  ;;  %s3477_s13 = sld [smem:[#allocation23_spill]] }
  0x43   : > { %s3478_s29 = sld [smem:[#allocation24_spill]] }
  0x44   : > { %s3087_s1 = scalar_lea.vmem %s3474_s7, %s2521_s2  ;;  %s3107_s2 = scalar_lea.vmem [#allocation7], %s2229_s11 }
  0x45   : > { %720 = sbr.rel (%p2233_p0) target bundleno = 78 (0x4e), region = 88  ;;  %s3479_s7 = sld [smem:[#allocation14_spill]] (!%p2233_p0) }
  0x46   : > { %s3093_s16 = scalar_lea.vmem %s3475_s24, %s2232_s27 }
  0x47   : > { %s704_s25 = scalar_lea.vmem %s3476_s19, %s3063_s12 }
  0x48   : > { %s707_s20 = scalar_lea.vmem %s3477_s13, %s3063_s12 }
  0x49   : > { %s710_s6 = scalar_lea.vmem %s3478_s29, %s3063_s12 }
  0x4b   : > { %v721_v0 = vld [vmem:[%s3479_s7] sm:$0xff]  ;;  %v722_v1 = vld [vmem:[%s3479_s7 + $0x8] sm:$0xff] }
  0x4c   : > { %723 = vst [vmem:[#allocation2] sm:$0xff] %v721_v0 }
  0x4d   : > { %724 = vst [vmem:[#allocation2 + $0x8] sm:$0xff] %v722_v1 }
  0x4e PF: > { %v2320_v2 = vld [vmem:[%s3047_s10 + $0xa8] sm:$0xf]  ;;  %v2544_v3 = vld [vmem:[%s3047_s10 + $0xb0] sm:$0xf0]  ;;  %v2543_v4 = vld [vmem:[%s3047_s10 + $0xac] sm:$0xf]  ;;  %s3480_s23 = scalar_lea.vmem %s3433_s4, %s3063_s12  ;;  %s3481_s21 = scalar_lea.vmem %s3434_s5, %s3063_s12 }
  0x4f   : > { %v2321_v5 = vor.u32 %v2544_v3, %v2320_v2  ;;  %v2322_v6 = vld [vmem:[%s3047_s10 + $0xb4] sm:$0xf0]  ;;  %v2308_v7 = vld [vmem:[%s3047_s10 + $0x90] sm:$0xf]  ;;  %v2541_v8 = vld [vmem:[%s3047_s10 + $0x98] sm:$0xf0] }
  0x50   : > { %v2325_v9 = vor.u32 %v2543_v4, %v2322_v6  ;;  %v2540_v10 = vld [vmem:[%s3047_s10 + $0x94] sm:$0xf]  ;;  %v2310_v11 = vld [vmem:[%s3047_s10 + $0x9c] sm:$0xf0]  ;;  %v2309_v12 = vor.u32 %v2541_v8, %v2308_v7  ;;  %v2296_v14 = vld [vmem:[%s3047_s10 + $0x78] sm:$0xf] }
  0x51   : > { %896 = vmatpush.bf16.msra.mxu0 %v2321_v5  ;;  %v2313_v13 = vor.u32 %v2540_v10, %v2310_v11  ;;  %v2538_v15 = vld [vmem:[%s3047_s10 + $0x80] sm:$0xf0]  ;;  %v2537_v16 = vld [vmem:[%s3047_s10 + $0x7c] sm:$0xf]  ;;  %v2298_v17 = vld [vmem:[%s3047_s10 + $0x84] sm:$0xf0] }
  0x52   : > { %910 = vmatpush.bf16.msra.mxu1 %v2325_v9  ;;  %v2297_v18 = vor.u32 %v2538_v15, %v2296_v14  ;;  %v2301_v19 = vor.u32 %v2537_v16, %v2298_v17  ;;  %v2284_v20 = vld [vmem:[%s3047_s10 + $0x60] sm:$0xf]  ;;  %v2535_v21 = vld [vmem:[%s3047_s10 + $0x68] sm:$0xf0]  ;;  %v2534_v22 = vld [vmem:[%s3047_s10 + $0x64] sm:$0xf] }
  0x53   : > { %v2286_v23 = vld [vmem:[%s3047_s10 + $0x6c] sm:$0xf0]  ;;  %v2272_v24 = vld [vmem:[%s3047_s10 + $0x48] sm:$0xf]  ;;  %v2285_v25 = vor.u32 %v2535_v21, %v2284_v20  ;;  %v2532_v26 = vld [vmem:[%s3047_s10 + $0x50] sm:$0xf0] }
  0x54   : > { %v2531_v27 = vld [vmem:[%s3047_s10 + $0x4c] sm:$0xf]  ;;  %v2289_v28 = vor.u32 %v2534_v22, %v2286_v23  ;;  %v2274_v29 = vld [vmem:[%s3047_s10 + $0x54] sm:$0xf0]  ;;  %v2273_v30 = vor.u32 %v2532_v26, %v2272_v24  ;;  %v2260_v32 = vld [vmem:[%s3047_s10 + $0x30] sm:$0xf] }
  0x55   : > { %897 = vmatpush.bf16.msra.mxu0 %v2309_v12  ;;  %v2277_v31 = vor.u32 %v2531_v27, %v2274_v29  ;;  %v2529_v33 = vld [vmem:[%s3047_s10 + $0x38] sm:$0xf0]  ;;  %v2528_v34 = vld [vmem:[%s3047_s10 + $0x34] sm:$0xf]  ;;  %v2262_v35 = vld [vmem:[%s3047_s10 + $0x3c] sm:$0xf0] }
  0x56   : > { %911 = vmatpush.bf16.msra.mxu1 %v2313_v13  ;;  %v2261_v36 = vor.u32 %v2529_v33, %v2260_v32  ;;  %v2265_v37 = vor.u32 %v2528_v34, %v2262_v35  ;;  %v2248_v38 = vld [vmem:[%s3047_s10 + $0x18] sm:$0xf]  ;;  %v2526_v39 = vld [vmem:[%s3047_s10 + $0x20] sm:$0xf0]  ;;  %v2525_v40 = vld [vmem:[%s3047_s10 + $0x1c] sm:$0xf] }
  0x57   : > { %v2250_v41 = vld [vmem:[%s3047_s10 + $0x24] sm:$0xf0]  ;;  %v2249_v42 = vor.u32 %v2526_v39, %v2248_v38  ;;  %v2236_v44 = vld [vmem:[%s3047_s10] sm:$0xf]  ;;  %v2523_v45 = vld [vmem:[%s3047_s10 + $0x8] sm:$0xf0] }
  0x58   : > { %v2253_v43 = vor.u32 %v2525_v40, %v2250_v41  ;;  %v2522_v46 = vld [vmem:[%s3047_s10 + $0x4] sm:$0xf]  ;;  %v2238_v47 = vld [vmem:[%s3047_s10 + $0xc] sm:$0xf0]  ;;  %v2237_v48 = vor.u32 %v2523_v45, %v2236_v44  ;;  %v3150_v50 = vld [vmem:[#allocation2 + $0x8] sm:$0xff]  ;;  %vm938_vm0 = vcmask 261120  }
  0x59   : > { %898 = vmatpush.bf16.msra.mxu0 %v2297_v18  ;;  %v3148_v49 = vld [vmem:[#allocation2] sm:$0xff]  ;;  %v2241_v51 = vor.u32 %v2522_v46, %v2238_v47  ;;  %s2881_s9 = smov 96   ;;  %s2882_s29 = smov 64   ;;  %vm991_vm1 = vcmask 64512   ;;  %v2545_v1 = vld [vmem:[%s3047_s10 + $0xb8] sm:$0xf0] }
  0x5a   : > { %912 = vmatpush.bf16.msra.mxu1 %v2301_v19  ;;  %v3154_v52 = vpack.c.bf16 %v3150_v50, %v3148_v49  ;;  %v3159_v53 = vld [vmem:[%s3081_s3] sm:$0x7]  ;;  %v2316_v2 = vld [vmem:[%s3047_s10 + $0x98] sm:$0xf]  ;;  %v2542_v4 = vld [vmem:[%s3047_s10 + $0xa0] sm:$0xf0] }
  0x5b   : > { %v763_v54 = vperm.slane %v3159_v53, 1  ;;  %v762_v55 = vperm.slane %v3159_v53, 0  ;;  %v2328_v0 = vld [vmem:[%s3047_s10 + $0xb0] sm:$0xf]  ;;  %v2317_v7 = vor.u32 %v2542_v4, %v2316_v2  ;;  %v2304_v8 = vld [vmem:[%s3047_s10 + $0x80] sm:$0xf] }
  0x5c   : > { %v2329_v3 = vor.u32 %v2545_v1, %v2328_v0  ;;  %v2539_v9 = vld [vmem:[%s3047_s10 + $0x88] sm:$0xf0]  ;;  %v2292_v11 = vld [vmem:[%s3047_s10 + $0x68] sm:$0xf]  ;;  %v2536_v12 = vld [vmem:[%s3047_s10 + $0x70] sm:$0xf0] }
  0x5d   : > { %899 = vmatpush.bf16.msra.mxu0 %v2285_v25  ;;  %v2305_v10 = vor.u32 %v2539_v9, %v2304_v8  ;;  %v2293_v15 = vor.u32 %v2536_v12, %v2292_v11  ;;  %v2280_v16 = vld [vmem:[%s3047_s10 + $0x50] sm:$0xf]  ;;  %v2533_v17 = vld [vmem:[%s3047_s10 + $0x58] sm:$0xf0]  ;;  %v2268_v19 = vld [vmem:[%s3047_s10 + $0x38] sm:$0xf] }
  0x5e   : > { %913 = vmatpush.bf16.msra.mxu1 %v2289_v28  ;;  %924 = vmatpush.bf16.msra.mxu2 %v2329_v3  ;;  %v2281_v18 = vor.u32 %v2533_v17, %v2280_v16  ;;  %v2530_v20 = vld [vmem:[%s3047_s10 + $0x40] sm:$0xf0]  ;;  %v2256_v22 = vld [vmem:[%s3047_s10 + $0x20] sm:$0xf]  ;;  %v2527_v23 = vld [vmem:[%s3047_s10 + $0x28] sm:$0xf0] }
  0x5f   : > { %v2269_v21 = vor.u32 %v2530_v20, %v2268_v19  ;;  %v2257_v24 = vor.u32 %v2527_v23, %v2256_v22  ;;  %v2244_v25 = vld [vmem:[%s3047_s10 + $0x8] sm:$0xf]  ;;  %v2524_v26 = vld [vmem:[%s3047_s10 + $0x10] sm:$0xf0]  ;;  %v764_v38 = vperm.slane %v3159_v53, 2  ;;  %s2883_s10 = smov 32  }
  0x60   : > { %v2245_v27 = vor.u32 %v2524_v26, %v2244_v25  ;;  %vm1478_vm2 = vcmask 523264   ;;  %vm1481_vm3 = vcmask 785408   ;;  %s3482_s19 = sld [smem:[#allocation18_spill]]  ;;  %p2514_p1 = scmp.ne.s32.totalorder %s2867_s28, 1 }
  0x61   : > { %900 = vmatpush.bf16.msra.mxu0 %v2273_v30 }
  0x62   : > { %914 = vmatpush.bf16.msra.mxu1 %v2277_v31  ;;  %925 = vmatpush.bf16.msra.mxu2 %v2317_v7 }
  0x65   : > { %901 = vmatpush.bf16.msra.mxu0 %v2261_v36 }
  0x66   : > { %915 = vmatpush.bf16.msra.mxu1 %v2265_v37  ;;  %926 = vmatpush.bf16.msra.mxu2 %v2305_v10  ;;  %s3483_s14 = scalar_lea.vmem %s3482_s19, %s3063_s12 }
  0x69   : > { %902 = vmatpush.bf16.msra.mxu0 %v2249_v42 }
  0x6a   : > { %916 = vmatpush.bf16.msra.mxu1 %v2253_v43  ;;  %927 = vmatpush.bf16.msra.mxu2 %v2293_v15 }
  0x6d   : > { %903 = vmatpush.bf16.msra.mxu0 %v2237_v48 }
  0x6e   : > { %917 = vmatpush.bf16.msra.mxu1 %v2241_v51  ;;  %928 = vmatpush.bf16.msra.mxu2 %v2281_v18 }
  0x70   : > { %904 = vmatmul.bf16.vlgmr.msra.gmra.mxu0 %v3154_v52 }
  0x71   : > { %918 = vmatmul.bf16.vlgmr.msra.gmra.mxu1 %v3154_v52 }
  0x72   : > { %929 = vmatpush.bf16.msra.mxu2 %v2269_v21 }
  0x76   : > { %930 = vmatpush.bf16.msra.mxu2 %v2257_v24 }
  0x7a   : > { %931 = vmatpush.bf16.msra.mxu2 %v2245_v27 }
  0x7d   : > { %932 = vmatmul.bf16.vlgmr.msra.gmra.mxu2 %v3154_v52 }
  0xed   : > { %v905_v56 = vpop.f32.mrf.mxu0 }
  0xee   : > { %v919_v57 = vpop.f32.mrf.mxu1  ;;  %v3165_v59 = vadd.f32 %v905_v56, %v762_v55 }
  0xef   : > { %v3163_v58 = vadd.f32 %v919_v57, %v763_v54 }
  0xf1   : > { %1062 = vrot.lane.b32.xlu2 %v3163_v58, %s2881_s9  ;;  %2330 = vmatpush.xpose.msk.msra.mxu3 %vm938_vm0, %v3163_v58 }
  0xf4   : > { %2331 = vmatmul.msk.f32.vlgmr.msra.gmra.mxu3 %vm938_vm0, %v3165_v59 }
  0xf5   : > { %v907_v61 = vpop.f32.mrf.mxu0 }
  0xf6   : > { %v921_v60 = vpop.f32.mrf.mxu1  ;;  %v3179_v63 = vadd.f32 %v907_v61, %v762_v55 }
  0xf7   : > { %v3173_v62 = vadd.f32 %v921_v60, %v763_v54 }
  0xf9   : > { %2332 = vmatpush.xpose.msk.msrb.mxu3 %vm938_vm0, %v3173_v62  ;;  %1060 = vrot.lane.b32.xlu2 %v3165_v59, %s2881_s9 }
  0xfc   : > { %2333 = vmatmul.msk.f32.vlgmr.msrb.gmra.mxu3 %vm938_vm0, %v3179_v63 }
 0x100   : > { %v933_v39 = vpop.f32.mrf.mxu2 }
 0x101   : > { %1194 = vrot.lane.b32.xlu2 %v3163_v58, %s2882_s29  ;;  %v3213_v40 = vadd.f32 %v933_v39, %v764_v38 }
 0x103   : > { %1032 = vmatpush.msra.mxu3 %v3213_v40 }
 0x108   : > { %v935_v41 = vpop.f32.mrf.mxu2 }
 0x109   : > { %1192 = vrot.lane.b32.xlu2 %v3165_v59, %s2882_s29  ;;  %v3218_v42 = vadd.f32 %v935_v41, %v764_v38 }
 0x10b   : > { %1055 = vmatpush.msrb.mxu3 %v3218_v42 }
 0x14b   : > { %v1063_v44 = vpop.permute.xlu2 %1062 }
 0x153   : > { %v1061_v51 = vpop.permute.xlu2 %1060 }
 0x15b   : > { %v1195_v54 = vpop.permute.xlu2 %1194 }
 0x163   : > { %v1193_v56 = vpop.permute.xlu2 %1192 }
 0x177   : > { %v962_v5 = vpop.f32.mrf.mxu3 }
 0x178   : > { %v992_v6 = vsel %vm991_vm1, %v962_v5, -inf }
 0x179   : > { %993 = vmax.xlane.f32.xlu0 %v992_v6 }
 0x17f   : > { %v988_v13 = vpop.f32.mrf.mxu3 }
 0x180   : > { %v995_v14 = vsel %vm991_vm1, %v988_v13, -inf }
 0x181   : > { %996 = vmax.xlane.f32.xlu0 %v995_v14 }
 0x195   : > { %1090 = vrot.lane.b32.xlu0 %v3173_v62, %s2881_s9 }
 0x1ec   : > { %v994_v28 = vpop.xlane.xlu0 %993 }
 0x1ed   : > { %v998_v29 = vsub.f32 %v962_v5, %v994_v28 }
 0x1ef   : > { %v1000_v30 = vmul.f32 1.442695, %v998_v29 }
 0x1f1   : > { %2689 = vpow2.f32 %v1000_v30 }
 0x1f4   : > { %v997_v31 = vpop.xlane.xlu0 %996 }
 0x1f5   : > { %v999_v32 = vsub.f32 %v988_v13, %v997_v31 }
 0x1f7   : > { %v2690_v33 = vpop.eup %2689  ;;  %v1002_v34 = vmul.f32 1.442695, %v999_v32 }
 0x1f8   : > { %v1004_v35 = vsel %vm991_vm1, %v2690_v33, 0.0 }
 0x1f9   : > { %2691 = vpow2.f32 %v1002_v34  ;;  %1005 = vadd.xlane.f32.xlu1 %v1004_v35 }
 0x1ff   : > { %v2692_v36 = vpop.eup %2691 }
 0x200   : > { %v1007_v37 = vsel %vm991_vm1, %v2692_v36, 0.0 }
 0x201   : > { %1008 = vadd.xlane.f32.xlu1 %v1007_v37 }
 0x207   : > { %v1091_v53 = vpop.permute.xlu0 %1090 }
 0x21a   : > { %1088 = vrot.lane.b32.xlu1 %v3179_v63, %s2881_s9 }
 0x222   : > { %1220 = vrot.lane.b32.xlu1 %v3179_v63, %s2882_s29 }
 0x26c   : > { %v1006_v43 = vpop.xlane.xlu1 %1005 }
 0x26d   : > { %2693 = vrcp.f32 %v1006_v43 }
 0x273   : > { %v2694_v45 = vpop.eup %2693 }
 0x274   : > { %v1012_v46 = vmul.f32 %v2694_v45, %v2690_v33  ;;  %v1009_v47 = vpop.xlane.xlu1 %1008 }
 0x275   : > { %2695 = vrcp.f32 %v1009_v47 }
 0x276   : > { %2334 = vmatmul.msk.f32.vlgmr.msra.gmra.mxu3 %vm991_vm1, %v1012_v46 }
 0x277   : > { %2336 = vmatpush.xpose.msk.msra.mxu3 %vm938_vm0, %v1063_v44 }
 0x27b   : > { %v2696_v48 = vpop.eup %2695 }
 0x27c   : > { %v1013_v52 = vmul.f32 %v2696_v48, %v2692_v36 }
 0x27e   : > { %2335 = vmatmul.msk.f32.vlgmr.msrb.gmra.mxu3 %vm991_vm1, %v1013_v52 }
 0x27f   : > { %2338 = vmatpush.xpose.msk.msrb.mxu3 %vm938_vm0, %v1091_v53 }
 0x286   : > { %2337 = vmatmul.msk.f32.vlgmr.msra.gmra.mxu3 %vm938_vm0, %v1061_v51 }
 0x287   : > { %2342 = vmatpush.xpose.msk.msra.mxu3 %vm938_vm0, %v1195_v54 }
 0x28c   : > { %v1089_v55 = vpop.permute.xlu1 %1088 }
 0x28e   : > { %2339 = vmatmul.msk.f32.vlgmr.msrb.gmra.mxu3 %vm938_vm0, %v1089_v55 }
 0x294   : > { %v1221_v9 = vpop.permute.xlu1 %1220 }
 0x296   : > { %2343 = vmatmul.msk.f32.vlgmr.msra.gmra.mxu3 %vm938_vm0, %v1193_v56  ;;  %v2663_v56 = vpack.i.bf16 %v3218_v42, %v3213_v40 }
 0x2f9   : > { %v3229_v57 = vpop.f32.mrf.mxu3 }
 0x301   : > { %v3231_v60 = vpop.f32.mrf.mxu3 }
 0x309   : > { %v1085_v61 = vpop.f32.mrf.mxu3 }
 0x30a   : > { %v1116_v0 = vsel %vm991_vm1, %v1085_v61, -inf }
 0x30b   : > { %1117 = vmax.xlane.f32.xlu2 %v1116_v0 }
 0x311   : > { %v1113_v1 = vpop.f32.mrf.mxu3 }
 0x312   : > { %v1119_v4 = vsel %vm991_vm1, %v1113_v1, -inf }
 0x319   : > { %v1217_v2 = vpop.f32.mrf.mxu3 }
 0x31a   : > { %v1248_v3 = vsel %vm991_vm1, %v1217_v2, -inf }
 0x31b   : > { %1249 = vmax.xlane.f32.xlu0 %v1248_v3 }
 0x323   : > { %1222 = vrot.lane.b32.xlu2 %v3173_v62, %s2882_s29 }
 0x32b   : > { %1352 = vrot.lane.b32.xlu2 %v3173_v62, %s2883_s10 }
 0x32f   : > { %1139 = vrot.lane.b32.xlu0 %v3213_v40, %s2881_s9 }
 0x337   : > { %1270 = vrot.lane.b32.xlu0 %v3213_v40, %s2882_s29 }
 0x33f   : > { %1350 = vrot.lane.b32.xlu0 %v3179_v63, %s2883_s10 }
 0x369   : > { %1120 = vmax.xlane.f32.xlu0 %v1119_v4 }
 0x37e   : > { %v1118_v5 = vpop.xlane.xlu2 %1117 }
 0x37f   : > { %v1122_v6 = vsub.f32 %v1085_v61, %v1118_v5 }
 0x381   : > { %v1124_v7 = vmul.f32 1.442695, %v1122_v6 }
 0x383   : > { %2697 = vpow2.f32 %v1124_v7 }
 0x386   : > { %v1223_v8 = vpop.permute.xlu2 %1222 }
 0x387   : > { %2344 = vmatpush.xpose.msk.msrb.mxu3 %vm938_vm0, %v1223_v8 }
 0x389   : > { %v2698_v62 = vpop.eup %2697 }
 0x38a   : > { %2345 = vmatmul.msk.f32.vlgmr.msrb.gmra.mxu3 %vm938_vm0, %v1221_v9  ;;  %v1128_v10 = vsel %vm991_vm1, %v2698_v62, 0.0 }
 0x38b   : > { %1129 = vadd.xlane.f32.xlu1 %v1128_v10 }
 0x38e   : > { %v1353_v11 = vpop.permute.xlu2 %1352  ;;  %v1250_v12 = vpop.xlane.xlu0 %1249 }
 0x38f   : > { %v1254_v63 = vsub.f32 %v1217_v2, %v1250_v12  ;;  %2350 = vmatpush.xpose.msk.msra.mxu3 %vm938_vm0, %v1353_v11 }
 0x391   : > { %v1256_v13 = vmul.f32 1.442695, %v1254_v63 }
 0x393   : > { %2699 = vpow2.f32 %v1256_v13 }
 0x399   : > { %v2700_v14 = vpop.eup %2699 }
 0x39a   : > { %v1260_v15 = vsel %vm991_vm1, %v2700_v14, 0.0 }
 0x39b   : > { %1261 = vadd.xlane.f32.xlu2 %v1260_v15  ;;  %v2553_v15 = vld [vmem:[%s3055_s8 + $0x38] sm:$0xff] }
 0x39c   : > { %1553 = vmatpush.bf16.msrb.mxu2 %v2553_v15 }
 0x3a1   : > { %v1140_v16 = vpop.permute.xlu0 %1139 }
 0x3a2   : > { %1160 = vmatpush.msrb.mxu0 %v1140_v16  ;;  %v2552_v16 = vld [vmem:[%s3055_s8 + $0x30] sm:$0xff] }
 0x3a3   : > { %1554 = vmatpush.bf16.msrb.mxu2 %v2552_v16  ;;  %v2422_v16 = vld [vmem:[%s3087_s1 + $0x48] sm:$0xf0] }
 0x3a4   : > { %1324 = vrot.lane.b32.xlu1 %v3163_v58, %s2883_s10 }
 0x3a9   : > { %v1271_v17 = vpop.permute.xlu0 %1270 }
 0x3aa   : > { %1291 = vmatpush.msra.mxu0 %v1271_v17  ;;  %v2551_v17 = vld [vmem:[%s3055_s8 + $0x28] sm:$0xff] }
 0x3ab   : > { %1555 = vmatpush.bf16.msrb.mxu2 %v2551_v17 }
 0x3b1   : > { %v1351_v18 = vpop.permute.xlu0 %1350 }
 0x3b2   : > { %2351 = vmatmul.msk.f32.vlgmr.msra.gmra.mxu3 %vm938_vm0, %v1351_v18  ;;  %v2550_v18 = vld [vmem:[%s3055_s8 + $0x20] sm:$0xff] }
 0x3b3   : > { %1322 = vrot.lane.b32.xlu2 %v3165_v59, %s2883_s10  ;;  %1556 = vmatpush.bf16.msrb.mxu2 %v2550_v18 }
 0x3dc   : > { %v1121_v20 = vpop.xlane.xlu0 %1120 }
 0x3dd   : > { %v1123_v22 = vsub.f32 %v1113_v1, %v1121_v20 }
 0x3df   : > { %v1126_v24 = vmul.f32 1.442695, %v1123_v22 }
 0x3fe   : > { %v1130_v19 = vpop.xlane.xlu1 %1129 }
 0x3ff   : > { %2701 = vrcp.f32 %v1130_v19  ;;  %v2549_v19 = vld [vmem:[%s3055_s8 + $0x18] sm:$0xff] }
 0x400   : > { %2703 = vpow2.f32 %v1126_v24  ;;  %1557 = vmatpush.bf16.msrb.mxu2 %v2549_v19  ;;  %v2412_v19 = vld [vmem:[%s3087_s1 + $0x30] sm:$0xf] }
 0x405   : > { %v2702_v21 = vpop.eup %2701 }
 0x406   : > { %v1136_v23 = vmul.f32 %v2702_v21, %v2698_v62  ;;  %v2704_v27 = vpop.eup %2703 }
 0x407   : > { %v1131_v30 = vsel %vm991_vm1, %v2704_v27, 0.0 }
 0x408   : > { %2340 = vmatmul.msk.f32.vlgmr.msrb.gmra.mxu0 %vm991_vm1, %v1136_v23 }
 0x40d   : > { %v1245_v25 = vpop.f32.mrf.mxu3 }
 0x40e   : > { %v1262_v58 = vpop.xlane.xlu2 %1261  ;;  %v1251_v26 = vsel %vm991_vm1, %v1245_v25, -inf }
 0x40f   : > { %2705 = vrcp.f32 %v1262_v58  ;;  %1252 = vmax.xlane.f32.xlu1 %v1251_v26  ;;  %v2547_v58 = vld [vmem:[%s3055_s8 + $0x8] sm:$0xff]  ;;  %v2546_v26 = vld [vmem:[%s3055_s8] sm:$0xff] }
 0x415   : > { %v2706_v28 = vpop.eup %2705 }
 0x416   : > { %v1268_v29 = vmul.f32 %v2706_v28, %v2700_v14  ;;  %v1325_v59 = vpop.permute.xlu1 %1324  ;;  %v1323_v31 = vpop.permute.xlu2 %1322 }
 0x417   : > { %2348 = vmatpush.xpose.msk.msrb.mxu0 %vm938_vm0, %v1325_v59  ;;  %1132 = vadd.xlane.f32.xlu1 %v1131_v30 }
 0x418   : > { %2346 = vmatmul.msk.f32.vlgmr.msra.gmra.mxu0 %vm991_vm1, %v1268_v29 }
 0x420   : > { %2349 = vmatmul.msk.f32.vlgmr.msrb.gmra.mxu0 %vm938_vm0, %v1323_v31 }
 0x435   : > { %v1375_v32 = vpop.f32.mrf.mxu3 }
 0x436   : > { %v1381_v33 = vsel %vm991_vm1, %v1375_v32, -inf }
 0x437   : > { %1382 = vmax.xlane.f32.xlu0 %v1381_v33 }
 0x44b   : > { %1166 = vrot.lane.b32.xlu0 %v3218_v42, %s2881_s9 }
 0x482   : > { %v1253_v35 = vpop.xlane.xlu1 %1252 }
 0x483   : > { %v1255_v36 = vsub.f32 %v1245_v25, %v1253_v35  ;;  %v2548_v25 = vld [vmem:[%s3055_s8 + $0x10] sm:$0xff] }
 0x484   : > { %1558 = vmatpush.bf16.msrb.mxu2 %v2548_v25 }
 0x485   : > { %v1162_v34 = vpop.f32.mrf.mxu0  ;;  %v1258_v38 = vmul.f32 1.442695, %v1255_v36 }
 0x487   : > { %2707 = vpow2.f32 %v1258_v38 }
 0x488   : > { %1559 = vmatpush.bf16.msrb.mxu2 %v2547_v58  ;;  %v2404_v58 = vld [vmem:[%s3087_s1 + $0x20] sm:$0xf] }
 0x48a   : > { %v1133_v48 = vpop.xlane.xlu1 %1132 }
 0x48c   : > { %1560 = vmatpush.bf16.msrb.mxu2 %v2546_v26  ;;  %v2559_v26 = vld [vmem:[%s3087_s1 + $0x24] sm:$0xf0] }
 0x48d   : > { %v2708_v43 = vpop.eup %2707 }
 0x48e   : > { %v1263_v44 = vsel %vm991_vm1, %v2708_v43, 0.0 }
 0x495   : > { %v3265_v37 = vpop.f32.mrf.mxu0 }
 0x49d   : > { %v1347_v39 = vpop.f32.mrf.mxu0 }
 0x49e   : > { %v1378_v41 = vsel %vm991_vm1, %v1347_v39, -inf }
 0x49f   : > { %1379 = vmax.xlane.f32.xlu2 %v1378_v41 }
 0x4a7   : > { %1264 = vadd.xlane.f32.xlu2 %v1263_v44  ;;  %v2683_v44 = vld [vmem:[%s3480_s23] ss:$0 sm:$0xff] }
 0x4aa   : > { %v1383_v45 = vpop.xlane.xlu0 %1382 }
 0x4ab   : > { %v1385_v46 = vsub.f32 %v1375_v32, %v1383_v45 }
 0x4ad   : > { %v1388_v47 = vmul.f32 1.442695, %v1385_v46 }
 0x4af   : > { %2709 = vpow2.f32 %v1388_v47 }
 0x4b0   : > { %2711 = vrcp.f32 %v1133_v48 }
 0x4b5   : > { %v2710_v51 = vpop.eup %2709 }
 0x4b6   : > { %v1393_v52 = vsel %vm991_vm1, %v2710_v51, 0.0  ;;  %v2712_v53 = vpop.eup %2711 }
 0x4b7   : > { %1394 = vadd.xlane.f32.xlu2 %v1393_v52  ;;  %v1137_v55 = vmul.f32 %v2712_v53, %v2704_v27  ;;  %v2884_v52 = vmov 128.0  }
 0x4bd   : > { %v1167_v54 = vpop.permute.xlu0 %1166 }
 0x4be   : > { %1187 = vmatpush.msrb.mxu1 %v1167_v54  ;;  %v2444_v54 = vld [vmem:[%s3087_s1 + $0x70] sm:$0xf] }
 0x4bf   : > { %2341 = vmatmul.msk.f32.vlgmr.msrb.gmra.mxu1 %vm991_vm1, %v1137_v55  ;;  %v2569_v55 = vld [vmem:[%s3087_s1 + $0x74] sm:$0xf0] }
 0x4cf   : > { %2664 = vrot.lane.b32.xlu2 %v2663_v56, %s2883_s10  ;;  %v2568_v56 = vld [vmem:[%s3087_s1 + $0x74] sm:$0xf] }
 0x512   : > { %v1380_v61 = vpop.xlane.xlu2 %1379 }
 0x513   : > { %v1384_v0 = vsub.f32 %v1347_v39, %v1380_v61  ;;  %v2445_v61 = vor.u32 %v2569_v55, %v2444_v54 }
 0x515   : > { %v1386_v1 = vmul.f32 1.442695, %v1384_v0  ;;  %1735 = vmatpush.bf16.msrb.mxu3 %v2445_v61  ;;  %v2585_v61 = vld [vmem:[%s3107_s2 + $0x78] sm:$0xff] }
 0x516   : > { %1915 = vmatpush.bf16.msra.mxu2 %v2585_v61 }
 0x517   : > { %2713 = vpow2.f32 %v1386_v1 }
 0x51a   : > { %v1265_v4 = vpop.xlane.xlu2 %1264 }
 0x51d   : > { %v2714_v2 = vpop.eup %2713 }
 0x51e   : > { %v1390_v3 = vsel %vm991_vm1, %v2714_v2, 0.0 }
 0x51f   : > { %1391 = vadd.xlane.f32.xlu1 %v1390_v3  ;;  %v2567_v3 = vld [vmem:[%s3087_s1 + $0x64] sm:$0xf0] }
 0x52a   : > { %v1395_v5 = vpop.xlane.xlu2 %1394 }
 0x532   : > { %v2665_v6 = vpop.permute.xlu2 %2664 }
 0x533   : > { %v2666_v7 = vunpack.i.l.bf16 %v2665_v6 }
 0x535   : > { %1421 = vmatpush.msra.mxu0 %v2666_v7 }
 0x538   : > { %1296 = vrot.lane.b32.xlu1 %v3218_v42, %s2882_s29  ;;  %v2667_v42 = vunpack.i.h.bf16 %v2665_v6  ;;  %v2438_v6 = vld [vmem:[%s3087_s1 + $0x68] sm:$0xf0] }
 0x53c   : > { %v1189_v8 = vpop.f32.mrf.mxu1 }
 0x53d   : > { %v2668_v40 = vpack.i.bf16 %v1189_v8, %v1162_v34 }
 0x53f   : > { %2669 = vrot.lane.b32.xlu0 %v2668_v40, %s2883_s10  ;;  %v2428_v40 = vld [vmem:[%s3087_s1 + $0x50] sm:$0xf] }
 0x592   : > { %v1392_v62 = vpop.xlane.xlu1 %1391 }
 0x593   : > { %2715 = vrcp.f32 %v1392_v62  ;;  %v2565_v62 = vld [vmem:[%s3087_s1 + $0x54] sm:$0xf0] }
 0x594   : > { %2717 = vrcp.f32 %v1265_v4  ;;  %v2566_v4 = vld [vmem:[%s3087_s1 + $0x64] sm:$0xf] }
 0x595   : > { %2719 = vrcp.f32 %v1395_v5  ;;  %v2441_v7 = vor.u32 %v2566_v4, %v2438_v6  ;;  %v2583_v6 = vld [vmem:[%s3107_s2 + $0x68] sm:$0xff] }
 0x596   : > { %2721 = vrcp.f32 %v2884_v52 }
 0x599   : > { %v2716_v9 = vpop.eup %2715 }
 0x59a   : > { %v1398_v10 = vmul.f32 %v2716_v9, %v2714_v2  ;;  %v2718_v11 = vpop.eup %2717  ;;  %v2436_v2 = vld [vmem:[%s3087_s1 + $0x60] sm:$0xf]  ;;  %v2564_v9 = vld [vmem:[%s3087_s1 + $0x54] sm:$0xf] }
 0x59b   : > { %v1269_v12 = vmul.f32 %v2718_v11, %v2708_v43  ;;  %v2720_v13 = vpop.eup %2719  ;;  %v2437_v5 = vor.u32 %v2567_v3, %v2436_v2  ;;  %v2430_v11 = vld [vmem:[%s3087_s1 + $0x58] sm:$0xf0]  ;;  %v2576_v2 = vld [vmem:[%s3107_s2 + $0x30] sm:$0xff] }
 0x59c   : > { %2352 = vmatmul.msk.f32.vlgmr.msra.gmra.mxu0 %vm991_vm1, %v1398_v10  ;;  %v1399_v14 = vmul.f32 %v2720_v13, %v2710_v51  ;;  %v2722_v53 = vpop.eup %2721  ;;  %v2429_v10 = vor.u32 %v2565_v62, %v2428_v40  ;;  %v2563_v13 = vld [vmem:[%s3087_s1 + $0x44] sm:$0xf0]  ;;  %v2582_v62 = vld [vmem:[%s3107_s2 + $0x60] sm:$0xff] }
 0x59d   : > { %v1576_v1 = vmul.f32 128.0, %v2722_v53  ;;  %1736 = vmatpush.bf16.msrb.mxu3 %v2437_v5  ;;  %vm1580_vm4 = vweird.f32 %v2722_v53 }
 0x59f   : > { %v1577_v8 = vsub.f32 1.0, %v1576_v1  ;;  %v2584_v1 = vld [vmem:[%s3107_s2 + $0x70] sm:$0xff] }
 0x5a0   : > { %1916 = vmatpush.bf16.msra.mxu2 %v2584_v1 }
 0x5a1   : > { %1737 = vmatpush.bf16.msrb.mxu3 %v2429_v10 }
 0x5a4   : > { %1917 = vmatpush.bf16.msra.mxu2 %v2583_v6 }
 0x5a8   : > { %1918 = vmatpush.bf16.msra.mxu2 %v2582_v62 }
 0x5aa   : > { %v1297_v63 = vpop.permute.xlu1 %1296 }
 0x5ab   : > { %1317 = vmatpush.msra.mxu1 %v1297_v63  ;;  %v1578_v63 = vmul.f32 %v2722_v53, %v1577_v8 }
 0x5ac   : > { %2347 = vmatmul.msk.f32.vlgmr.msra.gmra.mxu1 %vm991_vm1, %v1269_v12  ;;  %v2433_v12 = vor.u32 %v2564_v9, %v2430_v11 }
 0x5ad   : > { %1447 = vmatpush.msrb.mxu1 %v2667_v42  ;;  %v2420_v42 = vld [vmem:[%s3087_s1 + $0x40] sm:$0xf]  ;;  %v1579_v18 = vadd.f32 %v2722_v53, %v1578_v63 }
 0x5ae   : > { %v2421_v15 = vor.u32 %v2563_v13, %v2420_v42 }
 0x5af   : > { %v3333_v25 = vsel %vm1580_vm4, %v2722_v53, %v1579_v18 }
 0x5b0   : > { %1738 = vmatpush.bf16.msrb.mxu3 %v2421_v15 }
 0x5b1   : > { %v2670_v27 = vpop.permute.xlu0 %2669 }
 0x5b2   : > { %v2672_v29 = vunpack.i.h.bf16 %v2670_v27  ;;  %v2671_v59 = vunpack.i.l.bf16 %v2670_v27  ;;  %v2558_v27 = vld [vmem:[%s3087_s1 + $0x24] sm:$0xf] }
 0x5b4   : > { %2353 = vmatmul.msk.f32.vlgmr.msrb.gmra.mxu1 %vm991_vm1, %v1399_v14  ;;  %v1477_v33 = vsel %vm938_vm0, %v3231_v60, %v2672_v29  ;;  %v1476_v34 = vsel %vm938_vm0, %v3229_v57, %v2671_v59  ;;  %v2562_v14 = vld [vmem:[%s3087_s1 + $0x44] sm:$0xf]  ;;  %v2406_v29 = vld [vmem:[%s3087_s1 + $0x28] sm:$0xf0] }
 0x5b5   : > { %v2425_v17 = vor.u32 %v2562_v14, %v2422_v16 }
 0x619   : > { %v1423_v22 = vpop.f32.mrf.mxu0 }
 0x629   : > { %v1319_v20 = vpop.f32.mrf.mxu1 }
 0x62a   : > { %v2673_v21 = vpack.i.bf16 %v1319_v20, %v3265_v37  ;;  %v2561_v20 = vld [vmem:[%s3087_s1 + $0x34] sm:$0xf0] }
 0x62c   : > { %2674 = vrot.lane.b32.xlu0 %v2673_v21, %s2882_s29  ;;  %v2560_v21 = vld [vmem:[%s3087_s1 + $0x34] sm:$0xf] }
 0x631   : > { %v1449_v23 = vpop.f32.mrf.mxu1 }
 0x632   : > { %v2678_v24 = vpack.i.bf16 %v1449_v23, %v1423_v22  ;;  %v2413_v22 = vor.u32 %v2561_v20, %v2412_v19  ;;  %v2414_v23 = vld [vmem:[%s3087_s1 + $0x38] sm:$0xf0] }
 0x634   : > { %2679 = vrot.lane.b32.xlu1 %v2678_v24, %s2881_s9  ;;  %v2417_v24 = vor.u32 %v2560_v21, %v2414_v23  ;;  %1739 = vmatpush.bf16.msrb.mxu3 %v2413_v22  ;;  %v2685_v22 = vld [vmem:[%s3483_s14] ss:$0 sm:$0xff] }
 0x69e   : > { %v2675_v28 = vpop.permute.xlu0 %2674 }
 0x69f   : > { %v2677_v30 = vunpack.i.h.bf16 %v2675_v28  ;;  %v2676_v31 = vunpack.i.l.bf16 %v2675_v28  ;;  %v2405_v28 = vor.u32 %v2559_v26, %v2404_v58 }
 0x6a1   : > { %v1480_v37 = vsel %vm1478_vm2, %v1477_v33, %v2677_v30  ;;  %v1479_v38 = vsel %vm1478_vm2, %v1476_v34, %v2676_v31  ;;  %v2409_v30 = vor.u32 %v2558_v27, %v2406_v29  ;;  %1740 = vmatpush.bf16.msrb.mxu3 %v2405_v28  ;;  %v2396_v33 = vld [vmem:[%s3087_s1 + $0x10] sm:$0xf]  ;;  %v2557_v34 = vld [vmem:[%s3087_s1 + $0x14] sm:$0xf0]  ;;  %v2580_v28 = vld [vmem:[%s3107_s2 + $0x50] sm:$0xff] }
 0x6a2   : > { %v2574_v27 = vld [vmem:[%s3107_s2 + $0x20] sm:$0xff]  ;;  %v2573_v29 = vld [vmem:[%s3107_s2 + $0x18] sm:$0xff] }
 0x6a6   : > { %v2680_v32 = vpop.permute.xlu1 %2679 }
 0x6a7   : > { %v2682_v35 = vunpack.i.h.bf16 %v2680_v32  ;;  %v2681_v36 = vunpack.i.l.bf16 %v2680_v32 }
 0x6a9   : > { %v1482_v39 = vsel %vm1481_vm3, %v1479_v38, %v2681_v36  ;;  %v1483_v41 = vsel %vm1481_vm3, %v1480_v37, %v2682_v35  ;;  %v2556_v35 = vld [vmem:[%s3087_s1 + $0x14] sm:$0xf]  ;;  %v2397_v38 = vor.u32 %v2557_v34, %v2396_v33  ;;  %v1648_v34 = vld [vmem:[%s3093_s16] sm:$0x3] }
 0x6aa   : > { %v1501_v43 = vpack.c.bf16 %v1483_v41, %v1482_v39  ;;  %v2398_v39 = vld [vmem:[%s3087_s1 + $0x18] sm:$0xf0]  ;;  %v2388_v41 = vld [vmem:[%s3087_s1] sm:$0xf]  ;;  %v2570_v33 = vld [vmem:[%s3107_s2] sm:$0xff] }
 0x6ab   : > { %1741 = vmatpush.bf16.msrb.mxu3 %v2397_v38 }
 0x6ac   : > { %1561 = vmatmul.bf16.vlgmr.msrb.gmra.mxu2 %v1501_v43  ;;  %v2555_v43 = vld [vmem:[%s3087_s1 + $0x4] sm:$0xf0] }
 0x72f   : > { %v1562_v45 = vpop.f32.mrf.mxu2 }
 0x730   : > { %v1563_v60 = vadd.f32 %v2683_v44, %v1562_v45  ;;  %v2554_v45 = vld [vmem:[%s3087_s1 + $0x4] sm:$0xf] }
 0x732   : > { %v3302_v57 = vadd.f32 %v1563_v60, %v3148_v49  ;;  %v2390_v60 = vld [vmem:[%s3087_s1 + $0x8] sm:$0xf0] }
 0x734   : > { %1571 = vadd.xlane.f32.xlu0 %v3302_v57  ;;  %v1584_v46 = vmul.f32 %v3302_v57, %v3302_v57 }
 0x736   : > { %1586 = vadd.xlane.f32.xlu1 %v1584_v46 }
 0x737   : > { %v1564_v47 = vpop.f32.mrf.mxu2 }
 0x738   : > { %v1565_v48 = vadd.f32 %v2683_v44, %v1564_v47  ;;  %v2401_v44 = vor.u32 %v2556_v35, %v2398_v39  ;;  %v2389_v47 = vor.u32 %v2555_v43, %v2388_v41  ;;  %v1651_v41 = vperm.slane %v1648_v34, 0 }
 0x73a   : > { %v3308_v51 = vadd.f32 %v1565_v48, %v3150_v50  ;;  %v2446_v50 = vld [vmem:[%s3087_s1 + $0x78] sm:$0xf0]  ;;  %v2393_v48 = vor.u32 %v2554_v45, %v2390_v60  ;;  %1742 = vmatpush.bf16.msrb.mxu3 %v2389_v47 }
 0x73b   : > { %v2449_v0 = vor.u32 %v2568_v56, %v2446_v50  ;;  %v2577_v50 = vld [vmem:[%s3107_s2 + $0x38] sm:$0xff] }
 0x73c   : > { %1573 = vadd.xlane.f32.xlu2 %v3308_v51  ;;  %v1585_v49 = vmul.f32 %v3308_v51, %v3308_v51  ;;  %1901 = vmatpush.bf16.msra.mxu1 %v2577_v50 }
 0x73d   : > { %1749 = vmatpush.bf16.msrb.mxu0 %v2449_v0 }
 0x73e   : > { %1588 = vadd.xlane.f32.xlu0 %v1585_v49 }
 0x740   : > { %1902 = vmatpush.bf16.msra.mxu1 %v2576_v2 }
 0x741   : > { %1750 = vmatpush.bf16.msrb.mxu0 %v2441_v7  ;;  %v2575_v7 = vld [vmem:[%s3107_s2 + $0x28] sm:$0xff] }
 0x744   : > { %1903 = vmatpush.bf16.msra.mxu1 %v2575_v7 }
 0x745   : > { %1751 = vmatpush.bf16.msrb.mxu0 %v2433_v12 }
 0x748   : > { %1904 = vmatpush.bf16.msra.mxu1 %v2574_v27  ;;  %v2688_v27 = vld [vmem:[%s710_s6] ss:$0 sm:$0xff]  ;;  %s3487_s6 = sld [smem:[#allocation25_spill]] (!%p2514_p1) }
 0x749   : > { %1752 = vmatpush.bf16.msrb.mxu0 %v2425_v17  ;;  %v2684_v17 = vld [vmem:[%s3481_s21] ss:$0 sm:$0xff] }
 0x74c   : > { %1905 = vmatpush.bf16.msra.mxu1 %v2573_v29 }
 0x74d   : > { %1753 = vmatpush.bf16.msrb.mxu0 %v2417_v24 }
 0x751   : > { %1754 = vmatpush.bf16.msrb.mxu0 %v2409_v30  ;;  %v2572_v30 = vld [vmem:[%s3107_s2 + $0x10] sm:$0xff] }
 0x752   : > { %1906 = vmatpush.bf16.msra.mxu1 %v2572_v30 }
 0x755   : > { %1755 = vmatpush.bf16.msrb.mxu0 %v2401_v44 }
 0x759   : > { %1756 = vmatpush.bf16.msrb.mxu0 %v2393_v48 }
 0x7a7   : > { %v1572_v59 = vpop.xlane.xlu0 %1571 }
 0x7a8   : > { %v3340_v31 = vmul.f32 %v3333_v25, %v1572_v59  ;;  %v2579_v59 = vld [vmem:[%s3107_s2 + $0x48] sm:$0xff] }
 0x7a9   : > { %v1587_v32 = vpop.xlane.xlu1 %1586 }
 0x7aa   : > { %v1592_v36 = vmul.f32 %v3340_v31, %v3340_v31  ;;  %v1590_v37 = vmul.f32 %v1587_v32, %v3333_v25  ;;  %v1618_v14 = vsub.f32 %v3302_v57, %v3340_v31  ;;  %v2578_v31 = vld [vmem:[%s3107_s2 + $0x40] sm:$0xff]  ;;  %v2571_v32 = vld [vmem:[%s3107_s2 + $0x8] sm:$0xff] }
 0x7ab   : > { %1907 = vmatpush.bf16.msra.mxu1 %v2571_v32 }
 0x7ac   : > { %v1594_v46 = vsub.f32 %v1590_v37, %v1592_v36  ;;  %v1652_v36 = vperm.slane %v1648_v34, 1 }
 0x7ae   : > { %v1596_v49 = vadd.f32 1e-05, %v1594_v46 }
 0x7af   : > { %v1574_v52 = vpop.xlane.xlu2 %1573  ;;  %1908 = vmatpush.bf16.msra.mxu1 %v2570_v33 }
 0x7b0   : > { %2723 = vrsqrt.f32 %v1596_v49  ;;  %v1583_v53 = vmul.f32 %v3333_v25, %v1574_v52  ;;  %vm1604_vm6 = vweird.f32 %v1596_v49 }
 0x7b1   : > { %v1589_v54 = vpop.xlane.xlu0 %1588 }
 0x7b2   : > { %v1593_v55 = vmul.f32 %v1583_v53, %v1583_v53  ;;  %v1591_v56 = vmul.f32 %v1589_v54, %v3333_v25  ;;  %v1619_v19 = vsub.f32 %v3308_v51, %v1583_v53  ;;  %v2581_v51 = vld [vmem:[%s3107_s2 + $0x58] sm:$0xff]  ;;  %v2686_v54 = vld [vmem:[%s704_s25] ss:$0 sm:$0xff] }
 0x7b3   : > { %1919 = vmatpush.bf16.msra.mxu2 %v2581_v51 }
 0x7b4   : > { %v1595_v0 = vsub.f32 %v1591_v56, %v1593_v55 }
 0x7b6   : > { %v2724_v3 = vpop.eup %2723  ;;  %v1597_v4 = vadd.f32 1e-05, %v1595_v0 }
 0x7b7   : > { %v1599_v5 = vmul.f32 %v2724_v3, %v1596_v49  ;;  %vm1605_vm5 = vweird.f32 %v2724_v3  ;;  %1920 = vmatpush.bf16.msra.mxu2 %v2580_v28 }
 0x7b8   : > { %2725 = vrsqrt.f32 %v1597_v4  ;;  %vm1606_vm7 = vmor %vm1604_vm6, %vm1605_vm5  ;;  %vm1614_vm9 = vweird.f32 %v1597_v4 }
 0x7b9   : > { %v1600_v8 = vmul.f32 %v2724_v3, %v1599_v5 }
 0x7bb   : > { %v1601_v40 = vmul.f32 0.5, %v1600_v8  ;;  %1921 = vmatpush.bf16.msra.mxu2 %v2579_v59 }
 0x7bd   : > { %v1602_v9 = vsub.f32 1.5, %v1601_v40 }
 0x7be   : > { %v2726_v10 = vpop.eup %2725 }
 0x7bf   : > { %v1603_v11 = vmul.f32 %v2724_v3, %v1602_v9  ;;  %v1609_v12 = vmul.f32 %v2726_v10, %v1597_v4  ;;  %vm1615_vm8 = vweird.f32 %v2726_v10  ;;  %1922 = vmatpush.bf16.msra.mxu2 %v2578_v31 }
 0x7c0   : > { %vm1616_vm10 = vmor %vm1614_vm9, %vm1615_vm8 }
 0x7c1   : > { %v1610_v63 = vmul.f32 %v2726_v10, %v1609_v12  ;;  %v1607_v42 = vsel %vm1606_vm7, %v2724_v3, %v1603_v11 }
 0x7c2   : > { %v1620_v16 = vmul.f32 %v1618_v14, %v1607_v42 }
 0x7c3   : > { %v1611_v13 = vmul.f32 0.5, %v1610_v63 }
 0x7c4   : > { %v1625_v57 = vmul.f32 %v2684_v17, %v1620_v16 }
 0x7c5   : > { %v1612_v15 = vsub.f32 1.5, %v1611_v13 }
 0x7c6   : > { %v1630_v24 = vadd.f32 %v2685_v22, %v1625_v57 }
 0x7c7   : > { %v1613_v18 = vmul.f32 %v2726_v10, %v1612_v15 }
 0x7c9   : > { %v1617_v20 = vsel %vm1616_vm10, %v2726_v10, %v1613_v18 }
 0x7ca   : > { %v1621_v21 = vmul.f32 %v1619_v19, %v1617_v20 }
 0x7cc   : > { %v1626_v23 = vmul.f32 %v2684_v17, %v1621_v21 }
 0x7ce   : > { %v1631_v58 = vadd.f32 %v2685_v22, %v1626_v23 }
 0x7d0   : > { %v1649_v26 = vpack.c.bf16 %v1631_v58, %v1630_v24 }
 0x7d2   : > { %1743 = vmatmul.bf16.vlgmr.msrb.gmra.mxu3 %v1649_v26  ;;  %1757 = vmatmul.bf16.vlgmr.msrb.gmra.mxu0 %v1649_v26 }
 0x84f   : > { %v1758_v35 = vpop.f32.mrf.mxu0 }
 0x850   : > { %v1759_v38 = vadd.f32 %v1758_v35, %v1652_v36 }
 0x852   : > { %v1764_v44 = vmax.f32 %v1759_v38, 0.0 }
 0x855   : > { %v1744_v37 = vpop.f32.mrf.mxu3 }
 0x856   : > { %v1745_v60 = vadd.f32 %v1744_v37, %v1651_v41 }
 0x857   : > { %v1760_v39 = vpop.f32.mrf.mxu0 }
 0x858   : > { %v1761_v43 = vadd.f32 %v1760_v39, %v1652_v36  ;;  %v1763_v49 = vmax.f32 %v1745_v60, 0.0 }
 0x85a   : > { %v1766_v45 = vmax.f32 %v1761_v43, 0.0 }
 0x85c   : > { %v1801_v46 = vpack.c.bf16 %v1766_v45, %v1764_v44 }
 0x85d   : > { %v1746_v47 = vpop.f32.mrf.mxu3 }
 0x85e   : > { %v1747_v48 = vadd.f32 %v1746_v47, %v1651_v41  ;;  %1923 = vmatmul.bf16.vlgmr.msra.gmra.mxu2 %v1801_v46 }
 0x860   : > { %v1765_v52 = vmax.f32 %v1747_v48, 0.0 }
 0x862   : > { %v1800_v53 = vpack.c.bf16 %v1765_v52, %v1763_v49 }
 0x864   : > { %1909 = vmatmul.bf16.vlgmr.msra.gmra.mxu1 %v1800_v53 }
 0x8e1   : > { %v1910_v55 = vpop.f32.mrf.mxu1  ;;  %v1924_v56 = vpop.f32.mrf.mxu2 }
 0x8e2   : > { %v1911_v61 = vadd.f32 %v2686_v54, %v1910_v55 }
 0x8e4   : > { %v1925_v50 = vadd.f32 %v1924_v56, %v1911_v61 }
 0x8e6   : > { %v1931_v0 = vadd.f32 %v1925_v50, %v1630_v24 }
 0x8e8   : > { %1933 = vadd.xlane.f32.xlu2 %v1931_v0  ;;  %v1939_v1 = vmul.f32 %v1931_v0, %v1931_v0 }
 0x8e9   : > { %v1912_v2 = vpop.f32.mrf.mxu1  ;;  %v1926_v4 = vpop.f32.mrf.mxu2 }
 0x8ea   : > { %v1913_v3 = vadd.f32 %v2686_v54, %v1912_v2  ;;  %1941 = vadd.xlane.f32.xlu0 %v1939_v1 }
 0x8ec   : > { %v1927_v5 = vadd.f32 %v1926_v4, %v1913_v3 }
 0x8ee   : > { %v1932_v6 = vadd.f32 %v1927_v5, %v1631_v58 }
 0x8f0   : > { %1935 = vadd.xlane.f32.xlu1 %v1932_v6  ;;  %v1940_v7 = vmul.f32 %v1932_v6, %v1932_v6 }
 0x8f2   : > { %1943 = vadd.xlane.f32.xlu2 %v1940_v7 }
 0x95b   : > { %v1934_v8 = vpop.xlane.xlu2 %1933 }
 0x95c   : > { %v1937_v40 = vmul.f32 %v1934_v8, %v3333_v25 }
 0x95d   : > { %v1942_v62 = vpop.xlane.xlu0 %1941 }
 0x95e   : > { %v1947_v9 = vmul.f32 %v1937_v40, %v1937_v40  ;;  %v1945_v10 = vmul.f32 %v1942_v62, %v3333_v25  ;;  %v1973_v58 = vsub.f32 %v1931_v0, %v1937_v40 }
 0x960   : > { %v1949_v11 = vsub.f32 %v1945_v10, %v1947_v9 }
 0x962   : > { %v1951_v12 = vadd.f32 1e-05, %v1949_v11 }
 0x963   : > { %v1936_v63 = vpop.xlane.xlu1 %1935 }
 0x964   : > { %2727 = vrsqrt.f32 %v1951_v12  ;;  %v1938_v42 = vmul.f32 %v1936_v63, %v3333_v25  ;;  %vm1959_vm12 = vweird.f32 %v1951_v12 }
 0x965   : > { %v1944_v13 = vpop.xlane.xlu2 %1943 }
 0x966   : > { %v1948_v14 = vmul.f32 %v1938_v42, %v1938_v42  ;;  %v1946_v15 = vmul.f32 %v1944_v13, %v3333_v25  ;;  %v2687_v25 = vld [vmem:[%s707_s20] ss:$0 sm:$0xff]  ;;  %v1974_v33 = vsub.f32 %v1932_v6, %v1938_v42 }
 0x968   : > { %v1950_v16 = vsub.f32 %v1946_v15, %v1948_v14 }
 0x96a   : > { %v2728_v17 = vpop.eup %2727  ;;  %v1952_v18 = vadd.f32 1e-05, %v1950_v16 }
 0x96b   : > { %v1954_v19 = vmul.f32 %v2728_v17, %v1951_v12  ;;  %vm1960_vm11 = vweird.f32 %v2728_v17 }
 0x96c   : > { %2729 = vrsqrt.f32 %v1952_v18  ;;  %vm1961_vm13 = vmor %vm1959_vm12, %vm1960_vm11  ;;  %vm1969_vm15 = vweird.f32 %v1952_v18 }
 0x96d   : > { %v1955_v20 = vmul.f32 %v2728_v17, %v1954_v19 }
 0x96f   : > { %v1956_v21 = vmul.f32 0.5, %v1955_v20 }
 0x971   : > { %v1957_v57 = vsub.f32 1.5, %v1956_v21 }
 0x972   : > { %v2730_v22 = vpop.eup %2729 }
 0x973   : > { %v1958_v23 = vmul.f32 %v2728_v17, %v1957_v57  ;;  %v1964_v24 = vmul.f32 %v2730_v22, %v1952_v18  ;;  %vm1970_vm14 = vweird.f32 %v2730_v22 }
 0x974   : > { %vm1971_vm0 = vmor %vm1969_vm15, %vm1970_vm14 }
 0x975   : > { %v1962_v26 = vsel %vm1961_vm13, %v2728_v17, %v1958_v23  ;;  %v1965_v51 = vmul.f32 %v2730_v22, %v1964_v24 }
 0x976   : > { %v1975_v28 = vmul.f32 %v1973_v58, %v1962_v26 }
 0x977   : > { %v1966_v29 = vmul.f32 0.5, %v1965_v51 }
 0x978   : > { %v1980_v59 = vmul.f32 %v2687_v25, %v1975_v28 }
 0x979   : > { %v1967_v30 = vsub.f32 1.5, %v1966_v29 }
 0x97a   : > { %v1985_v31 = vadd.f32 %v2688_v27, %v1980_v59 }
 0x97b   : > { %v1968_v32 = vmul.f32 %v2730_v22, %v1967_v30 }
 0x97c   : > { %1987 = vst [vmem:[#allocation2] sm:$0xff] %v1985_v31 }
 0x97d   : > { %v1972_v34 = vsel %vm1971_vm0, %v2730_v22, %v1968_v32 }
 0x97e   : > { %v1976_v35 = vmul.f32 %v1974_v33, %v1972_v34 }
 0x980   : > { %v1981_v36 = vmul.f32 %v2687_v25, %v1976_v35  ;;  %1992 = sbr.rel (%p2514_p1) target bundleno = 2439 (0x987), region = 92 }
 0x982   : > { %v1986_v37 = vadd.f32 %v2688_v27, %v1981_v36 }
 0x984   : > { %1988 = vst [vmem:[#allocation2 + $0x8] sm:$0xff] %v1986_v37 }
 0x985   : > { %1993 = vst [vmem:[%s3487_s6] sm:$0xff] %v1985_v31 }
 0x986   : > { %1994 = vst [vmem:[%s3487_s6 + $0x8] sm:$0xff] %v1986_v37 }
 0x987 PF: > { %s29_s30 = sadd.s32 1, %s2875_s30   ;;  %s3488_s10 = sld [smem:[#allocation10_spill]] }
 0x988   : > { %p26_p2 = scmp.ge.s32.totalorder %s29_s30, 4   ;;  %s3489_s27 = sld [smem:[#allocation13_spill]] }
 0x989   : > { %s3490_s28 = sld [smem:[#allocation11_spill]]  ;;  %s3492_s25 = smov %s2859_s26 }
 0x98a   : > { %s3491_s29 = sld [smem:[#allocation12_spill]]  ;;  %28 = sbr.rel (!%p26_p2) target bundleno = 19 (0x13), region = 174 }
 0x98d   : > { %s3493_s26 = smov %s3488_s10 }
 0x98f   :  { %2017 = vsyncpa [#allocation4], 1 }
 0x990   :  { %2019 = vsyncpa [#allocation4 + $0x1], 1 }
 0x991   :  { %2020 = vsyncpa [#allocation6], 1 }
 0x992   :  { %2022 = vsyncpa [#allocation6 + $0x1], 1 }

// kernel: transformer_simplifier_forward.3
= control target key start
LH: loop header
LB: loop body
LE: loop exit
PB: predicated region body
PF: predicated region fallthrough
CT: control target
= control target key end

     0   :  { %s5936_s0 = inlined_call_operand.vmem [shape: f32[16,128], index: 0, kind: input, shape index: {}]   ;;  %s5937_s1 = inlined_call_operand.vmem [shape: f32[16,128], index: 1, kind: input, shape index: {}]   ;;  %s5938_s2 = inlined_call_operand.hbm [shape: bf16[2,128,384], index: 2, kind: input, shape index: {}]   ;;  %s5939_s3 = inlined_call_operand.vmem [shape: f32[2,1,384], index: 3, kind: input, shape index: {}]   ;;  %s5940_s4 = inlined_call_operand.hbm [shape: bf16[2,128,128], index: 4, kind: input, shape index: {}]   ;;  %s5941_s5 = inlined_call_operand.vmem [shape: f32[2,1,128], index: 5, kind: input, shape index: {}]   ;;  %s5942_s6 = inlined_call_operand.vmem [shape: f32[2,1,128], index: 6, kind: input, shape index: {}]   ;;  %s5943_s7 = inlined_call_operand.vmem [shape: f32[2,1,128], index: 7, kind: input, shape index: {}]   ;;  %s5944_s8 = inlined_call_operand.hbm [shape: bf16[2,128,128], index: 8, kind: input, shape index: {}]   ;;  %s5945_s9 = inlined_call_operand.vmem [shape: f32[2,1,128], index: 9, kind: input, shape index: {}]   ;;  %s5946_s10 = inlined_call_operand.hbm [shape: bf16[2,128,256], index: 10, kind: input, shape index: {}]   ;;  %s5947_s11 = inlined_call_operand.vmem [shape: f32[2,1,256], index: 11, kind: input, shape index: {}]   ;;  %s5948_s12 = inlined_call_operand.hbm [shape: bf16[2,128,128], index: 12, kind: input, shape index: {}]   ;;  %s5949_s13 = inlined_call_operand.vmem [shape: f32[2,1,128], index: 13, kind: input, shape index: {}]   ;;  %s5950_s14 = inlined_call_operand.vmem [shape: f32[2,1,128], index: 14, kind: input, shape index: {}]   ;;  %s5951_s15 = inlined_call_operand.vmem [shape: f32[2,1,128], index: 15, kind: input, shape index: {}]   ;;  %s5952_s16 = inlined_call_operand.hbm [shape: bf16[2,128,256], index: 16, kind: input, shape index: {}]   ;;  %s5953_s17 = inlined_call_operand.vmem [shape: f32[2,1,256], index: 17, kind: input, shape index: {}]   ;;  %s5954_s18 = inlined_call_operand.hbm [shape: bf16[2,256,128], index: 18, kind: input, shape index: {}]   ;;  %s5955_s19 = inlined_call_operand.vmem [shape: f32[2,1,128], index: 19, kind: input, shape index: {}]   ;;  %s5956_s20 = inlined_call_operand.vmem [shape: f32[2,1,128], index: 20, kind: input, shape index: {}]   ;;  %s5957_s21 = inlined_call_operand.vmem [shape: f32[2,1,128], index: 21, kind: input, shape index: {}]   ;;  %s5958_s22 = inlined_call_operand.vmem [shape: bf16[128,128], index: 22, kind: input, shape index: {}]   ;;  %s5959_s23 = inlined_call_operand.vmem [shape: f32[1,128], index: 23, kind: input, shape index: {}]   ;;  %s5960_s24 = inlined_call_operand.hbm [shape: f32[16,128], index: 24, kind: output, shape index: {}]  }
   0x1   :  { %5978 = sst [smem:[#allocation30_spill]] %s5936_s0 }
   0x2   :  { %5979 = sst [smem:[#allocation31_spill]] %s5937_s1 }
   0x3   :  { %5980 = sst [smem:[#allocation32_spill]] %s5938_s2 }
   0x4   :  { %5981 = sst [smem:[#allocation33_spill]] %s5939_s3 }
   0x5   :  { %5982 = sst [smem:[#allocation34_spill]] %s5940_s4 }
   0x6   :  { %5983 = sst [smem:[#allocation35_spill]] %s5941_s5 }
   0x7   :  { %5984 = sst [smem:[#allocation36_spill]] %s5942_s6 }
   0x8   :  { %5985 = sst [smem:[#allocation37_spill]] %s5943_s7 }
   0x9   :  { %5986 = sst [smem:[#allocation38_spill]] %s5944_s8 }
   0xa   :  { %5987 = sst [smem:[#allocation39_spill]] %s5945_s9 }
   0xb   :  { %5988 = sst [smem:[#allocation40_spill]] %s5946_s10 }
   0xc   :  { %5989 = sst [smem:[#allocation41_spill]] %s5947_s11 }
   0xd   :  { %5990 = sst [smem:[#allocation42_spill]] %s5948_s12 }
   0xe   :  { %5991 = sst [smem:[#allocation43_spill]] %s5949_s13 }
   0xf   :  { %5992 = sst [smem:[#allocation44_spill]] %s5950_s14 }
  0x10   :  { %5993 = sst [smem:[#allocation45_spill]] %s5951_s15 }
  0x11   :  { %5994 = sst [smem:[#allocation46_spill]] %s5952_s16 }
  0x12   :  { %5995 = sst [smem:[#allocation47_spill]] %s5953_s17 }
  0x13   :  { %5996 = sst [smem:[#allocation48_spill]] %s5954_s18 }
  0x14   :  { %5997 = sst [smem:[#allocation49_spill]] %s5955_s19 }
  0x15   :  { %5998 = sst [smem:[#allocation50_spill]] %s5956_s20 }
  0x16   :  { %5999 = sst [smem:[#allocation51_spill]] %s5957_s21 }
  0x17   :  { %6000 = sst [smem:[#allocation52_spill]] %s5958_s22 }
  0x18   :  { %6001 = sst [smem:[#allocation53_spill]] %s5959_s23 }
  0x19   :  { %6002 = sst [smem:[#allocation54_spill]] %s5960_s24 }
  0x1a   :  { %29 = vsyncpa [#allocation4], 0 }
  0x1b   :  { %31 = vsyncpa [#allocation4 + $0x1], 0 }
  0x1c   :  { %32 = vsyncpa [#allocation7], 0 }
  0x1d   :  { %34 = vsyncpa [#allocation7 + $0x1], 0 }
  0x1e   :  { %35 = vsyncpa [#allocation10], 0 }
  0x1f   :  { %37 = vsyncpa [#allocation10 + $0x1], 0 }
  0x20   :  { %38 = vsyncpa [#allocation13], 0 }
  0x21   :  { %40 = vsyncpa [#allocation13 + $0x1], 0 }
  0x22   :  { %41 = vsyncpa [#allocation5], 0  ;;  %s5166_s5 = smov 0   ;;  %s5168_s26 = smov 0  }
  0x23   :  { %s5170_s27 = smov 0   ;;  %s5172_s28 = smov 0  }
  0x24   :  { %s5174_s6 = smov 0   ;;  %s5176_s2 = smov 0  }
  0x25 LB: > { %6003 = sst [smem:[#allocation21_spill]] %s5010_s26  ;;  %s5195_s29 = sadd.s32 4294967295, %s5026_s2   ;;  %s5026_s2 = sphi %s5176_s2, %s47_s2   ;;  %s5022_s6 = sphi %s5174_s6, %s6068_s6   ;;  %s5018_s28 = sphi %s5172_s28, %s6067_s28   ;;  %s5014_s27 = sphi %s5170_s27, %s6066_s27   ;;  %s5010_s26 = sphi %s5168_s26, %s6065_s26   ;;  %s5006_s5 = sphi %s5166_s5, %s6064_s5  }
  0x26   : > { %6004 = sst [smem:[#allocation22_spill]] %s5014_s27  ;;  %s56_s0 = sadd.s32 1, %s5022_s6 }
  0x27   : > { %6005 = sst [smem:[#allocation23_spill]] %s5022_s6  ;;  %p57_p0 = scmp.ge.s32.totalorder %s56_s0, 2 }
  0x28   : > { %6006 = sst [smem:[#allocation24_spill]] %s5026_s2  ;;  %s118_s7 = sadd.s32 1, %s5014_s27 }
  0x29   : > { %6007 = sst [smem:[#allocation25_spill]] %s5195_s29  ;;  %p125_p1 = scmp.ne.s32.totalorder %s5014_s27, %s5010_s26 }
  0x2a   : > { %p126_p2 = scmp.eq.s32.totalorder %s5026_s2, 0  ;;  %s6070_s0 = smov (%p57_p0, %s56_s0), 0 }
  0x2b   : > { %6008 = sst [smem:[#allocation26_spill]] %s6070_s0  ;;  %p131_p4 = scmp.ne.s32.totalorder %s5010_s26, %s5006_s5 }
  0x2c   : > { %p127_p3 = por %p126_p2, %p125_p1  ;;  %s115_s30 = ssub.s32 %s5022_s6, %s6070_s0 }
  0x2d   : > { %p132_p5 = scmp.eq.s32.totalorder %s5195_s29, 0  ;;  %p116_p6 = scmp.eq.s32.totalorder %s115_s30, 0 }
  0x2e   : > { %p4519_p8 = scmp.lt.s32.totalorder %s5026_s2, 2  ;;  %s5217_s8 = sand.u32 1, %s5014_s27  }
  0x2f   : > { %p5208_p7 = por %p132_p5, %p131_p4  ;;  %s5224_s1 = sand.u32 1, %s5026_s2  }
  0x30   : > { %s5214_s25 = scalar_select %p116_p6, %s5014_s27, %s118_s7  }
  0x31   : > { %p5219_p9 = pnand %p4519_p8, %p127_p3  ;;  %s5227_s5 = sshll.u32 %s5217_s8, 6 }
  0x32   : > { %6010 = sst [smem:[#allocation27_spill]] %s5214_s25  ;;  %s5230_s7 = sshll.u32 %s5022_s6, 6 }
  0x33   : > { %s6012_s25 = sld [smem:[#allocation34_spill]]  ;;  %s774_s24 = scalar_lea.vmem [#allocation6], %s5227_s5 }
  0x34   : > { %s782_s23 = sshll.u32 %s774_s24, 4  ;;  %p3886_p10 = scmp.ge.s32.totalorder %s5026_s2, 1  ;;  %s783_s23 = int_to_ptr.vmem [resolvable:$true] %s782_s23 }
  0x35   : > { %s5966_s21 = scalar_lea.sflag [#allocation7], %s5224_s1  ;;  %s5967_s20 = smov 64  }
  0x36   : > { %s5969_s19 = smov 4   ;;  %p974_p11 = scmp.lt.s32.totalorder %s5026_s2, 3 }
  0x37   : > { %s5248_s0 = sshll.u32 %s5217_s8, 7  ;;  %s5251_s24 = sshll.u32 %s5022_s6, 7 }
  0x38   : > { %p5253_p12 = pnand %p3886_p10, %p974_p11  ;;  %s6014_s10 = sld [smem:[#allocation40_spill]] }
  0x39   : > { %s779_s27 = scalar_lea.hbm %s6012_s25, %s5230_s7  ;;  %s842_s15 = scalar_lea.vmem [#allocation9], %s5248_s0 }
  0x3a   : > { %s780_s22 = sshll.u32 %s779_s27, 4  ;;  %s6015_s16 = sld [smem:[#allocation46_spill]]  ;;  %s781_s22 = int_to_ptr.hbm [resolvable:$true] %s780_s22 }
  0x3b   : > { %4503 = dma.hbm_to_vmem [thread:$0]  (!%p5219_p9), %s781_s22, 1024, %s783_s23, %s5966_s21, %s5967_s20, %s5967_s20, %s5969_s19  }
  0x3c   : > { %s850_s22 = sshll.u32 %s842_s15, 4  ;;  %s5972_s21 = scalar_lea.sflag [#allocation10], %s5224_s1  ;;  %s851_s22 = int_to_ptr.vmem [resolvable:$true] %s850_s22 }
  0x3d   : > { %s5030_s20 = smov 128   ;;  %s5031_s19 = smov 8  }
  0x3e   : > { %s847_s17 = scalar_lea.hbm %s6014_s10, %s5251_s24  ;;  %s911_s10 = scalar_lea.vmem [#allocation12], %s5248_s0 }
  0x3f   : > { %s848_s23 = sshll.u32 %s847_s17, 4  ;;  %s919_s11 = sshll.u32 %s911_s10, 4  ;;  %s849_s23 = int_to_ptr.hbm [resolvable:$true] %s848_s23  ;;  %s920_s11 = int_to_ptr.vmem [resolvable:$true] %s919_s11 }
  0x40   : > { %4509 = dma.hbm_to_vmem [thread:$0]  (!%p5219_p9), %s849_s23, 2048, %s851_s22, %s5972_s21, %s5030_s20, %s5030_s20, %s5031_s19  }
  0x41   : > { %s916_s25 = scalar_lea.hbm %s6015_s16, %s5251_s24  ;;  %s908_s15 = scalar_lea.sflag [#allocation13], %s5224_s1 }
  0x42   : > { %s917_s30 = sshll.u32 %s916_s25, 4  ;;  %s4475_s17 = smul.u32 192, %s5217_s8  ;;  %s918_s30 = int_to_ptr.hbm [resolvable:$true] %s917_s30 }
  0x43   : > { %4515 = dma.hbm_to_vmem [thread:$0]  (!%p5219_p9), %s918_s30, 2048, %s920_s11, %s908_s15, %s5030_s20, %s5030_s20, %s5031_s19  }
  0x44   : > { %s4476_s13 = smul.u32 192, %s5022_s6  ;;  %s6016_s21 = sld [smem:[#allocation32_spill]] }
  0x45   : > { %s745_s2 = scalar_lea.vmem [#allocation3], %s4475_s17  ;;  %s742_s16 = scalar_lea.sflag [#allocation4], %s5217_s8 }
  0x46   : > { %s753_s10 = sshll.u32 %s745_s2, 4  ;;  %s5032_s9 = smov 192   ;;  %s754_s10 = int_to_ptr.vmem [resolvable:$true] %s753_s10 }
  0x47   : > { %s5033_s11 = smov 12   ;;  %s814_s30 = scalar_lea.vmem [#allocation8], %s5227_s5 }
  0x48   : > { %s822_s17 = sshll.u32 %s814_s30, 4  ;;  %s6018_s8 = smov 4   ;;  %s823_s17 = int_to_ptr.vmem [resolvable:$true] %s822_s17 }
  0x49   : > { %s6019_s23 = smov 64   ;;  %s6021_s12 = sld [smem:[#allocation42_spill]] }
  0x4a   : > { %s750_s14 = scalar_lea.hbm %s6016_s21, %s4476_s13  ;;  %s6017_s13 = sld [smem:[#allocation38_spill]] }
  0x4b   : > { %s751_s25 = sshll.u32 %s750_s14, 4  ;;  %s6020_s14 = scalar_lea.sflag [#allocation7], %s5224_s1  ;;  %s752_s25 = int_to_ptr.hbm [resolvable:$true] %s751_s25 }
  0x4c   : > { %4500 = dma.hbm_to_vmem [thread:$0]  (!%p5219_p9), %s752_s25, 3072, %s754_s10, %s742_s16, %s5032_s9, %s5032_s9, %s5033_s11  }
  0x4d   : > { %s871_s10 = scalar_lea.vmem [#allocation11], %s5227_s5  ;;  %s6022_s19 = scalar_lea.sflag [#allocation10], %s5224_s1 }
  0x4e   : > { %s879_s25 = sshll.u32 %s871_s10, 4  ;;  %s6023_s18 = sld [smem:[#allocation48_spill]]  ;;  %s880_s25 = int_to_ptr.vmem [resolvable:$true] %s879_s25 }
  0x4f   : > { %s876_s16 = scalar_lea.hbm %s6021_s12, %s5230_s7  ;;  %s940_s30 = scalar_lea.vmem [#allocation14], %s5248_s0 }
  0x50   : > { %s819_s21 = scalar_lea.hbm %s6017_s13, %s5230_s7  ;;  %s877_s11 = sshll.u32 %s876_s16, 4  ;;  %s878_s11 = int_to_ptr.hbm [resolvable:$true] %s877_s11 }
  0x51   : > { %s820_s22 = sshll.u32 %s819_s21, 4  ;;  %s821_s22 = int_to_ptr.hbm [resolvable:$true] %s820_s22 }
  0x52   : > { %4506 = dma.hbm_to_vmem [thread:$0]  (!%p5219_p9), %s821_s22, 1024, %s823_s17, %s6020_s14, %s6019_s23, %s6019_s23, %s6018_s8  }
  0x53   : > { %4512 = dma.hbm_to_vmem [thread:$0]  (!%p5219_p9), %s878_s11, 1024, %s880_s25, %s6022_s19, %s6019_s23, %s6019_s23, %s6018_s8  }
  0x54   : > { %s945_s21 = scalar_lea.hbm %s6023_s18, %s5251_s24  ;;  %s948_s17 = sshll.u32 %s940_s30, 4  ;;  %s949_s17 = int_to_ptr.vmem [resolvable:$true] %s948_s17 }
  0x55   : > { %s946_s22 = sshll.u32 %s945_s21, 4  ;;  %978 = sbr.rel (%p5253_p12) target bundleno = 3859 (0xf13), region = 116  ;;  %s947_s22 = int_to_ptr.hbm [resolvable:$true] %s946_s22 }
  0x56   : > { %4518 = dma.hbm_to_vmem [thread:$0]  (!%p5219_p9), %s947_s22, 2048, %s949_s17, %s908_s15, %s6019_s23, %s6019_s23, %s6018_s8  }
  0x5a   : > { %s980_s5 = sand.u32 1, %s5010_s26  }
  0x5b   : > { %s4477_s7 = smul.u32 192, %s980_s5  ;;  %s981_s14 = scalar_lea.sflag [#allocation4], %s980_s5 }
  0x5d   : > { %s5324_s24 = scalar_lea.vmem [#allocation3], %s4477_s7 }
  0x5e   : > { %4985 = dma.done.wait (%p5208_p7), %s981_s14, 3072  }
  0x5f   : > { %4987 = vsyncadd (%p5208_p7), %s981_s14, 4294964224  ;;  %s990_s4 = sand.u32 1, %s5195_s29   ;;  %s3887_s1 = sshll.u32 %s980_s5, 6 }
  0x60   : > { %s991_s0 = scalar_lea.sflag [#allocation7], %s990_s4  ;;  %s5331_s15 = scalar_lea.vmem [#allocation6], %s3887_s1 }
  0x61   : > { %4989 = dma.done.wait (%p5208_p7), %s991_s0, 2048  }
  0x62   : > { %4991 = vsyncadd (%p5208_p7), %s991_s0, 4294965248  ;;  %s3889_s27 = sshll.u32 %s980_s5, 7  ;;  %s5337_s8 = scalar_lea.vmem [#allocation8], %s3887_s1 }
  0x63   : > { %s1011_s23 = scalar_lea.sflag [#allocation10], %s990_s4  ;;  %s5339_s2 = scalar_lea.vmem [#allocation9], %s3889_s27 }
  0x64   : > { %4993 = dma.done.wait (%p5208_p7), %s1011_s23, 3072  }
  0x65   : > { %4995 = vsyncadd (%p5208_p7), %s1011_s23, 4294964224  ;;  %s5345_s9 = scalar_lea.vmem [#allocation11], %s3887_s1  ;;  %s1031_s16 = scalar_lea.sflag [#allocation13], %s990_s4 }
  0x66   : > { %6024 = sst [smem:[#allocation28_spill]] %s5345_s9  ;;  %s5347_s10 = scalar_lea.vmem [#allocation12], %s3889_s27 }
  0x67   : > { %6025 = sst [smem:[#allocation29_spill]] %s5347_s10 }
  0x68   : > { %4997 = dma.done.wait (%p5208_p7), %s1031_s16, 4096  }
  0x69   : > { %4999 = vsyncadd (%p5208_p7), %s1031_s16, 4294963200  ;;  %p1199_p13 = scmp.lt.s32.totalorder %s5018_s28, 1  ;;  %s6029_s23 = sld [smem:[#allocation33_spill]] }
  0x6a   : > { %s6032_s17 = sld [smem:[#allocation41_spill]]  ;;  %s5414_s1 = scalar_lea.vmem [#allocation14], %s3889_s27 }
  0x6b   : > { %s5355_s25 = scalar_select %p1199_p13, %s5018_s28, 1 }
  0x6c   : > { %s6035_s6 = sld [smem:[#allocation47_spill]]  ;;  %p3895_p0 = scmp.ne.s32.totalorder %s5018_s28, 0 }
  0x6d   : > { %s4478_s11 = smul.u32 3, %s5355_s25  ;;  %s3893_s29 = sshll.u32 %s5355_s25, 1 }
  0x6e   : > { %s6036_s20 = sld [smem:[#allocation49_spill]] }
  0x6f   : > { %s5373_s16 = scalar_lea.vmem %s6029_s23, %s4478_s11  ;;  %s6034_s23 = sld [smem:[#allocation45_spill]] }
  0x70   : > { %s5387_s22 = scalar_lea.vmem %s6032_s17, %s3893_s29  ;;  %s6037_s17 = sld [smem:[#allocation50_spill]] }
  0x71   : > { %s6038_s7 = sld [smem:[#allocation51_spill]] }
  0x72   : > { %s5400_s26 = scalar_lea.vmem %s6035_s6, %s3893_s29  ;;  %s6039_s0 = sld [smem:[#allocation30_spill]] (!%p3895_p0) }
  0x73   : > { %1245 = sbr.rel (%p3895_p0) target bundleno = 123 (0x7b), region = 148 }
  0x74   : > { %s1234_s13 = scalar_lea.vmem %s6036_s20, %s5355_s25 }
  0x75   : > { %s1227_s4 = scalar_lea.vmem %s6034_s23, %s5355_s25 }
  0x76   : > { %s1237_s10 = scalar_lea.vmem %s6037_s17, %s5355_s25 }
  0x77   : > { %s1240_s14 = scalar_lea.vmem %s6038_s7, %s5355_s25 }
  0x78   : > { %v1246_v0 = vld [vmem:[%s6039_s0] sm:$0xff]  ;;  %v1247_v1 = vld [vmem:[%s6039_s0 + $0x8] sm:$0xff] }
  0x79   : > { %1248 = vst [vmem:[#allocation2] sm:$0xff] %v1246_v0 }
  0x7a   : > { %1249 = vst [vmem:[#allocation2 + $0x8] sm:$0xff] %v1247_v1 }
  0x7b PF: > { %v3982_v2 = vld [vmem:[%s5324_s24 + $0xa8] sm:$0xf]  ;;  %v4393_v3 = vld [vmem:[%s5324_s24 + $0xb0] sm:$0xf0]  ;;  %v4392_v4 = vld [vmem:[%s5324_s24 + $0xac] sm:$0xf] }
  0x7c   : > { %v3983_v5 = vor.u32 %v4393_v3, %v3982_v2  ;;  %v3984_v6 = vld [vmem:[%s5324_s24 + $0xb4] sm:$0xf0]  ;;  %v3970_v7 = vld [vmem:[%s5324_s24 + $0x90] sm:$0xf]  ;;  %v4390_v8 = vld [vmem:[%s5324_s24 + $0x98] sm:$0xf0] }
  0x7d   : > { %v3987_v9 = vor.u32 %v4392_v4, %v3984_v6  ;;  %v4389_v10 = vld [vmem:[%s5324_s24 + $0x94] sm:$0xf]  ;;  %v3972_v11 = vld [vmem:[%s5324_s24 + $0x9c] sm:$0xf0]  ;;  %v3971_v12 = vor.u32 %v4390_v8, %v3970_v7  ;;  %v3958_v14 = vld [vmem:[%s5324_s24 + $0x78] sm:$0xf] }
  0x7e   : > { %1423 = vmatpush.bf16.msra.mxu0 %v3983_v5  ;;  %v3975_v13 = vor.u32 %v4389_v10, %v3972_v11  ;;  %v4387_v15 = vld [vmem:[%s5324_s24 + $0x80] sm:$0xf0]  ;;  %v4386_v16 = vld [vmem:[%s5324_s24 + $0x7c] sm:$0xf]  ;;  %v3960_v17 = vld [vmem:[%s5324_s24 + $0x84] sm:$0xf0] }
  0x7f   : > { %1437 = vmatpush.bf16.msra.mxu1 %v3987_v9  ;;  %v3959_v18 = vor.u32 %v4387_v15, %v3958_v14  ;;  %v3963_v19 = vor.u32 %v4386_v16, %v3960_v17  ;;  %v3946_v20 = vld [vmem:[%s5324_s24 + $0x60] sm:$0xf]  ;;  %v4384_v21 = vld [vmem:[%s5324_s24 + $0x68] sm:$0xf0]  ;;  %v4383_v22 = vld [vmem:[%s5324_s24 + $0x64] sm:$0xf] }
  0x80   : > { %v3948_v23 = vld [vmem:[%s5324_s24 + $0x6c] sm:$0xf0]  ;;  %v3934_v24 = vld [vmem:[%s5324_s24 + $0x48] sm:$0xf]  ;;  %v3947_v25 = vor.u32 %v4384_v21, %v3946_v20  ;;  %v4381_v26 = vld [vmem:[%s5324_s24 + $0x50] sm:$0xf0] }
  0x81   : > { %v4380_v27 = vld [vmem:[%s5324_s24 + $0x4c] sm:$0xf]  ;;  %v3951_v28 = vor.u32 %v4383_v22, %v3948_v23  ;;  %v3936_v29 = vld [vmem:[%s5324_s24 + $0x54] sm:$0xf0]  ;;  %v3935_v30 = vor.u32 %v4381_v26, %v3934_v24  ;;  %v3922_v32 = vld [vmem:[%s5324_s24 + $0x30] sm:$0xf] }
  0x82   : > { %1424 = vmatpush.bf16.msra.mxu0 %v3971_v12  ;;  %v3939_v31 = vor.u32 %v4380_v27, %v3936_v29  ;;  %v4378_v33 = vld [vmem:[%s5324_s24 + $0x38] sm:$0xf0]  ;;  %v4377_v34 = vld [vmem:[%s5324_s24 + $0x34] sm:$0xf]  ;;  %v3924_v35 = vld [vmem:[%s5324_s24 + $0x3c] sm:$0xf0] }
  0x83   : > { %1438 = vmatpush.bf16.msra.mxu1 %v3975_v13  ;;  %v3923_v36 = vor.u32 %v4378_v33, %v3922_v32  ;;  %v3927_v37 = vor.u32 %v4377_v34, %v3924_v35  ;;  %v3910_v38 = vld [vmem:[%s5324_s24 + $0x18] sm:$0xf]  ;;  %v4375_v39 = vld [vmem:[%s5324_s24 + $0x20] sm:$0xf0]  ;;  %v4374_v40 = vld [vmem:[%s5324_s24 + $0x1c] sm:$0xf] }
  0x84   : > { %v3912_v41 = vld [vmem:[%s5324_s24 + $0x24] sm:$0xf0]  ;;  %v3911_v42 = vor.u32 %v4375_v39, %v3910_v38  ;;  %v3898_v44 = vld [vmem:[%s5324_s24] sm:$0xf]  ;;  %v4372_v45 = vld [vmem:[%s5324_s24 + $0x8] sm:$0xf0] }
  0x85   : > { %v3915_v43 = vor.u32 %v4374_v40, %v3912_v41  ;;  %v4371_v46 = vld [vmem:[%s5324_s24 + $0x4] sm:$0xf]  ;;  %v3900_v47 = vld [vmem:[%s5324_s24 + $0xc] sm:$0xf0]  ;;  %v3899_v48 = vor.u32 %v4372_v45, %v3898_v44  ;;  %v5457_v50 = vld [vmem:[#allocation2 + $0x8] sm:$0xff]  ;;  %vm1465_vm0 = vcmask 261120  }
  0x86   : > { %1425 = vmatpush.bf16.msra.mxu0 %v3959_v18  ;;  %v5455_v49 = vld [vmem:[#allocation2] sm:$0xff]  ;;  %v3903_v51 = vor.u32 %v4371_v46, %v3900_v47  ;;  %s5034_s27 = smov 96   ;;  %s5035_s9 = smov 64   ;;  %vm1518_vm1 = vcmask 64512   ;;  %v4394_v1 = vld [vmem:[%s5324_s24 + $0xb8] sm:$0xf0] }
  0x87   : > { %1439 = vmatpush.bf16.msra.mxu1 %v3963_v19  ;;  %v5461_v52 = vpack.c.bf16 %v5457_v50, %v5455_v49  ;;  %v5466_v53 = vld [vmem:[%s5373_s16] sm:$0x7]  ;;  %v3978_v2 = vld [vmem:[%s5324_s24 + $0x98] sm:$0xf]  ;;  %v4391_v4 = vld [vmem:[%s5324_s24 + $0xa0] sm:$0xf0] }
  0x88   : > { %v1290_v54 = vperm.slane %v5466_v53, 1  ;;  %v1289_v55 = vperm.slane %v5466_v53, 0  ;;  %v3990_v0 = vld [vmem:[%s5324_s24 + $0xb0] sm:$0xf]  ;;  %v3979_v7 = vor.u32 %v4391_v4, %v3978_v2  ;;  %v3966_v8 = vld [vmem:[%s5324_s24 + $0x80] sm:$0xf] }
  0x89   : > { %v3991_v3 = vor.u32 %v4394_v1, %v3990_v0  ;;  %v4388_v9 = vld [vmem:[%s5324_s24 + $0x88] sm:$0xf0]  ;;  %v3954_v11 = vld [vmem:[%s5324_s24 + $0x68] sm:$0xf]  ;;  %v4385_v12 = vld [vmem:[%s5324_s24 + $0x70] sm:$0xf0] }
  0x8a   : > { %1426 = vmatpush.bf16.msra.mxu0 %v3947_v25  ;;  %v3967_v10 = vor.u32 %v4388_v9, %v3966_v8  ;;  %v3955_v15 = vor.u32 %v4385_v12, %v3954_v11  ;;  %v3942_v16 = vld [vmem:[%s5324_s24 + $0x50] sm:$0xf]  ;;  %v4382_v17 = vld [vmem:[%s5324_s24 + $0x58] sm:$0xf0]  ;;  %v3930_v19 = vld [vmem:[%s5324_s24 + $0x38] sm:$0xf] }
  0x8b   : > { %1440 = vmatpush.bf16.msra.mxu1 %v3951_v28  ;;  %1451 = vmatpush.bf16.msra.mxu2 %v3991_v3  ;;  %v3943_v18 = vor.u32 %v4382_v17, %v3942_v16  ;;  %v4379_v20 = vld [vmem:[%s5324_s24 + $0x40] sm:$0xf0]  ;;  %v3918_v22 = vld [vmem:[%s5324_s24 + $0x20] sm:$0xf]  ;;  %v4376_v23 = vld [vmem:[%s5324_s24 + $0x28] sm:$0xf0] }
  0x8c   : > { %v3931_v21 = vor.u32 %v4379_v20, %v3930_v19  ;;  %v3919_v24 = vor.u32 %v4376_v23, %v3918_v22  ;;  %v3906_v25 = vld [vmem:[%s5324_s24 + $0x8] sm:$0xf]  ;;  %v4373_v26 = vld [vmem:[%s5324_s24 + $0x10] sm:$0xf0]  ;;  %v1291_v38 = vperm.slane %v5466_v53, 2  ;;  %s5036_s24 = smov 32  }
  0x8d   : > { %v3907_v27 = vor.u32 %v4373_v26, %v3906_v25  ;;  %vm2005_vm2 = vcmask 523264   ;;  %vm2008_vm3 = vcmask 785408   ;;  %s6040_s18 = sld [smem:[#allocation35_spill]]  ;;  %p4328_p1 = scmp.ne.s32.totalorder %s5018_s28, 1 }
  0x8e   : > { %1427 = vmatpush.bf16.msra.mxu0 %v3935_v30  ;;  %s6042_s20 = sld [smem:[#allocation31_spill]] }
  0x8f   : > { %1441 = vmatpush.bf16.msra.mxu1 %v3939_v31  ;;  %1452 = vmatpush.bf16.msra.mxu2 %v3979_v7  ;;  %s6043_s5 = sld [smem:[#allocation36_spill]] }
  0x90   : > { %s6045_s23 = sld [smem:[#allocation37_spill]] }
  0x91   : > { %s6047_s16 = sld [smem:[#allocation39_spill]] }
  0x92   : > { %1428 = vmatpush.bf16.msra.mxu0 %v3923_v36  ;;  %s6053_s30 = sld [smem:[#allocation44_spill]] }
  0x93   : > { %1442 = vmatpush.bf16.msra.mxu1 %v3927_v37  ;;  %1453 = vmatpush.bf16.msra.mxu2 %v3967_v10  ;;  %s6041_s6 = scalar_lea.vmem %s6040_s18, %s5355_s25 }
  0x95   : > { %s6044_s7 = scalar_lea.vmem %s6043_s5, %s5355_s25 }
  0x96   : > { %1429 = vmatpush.bf16.msra.mxu0 %v3911_v42  ;;  %s6046_s12 = scalar_lea.vmem %s6045_s23, %s5355_s25 }
  0x97   : > { %1443 = vmatpush.bf16.msra.mxu1 %v3915_v43  ;;  %1454 = vmatpush.bf16.msra.mxu2 %v3955_v15  ;;  %s6048_s18 = scalar_lea.vmem %s6047_s16, %s5355_s25 }
  0x9a   : > { %1430 = vmatpush.bf16.msra.mxu0 %v3899_v48 }
  0x9b   : > { %1444 = vmatpush.bf16.msra.mxu1 %v3903_v51  ;;  %1455 = vmatpush.bf16.msra.mxu2 %v3943_v18 }
  0x9d   : > { %1431 = vmatmul.bf16.vlgmr.msra.gmra.mxu0 %v5461_v52 }
  0x9e   : > { %1445 = vmatmul.bf16.vlgmr.msra.gmra.mxu1 %v5461_v52 }
  0x9f   : > { %1456 = vmatpush.bf16.msra.mxu2 %v3931_v21 }
  0xa3   : > { %1457 = vmatpush.bf16.msra.mxu2 %v3919_v24 }
  0xa7   : > { %1458 = vmatpush.bf16.msra.mxu2 %v3907_v27 }
  0xaa   : > { %1459 = vmatmul.bf16.vlgmr.msra.gmra.mxu2 %v5461_v52 }
 0x11a   : > { %v1432_v56 = vpop.f32.mrf.mxu0 }
 0x11b   : > { %v1446_v57 = vpop.f32.mrf.mxu1  ;;  %v5472_v59 = vadd.f32 %v1432_v56, %v1289_v55 }
 0x11c   : > { %v5470_v58 = vadd.f32 %v1446_v57, %v1290_v54 }
 0x11e   : > { %1589 = vrot.lane.b32.xlu2 %v5470_v58, %s5034_s27  ;;  %3992 = vmatpush.xpose.msk.msra.mxu3 %vm1465_vm0, %v5470_v58 }
 0x121   : > { %3993 = vmatmul.msk.f32.vlgmr.msra.gmra.mxu3 %vm1465_vm0, %v5472_v59 }
 0x122   : > { %v1434_v61 = vpop.f32.mrf.mxu0 }
 0x123   : > { %v1448_v60 = vpop.f32.mrf.mxu1  ;;  %v5486_v63 = vadd.f32 %v1434_v61, %v1289_v55 }
 0x124   : > { %v5480_v62 = vadd.f32 %v1448_v60, %v1290_v54 }
 0x126   : > { %3994 = vmatpush.xpose.msk.msrb.mxu3 %vm1465_vm0, %v5480_v62  ;;  %1587 = vrot.lane.b32.xlu2 %v5472_v59, %s5034_s27 }
 0x129   : > { %3995 = vmatmul.msk.f32.vlgmr.msrb.gmra.mxu3 %vm1465_vm0, %v5486_v63 }
 0x12d   : > { %v1460_v39 = vpop.f32.mrf.mxu2 }
 0x12e   : > { %1721 = vrot.lane.b32.xlu2 %v5470_v58, %s5035_s9  ;;  %v5520_v40 = vadd.f32 %v1460_v39, %v1291_v38 }
 0x130   : > { %1559 = vmatpush.msra.mxu3 %v5520_v40 }
 0x135   : > { %v1462_v41 = vpop.f32.mrf.mxu2 }
 0x136   : > { %1719 = vrot.lane.b32.xlu2 %v5472_v59, %s5035_s9  ;;  %v5525_v42 = vadd.f32 %v1462_v41, %v1291_v38 }
 0x138   : > { %1582 = vmatpush.msrb.mxu3 %v5525_v42 }
 0x178   : > { %v1590_v44 = vpop.permute.xlu2 %1589 }
 0x180   : > { %v1588_v51 = vpop.permute.xlu2 %1587 }
 0x188   : > { %v1722_v54 = vpop.permute.xlu2 %1721 }
 0x190   : > { %v1720_v56 = vpop.permute.xlu2 %1719 }
 0x1a4   : > { %v1489_v5 = vpop.f32.mrf.mxu3 }
 0x1a5   : > { %v1519_v6 = vsel %vm1518_vm1, %v1489_v5, -inf }
 0x1a6   : > { %1520 = vmax.xlane.f32.xlu0 %v1519_v6 }
 0x1ac   : > { %v1515_v13 = vpop.f32.mrf.mxu3 }
 0x1ad   : > { %v1522_v14 = vsel %vm1518_vm1, %v1515_v13, -inf }
 0x1ae   : > { %1523 = vmax.xlane.f32.xlu0 %v1522_v14 }
 0x1c2   : > { %1617 = vrot.lane.b32.xlu0 %v5480_v62, %s5034_s27 }
 0x219   : > { %v1521_v28 = vpop.xlane.xlu0 %1520 }
 0x21a   : > { %v1525_v29 = vsub.f32 %v1489_v5, %v1521_v28 }
 0x21c   : > { %v1527_v30 = vmul.f32 1.442695, %v1525_v29 }
 0x21e   : > { %4643 = vpow2.f32 %v1527_v30 }
 0x221   : > { %v1524_v31 = vpop.xlane.xlu0 %1523 }
 0x222   : > { %v1526_v32 = vsub.f32 %v1515_v13, %v1524_v31 }
 0x224   : > { %v4644_v33 = vpop.eup %4643  ;;  %v1529_v34 = vmul.f32 1.442695, %v1526_v32 }
 0x225   : > { %v1531_v35 = vsel %vm1518_vm1, %v4644_v33, 0.0 }
 0x226   : > { %4645 = vpow2.f32 %v1529_v34  ;;  %1532 = vadd.xlane.f32.xlu1 %v1531_v35 }
 0x22c   : > { %v4646_v36 = vpop.eup %4645 }
 0x22d   : > { %v1534_v37 = vsel %vm1518_vm1, %v4646_v36, 0.0 }
 0x22e   : > { %1535 = vadd.xlane.f32.xlu1 %v1534_v37 }
 0x234   : > { %v1618_v53 = vpop.permute.xlu0 %1617 }
 0x247   : > { %1615 = vrot.lane.b32.xlu1 %v5486_v63, %s5034_s27 }
 0x24f   : > { %1747 = vrot.lane.b32.xlu1 %v5486_v63, %s5035_s9 }
 0x299   : > { %v1533_v43 = vpop.xlane.xlu1 %1532 }
 0x29a   : > { %4647 = vrcp.f32 %v1533_v43 }
 0x2a0   : > { %v4648_v45 = vpop.eup %4647 }
 0x2a1   : > { %v1539_v46 = vmul.f32 %v4648_v45, %v4644_v33  ;;  %v1536_v47 = vpop.xlane.xlu1 %1535 }
 0x2a2   : > { %4649 = vrcp.f32 %v1536_v47 }
 0x2a3   : > { %3996 = vmatmul.msk.f32.vlgmr.msra.gmra.mxu3 %vm1518_vm1, %v1539_v46 }
 0x2a4   : > { %3998 = vmatpush.xpose.msk.msra.mxu3 %vm1465_vm0, %v1590_v44 }
 0x2a8   : > { %v4650_v48 = vpop.eup %4649 }
 0x2a9   : > { %v1540_v52 = vmul.f32 %v4650_v48, %v4646_v36 }
 0x2ab   : > { %3997 = vmatmul.msk.f32.vlgmr.msrb.gmra.mxu3 %vm1518_vm1, %v1540_v52 }
 0x2ac   : > { %4000 = vmatpush.xpose.msk.msrb.mxu3 %vm1465_vm0, %v1618_v53 }
 0x2b3   : > { %3999 = vmatmul.msk.f32.vlgmr.msra.gmra.mxu3 %vm1465_vm0, %v1588_v51 }
 0x2b4   : > { %4004 = vmatpush.xpose.msk.msra.mxu3 %vm1465_vm0, %v1722_v54 }
 0x2b9   : > { %v1616_v55 = vpop.permute.xlu1 %1615 }
 0x2bb   : > { %4001 = vmatmul.msk.f32.vlgmr.msrb.gmra.mxu3 %vm1465_vm0, %v1616_v55 }
 0x2c1   : > { %v1748_v9 = vpop.permute.xlu1 %1747 }
 0x2c3   : > { %4005 = vmatmul.msk.f32.vlgmr.msra.gmra.mxu3 %vm1465_vm0, %v1720_v56  ;;  %v4583_v56 = vpack.i.bf16 %v5525_v42, %v5520_v40 }
 0x326   : > { %v5536_v57 = vpop.f32.mrf.mxu3 }
 0x32e   : > { %v5538_v60 = vpop.f32.mrf.mxu3 }
 0x336   : > { %v1612_v61 = vpop.f32.mrf.mxu3 }
 0x337   : > { %v1643_v0 = vsel %vm1518_vm1, %v1612_v61, -inf }
 0x338   : > { %1644 = vmax.xlane.f32.xlu2 %v1643_v0 }
 0x33e   : > { %v1640_v1 = vpop.f32.mrf.mxu3 }
 0x33f   : > { %v1646_v4 = vsel %vm1518_vm1, %v1640_v1, -inf }
 0x346   : > { %v1744_v2 = vpop.f32.mrf.mxu3 }
 0x347   : > { %v1775_v3 = vsel %vm1518_vm1, %v1744_v2, -inf }
 0x348   : > { %1776 = vmax.xlane.f32.xlu0 %v1775_v3 }
 0x350   : > { %1749 = vrot.lane.b32.xlu2 %v5480_v62, %s5035_s9 }
 0x358   : > { %1879 = vrot.lane.b32.xlu2 %v5480_v62, %s5036_s24 }
 0x35c   : > { %1666 = vrot.lane.b32.xlu0 %v5520_v40, %s5034_s27 }
 0x364   : > { %1797 = vrot.lane.b32.xlu0 %v5520_v40, %s5035_s9 }
 0x36c   : > { %1877 = vrot.lane.b32.xlu0 %v5486_v63, %s5036_s24 }
 0x396   : > { %1647 = vmax.xlane.f32.xlu0 %v1646_v4 }
 0x3ab   : > { %v1645_v5 = vpop.xlane.xlu2 %1644 }
 0x3ac   : > { %v1649_v6 = vsub.f32 %v1612_v61, %v1645_v5 }
 0x3ae   : > { %v1651_v7 = vmul.f32 1.442695, %v1649_v6 }
 0x3b0   : > { %4651 = vpow2.f32 %v1651_v7 }
 0x3b3   : > { %v1750_v8 = vpop.permute.xlu2 %1749 }
 0x3b4   : > { %4006 = vmatpush.xpose.msk.msrb.mxu3 %vm1465_vm0, %v1750_v8 }
 0x3b6   : > { %v4652_v62 = vpop.eup %4651 }
 0x3b7   : > { %4007 = vmatmul.msk.f32.vlgmr.msrb.gmra.mxu3 %vm1465_vm0, %v1748_v9  ;;  %v1655_v10 = vsel %vm1518_vm1, %v4652_v62, 0.0 }
 0x3b8   : > { %1656 = vadd.xlane.f32.xlu1 %v1655_v10 }
 0x3bb   : > { %v1880_v11 = vpop.permute.xlu2 %1879  ;;  %v1777_v12 = vpop.xlane.xlu0 %1776 }
 0x3bc   : > { %v1781_v63 = vsub.f32 %v1744_v2, %v1777_v12  ;;  %4012 = vmatpush.xpose.msk.msra.mxu3 %vm1465_vm0, %v1880_v11 }
 0x3be   : > { %v1783_v13 = vmul.f32 1.442695, %v1781_v63 }
 0x3c0   : > { %4653 = vpow2.f32 %v1783_v13 }
 0x3c6   : > { %v4654_v14 = vpop.eup %4653 }
 0x3c7   : > { %v1787_v15 = vsel %vm1518_vm1, %v4654_v14, 0.0 }
 0x3c8   : > { %1788 = vadd.xlane.f32.xlu2 %v1787_v15  ;;  %v4402_v15 = vld [vmem:[%s5331_s15 + $0x38] sm:$0xff] }
 0x3c9   : > { %2080 = vmatpush.bf16.msrb.mxu2 %v4402_v15  ;;  %v5037_v15 = vmov 128.0  }
 0x3ce   : > { %v1667_v16 = vpop.permute.xlu0 %1666 }
 0x3cf   : > { %1687 = vmatpush.msrb.mxu0 %v1667_v16  ;;  %v4401_v16 = vld [vmem:[%s5331_s15 + $0x30] sm:$0xff] }
 0x3d0   : > { %2081 = vmatpush.bf16.msrb.mxu2 %v4401_v16 }
 0x3d1   : > { %1851 = vrot.lane.b32.xlu1 %v5470_v58, %s5036_s24 }
 0x3d6   : > { %v1798_v17 = vpop.permute.xlu0 %1797 }
 0x3d7   : > { %1818 = vmatpush.msra.mxu0 %v1798_v17  ;;  %v4400_v17 = vld [vmem:[%s5331_s15 + $0x28] sm:$0xff] }
 0x3d8   : > { %2082 = vmatpush.bf16.msrb.mxu2 %v4400_v17 }
 0x3de   : > { %v1878_v18 = vpop.permute.xlu0 %1877 }
 0x3df   : > { %4013 = vmatmul.msk.f32.vlgmr.msra.gmra.mxu3 %vm1465_vm0, %v1878_v18  ;;  %v4399_v18 = vld [vmem:[%s5331_s15 + $0x20] sm:$0xff] }
 0x3e0   : > { %1849 = vrot.lane.b32.xlu2 %v5472_v59, %s5036_s24  ;;  %2083 = vmatpush.bf16.msrb.mxu2 %v4399_v18  ;;  %v4410_v18 = vld [vmem:[%s5337_s8 + $0x38] sm:$0xff] }
 0x3e1   : > { %2228 = vmatpush.bf16.msrb.mxu3 %v4410_v18 }
 0x409   : > { %v1648_v20 = vpop.xlane.xlu0 %1647 }
 0x40a   : > { %v1650_v22 = vsub.f32 %v1640_v1, %v1648_v20 }
 0x40c   : > { %v1653_v24 = vmul.f32 1.442695, %v1650_v22 }
 0x42b   : > { %v1657_v19 = vpop.xlane.xlu1 %1656 }
 0x42c   : > { %4655 = vrcp.f32 %v1657_v19  ;;  %v4398_v19 = vld [vmem:[%s5331_s15 + $0x18] sm:$0xff] }
 0x42d   : > { %4657 = vpow2.f32 %v1653_v24  ;;  %2084 = vmatpush.bf16.msrb.mxu2 %v4398_v19 }
 0x432   : > { %v4656_v21 = vpop.eup %4655 }
 0x433   : > { %v1663_v23 = vmul.f32 %v4656_v21, %v4652_v62  ;;  %v4658_v27 = vpop.eup %4657 }
 0x434   : > { %v1658_v30 = vsel %vm1518_vm1, %v4658_v27, 0.0 }
 0x435   : > { %4002 = vmatmul.msk.f32.vlgmr.msrb.gmra.mxu0 %vm1518_vm1, %v1663_v23 }
 0x43a   : > { %v1772_v25 = vpop.f32.mrf.mxu3 }
 0x43b   : > { %v1789_v58 = vpop.xlane.xlu2 %1788  ;;  %v1778_v26 = vsel %vm1518_vm1, %v1772_v25, -inf }
 0x43c   : > { %4659 = vrcp.f32 %v1789_v58  ;;  %1779 = vmax.xlane.f32.xlu1 %v1778_v26  ;;  %v4396_v58 = vld [vmem:[%s5331_s15 + $0x8] sm:$0xff]  ;;  %v4395_v26 = vld [vmem:[%s5331_s15] sm:$0xff] }
 0x442   : > { %v4660_v28 = vpop.eup %4659 }
 0x443   : > { %v1795_v29 = vmul.f32 %v4660_v28, %v4654_v14  ;;  %v1852_v59 = vpop.permute.xlu1 %1851  ;;  %v1850_v31 = vpop.permute.xlu2 %1849 }
 0x444   : > { %4010 = vmatpush.xpose.msk.msrb.mxu0 %vm1465_vm0, %v1852_v59  ;;  %1659 = vadd.xlane.f32.xlu1 %v1658_v30 }
 0x445   : > { %4008 = vmatmul.msk.f32.vlgmr.msra.gmra.mxu0 %vm1518_vm1, %v1795_v29 }
 0x44d   : > { %4011 = vmatmul.msk.f32.vlgmr.msrb.gmra.mxu0 %vm1465_vm0, %v1850_v31 }
 0x462   : > { %v1902_v32 = vpop.f32.mrf.mxu3 }
 0x463   : > { %v1908_v33 = vsel %vm1518_vm1, %v1902_v32, -inf }
 0x464   : > { %1909 = vmax.xlane.f32.xlu0 %v1908_v33 }
 0x478   : > { %1693 = vrot.lane.b32.xlu0 %v5525_v42, %s5034_s27 }
 0x4af   : > { %v1780_v35 = vpop.xlane.xlu1 %1779 }
 0x4b0   : > { %v1782_v36 = vsub.f32 %v1772_v25, %v1780_v35  ;;  %v4397_v25 = vld [vmem:[%s5331_s15 + $0x10] sm:$0xff] }
 0x4b1   : > { %2085 = vmatpush.bf16.msrb.mxu2 %v4397_v25 }
 0x4b2   : > { %v1689_v34 = vpop.f32.mrf.mxu0  ;;  %v1785_v38 = vmul.f32 1.442695, %v1782_v36 }
 0x4b4   : > { %4661 = vpow2.f32 %v1785_v38 }
 0x4b5   : > { %2086 = vmatpush.bf16.msrb.mxu2 %v4396_v58  ;;  %v4406_v58 = vld [vmem:[%s5337_s8 + $0x18] sm:$0xff] }
 0x4b7   : > { %v1660_v48 = vpop.xlane.xlu1 %1659 }
 0x4b9   : > { %2087 = vmatpush.bf16.msrb.mxu2 %v4395_v26 }
 0x4ba   : > { %v4662_v43 = vpop.eup %4661 }
 0x4bb   : > { %v1790_v44 = vsel %vm1518_vm1, %v4662_v43, 0.0 }
 0x4c2   : > { %v5572_v37 = vpop.f32.mrf.mxu0 }
 0x4ca   : > { %v1874_v39 = vpop.f32.mrf.mxu0 }
 0x4cb   : > { %v1905_v41 = vsel %vm1518_vm1, %v1874_v39, -inf }
 0x4cc   : > { %1906 = vmax.xlane.f32.xlu2 %v1905_v41 }
 0x4d4   : > { %1791 = vadd.xlane.f32.xlu2 %v1790_v44  ;;  %v4130_v44 = vld [vmem:[%s5339_s2 + $0x60] sm:$0xf] }
 0x4d7   : > { %v1910_v45 = vpop.xlane.xlu0 %1909 }
 0x4d8   : > { %v1912_v46 = vsub.f32 %v1902_v32, %v1910_v45 }
 0x4da   : > { %v1915_v47 = vmul.f32 1.442695, %v1912_v46  ;;  %v4424_v46 = vld [vmem:[%s5339_s2 + $0x64] sm:$0xf0] }
 0x4dc   : > { %4663 = vpow2.f32 %v1915_v47  ;;  %v4131_v47 = vor.u32 %v4424_v46, %v4130_v44 }
 0x4dd   : > { %4665 = vrcp.f32 %v1660_v48  ;;  %v4122_v48 = vld [vmem:[%s5339_s2 + $0x50] sm:$0xf] }
 0x4e2   : > { %v4664_v51 = vpop.eup %4663 }
 0x4e3   : > { %v1920_v52 = vsel %vm1518_vm1, %v4664_v51, 0.0  ;;  %v4666_v53 = vpop.eup %4665 }
 0x4e4   : > { %1921 = vadd.xlane.f32.xlu2 %v1920_v52  ;;  %v1664_v55 = vmul.f32 %v4666_v53, %v4658_v27  ;;  %v4114_v53 = vld [vmem:[%s5339_s2 + $0x40] sm:$0xf] }
 0x4ea   : > { %v1694_v54 = vpop.permute.xlu0 %1693 }
 0x4eb   : > { %1714 = vmatpush.msrb.mxu1 %v1694_v54  ;;  %v4420_v54 = vld [vmem:[%s5339_s2 + $0x44] sm:$0xf0] }
 0x4ec   : > { %4003 = vmatmul.msk.f32.vlgmr.msrb.gmra.mxu1 %vm1518_vm1, %v1664_v55  ;;  %v4115_v55 = vor.u32 %v4420_v54, %v4114_v53 }
 0x4fc   : > { %4584 = vrot.lane.b32.xlu2 %v4583_v56, %s5036_s24  ;;  %v4106_v56 = vld [vmem:[%s5339_s2 + $0x30] sm:$0xf] }
 0x53f   : > { %v1907_v61 = vpop.xlane.xlu2 %1906 }
 0x540   : > { %v1911_v0 = vsub.f32 %v1874_v39, %v1907_v61  ;;  %v4418_v61 = vld [vmem:[%s5339_s2 + $0x34] sm:$0xf0] }
 0x542   : > { %v1913_v1 = vmul.f32 1.442695, %v1911_v0  ;;  %v4633_v0 = vld [vmem:[%s6041_s6] ss:$0 sm:$0xff]  ;;  %s6051_s6 = sld [smem:[#allocation43_spill]] }
 0x544   : > { %4667 = vpow2.f32 %v1913_v1  ;;  %v4107_v1 = vor.u32 %v4418_v61, %v4106_v56 }
 0x547   : > { %v1792_v4 = vpop.xlane.xlu2 %1791 }
 0x548   : > { %s6052_s3 = scalar_lea.vmem %s6051_s6, %s5355_s25 }
 0x54a   : > { %v4668_v2 = vpop.eup %4667 }
 0x54b   : > { %v1917_v3 = vsel %vm1518_vm1, %v4668_v2, 0.0 }
 0x54c   : > { %1918 = vadd.xlane.f32.xlu1 %v1917_v3  ;;  %v4416_v3 = vld [vmem:[%s5339_s2 + $0x24] sm:$0xf0] }
 0x557   : > { %v1922_v5 = vpop.xlane.xlu2 %1921 }
 0x55f   : > { %v4585_v6 = vpop.permute.xlu2 %4584 }
 0x560   : > { %v4586_v7 = vunpack.i.l.bf16 %v4585_v6 }
 0x562   : > { %1948 = vmatpush.msra.mxu0 %v4586_v7 }
 0x565   : > { %1823 = vrot.lane.b32.xlu1 %v5525_v42, %s5035_s9  ;;  %v4587_v42 = vunpack.i.h.bf16 %v4585_v6 }
 0x569   : > { %v1716_v8 = vpop.f32.mrf.mxu1 }
 0x56a   : > { %v4588_v40 = vpack.i.bf16 %v1716_v8, %v1689_v34  ;;  %v4090_v8 = vld [vmem:[%s5339_s2 + $0x10] sm:$0xf] }
 0x56c   : > { %4589 = vrot.lane.b32.xlu0 %v4588_v40, %s5036_s24  ;;  %v4414_v40 = vld [vmem:[%s5339_s2 + $0x14] sm:$0xf0] }
 0x5bf   : > { %v1919_v62 = vpop.xlane.xlu1 %1918 }
 0x5c0   : > { %4669 = vrcp.f32 %v1919_v62 }
 0x5c1   : > { %4671 = vrcp.f32 %v1792_v4 }
 0x5c2   : > { %4673 = vrcp.f32 %v1922_v5 }
 0x5c3   : > { %4675 = vrcp.f32 %v5037_v15 }
 0x5c6   : > { %v4670_v9 = vpop.eup %4669 }
 0x5c7   : > { %v1925_v10 = vmul.f32 %v4670_v9, %v4668_v2  ;;  %v4672_v11 = vpop.eup %4671  ;;  %v4098_v2 = vld [vmem:[%s5339_s2 + $0x20] sm:$0xf]  ;;  %v4091_v9 = vor.u32 %v4414_v40, %v4090_v8 }
 0x5c8   : > { %v1796_v12 = vmul.f32 %v4672_v11, %v4662_v43  ;;  %v4674_v13 = vpop.eup %4673  ;;  %v4099_v6 = vor.u32 %v4416_v3, %v4098_v2 }
 0x5c9   : > { %4014 = vmatmul.msk.f32.vlgmr.msra.gmra.mxu0 %vm1518_vm1, %v1925_v10  ;;  %v1926_v14 = vmul.f32 %v4674_v13, %v4664_v51  ;;  %v4422_v51 = vld [vmem:[%s5339_s2 + $0x54] sm:$0xf0]  ;;  %v4676_v17 = vpop.eup %4675 }
 0x5ca   : > { %v4123_v52 = vor.u32 %v4422_v51, %v4122_v48  ;;  %v2103_v19 = vmul.f32 128.0, %v4676_v17  ;;  %vm2107_vm4 = vweird.f32 %v4676_v17 }
 0x5d7   : > { %v1824_v63 = vpop.permute.xlu1 %1823 }
 0x5d8   : > { %1844 = vmatpush.msra.mxu1 %v1824_v63  ;;  %v4082_v63 = vld [vmem:[%s5339_s2] sm:$0xf] }
 0x5d9   : > { %4009 = vmatmul.msk.f32.vlgmr.msra.gmra.mxu1 %vm1518_vm1, %v1796_v12 }
 0x5da   : > { %1974 = vmatpush.msrb.mxu1 %v4587_v42  ;;  %v4412_v42 = vld [vmem:[%s5339_s2 + $0x4] sm:$0xf0] }
 0x5db   : > { %v4083_v13 = vor.u32 %v4412_v42, %v4082_v63 }
 0x5de   : > { %v4590_v27 = vpop.permute.xlu0 %4589 }
 0x5df   : > { %v4592_v29 = vunpack.i.h.bf16 %v4590_v27  ;;  %v4591_v59 = vunpack.i.l.bf16 %v4590_v27  ;;  %v4405_v27 = vld [vmem:[%s5337_s8 + $0x10] sm:$0xff] }
 0x5e1   : > { %4015 = vmatmul.msk.f32.vlgmr.msrb.gmra.mxu1 %vm1518_vm1, %v1926_v14  ;;  %v2004_v33 = vsel %vm1465_vm0, %v5538_v60, %v4592_v29  ;;  %v2003_v34 = vsel %vm1465_vm0, %v5536_v57, %v4591_v59  ;;  %v4138_v60 = vld [vmem:[%s5339_s2 + $0x70] sm:$0xf]  ;;  %v4426_v57 = vld [vmem:[%s5339_s2 + $0x74] sm:$0xf0] }
 0x5e2   : > { %v4139_v45 = vor.u32 %v4426_v57, %v4138_v60  ;;  %v1252_v14 = vld [vmem:[%s6042_s20] sm:$0xff] }
 0x5e4   : > { %2345 = vmatpush.bf16.msrb.mxu0 %v4139_v45 }
 0x5e8   : > { %2346 = vmatpush.bf16.msrb.mxu0 %v4131_v47 }
 0x5ec   : > { %2347 = vmatpush.bf16.msrb.mxu0 %v4123_v52 }
 0x5f0   : > { %2348 = vmatpush.bf16.msrb.mxu0 %v4115_v55 }
 0x5f4   : > { %2349 = vmatpush.bf16.msrb.mxu0 %v4107_v1  ;;  %v4634_v1 = vld [vmem:[%s6044_s7] ss:$0 sm:$0xff]  ;;  %s6060_s7 = sld [smem:[#allocation53_spill]] (!%p4328_p1) }
 0x5f8   : > { %2350 = vmatpush.bf16.msrb.mxu0 %v4099_v6 }
 0x5fc   : > { %2351 = vmatpush.bf16.msrb.mxu0 %v4091_v9 }
 0x600   : > { %2352 = vmatpush.bf16.msrb.mxu0 %v4083_v13  ;;  %v4636_v13 = vld [vmem:[%s6048_s18] ss:$0 sm:$0xff] }
 0x646   : > { %v1950_v22 = vpop.f32.mrf.mxu0 }
 0x656   : > { %v1846_v20 = vpop.f32.mrf.mxu1 }
 0x657   : > { %v4593_v21 = vpack.i.bf16 %v1846_v20, %v5572_v37  ;;  %v4409_v20 = vld [vmem:[%s5337_s8 + $0x30] sm:$0xff] }
 0x658   : > { %2229 = vmatpush.bf16.msrb.mxu3 %v4409_v20 }
 0x659   : > { %4594 = vrot.lane.b32.xlu0 %v4593_v21, %s5035_s9  ;;  %v2104_v21 = vsub.f32 1.0, %v2103_v19 }
 0x65e   : > { %v1976_v23 = vpop.f32.mrf.mxu1 }
 0x65f   : > { %v4598_v24 = vpack.i.bf16 %v1976_v23, %v1950_v22  ;;  %v4408_v22 = vld [vmem:[%s5337_s8 + $0x28] sm:$0xff]  ;;  %v2105_v23 = vmul.f32 %v4676_v17, %v2104_v21 }
 0x660   : > { %2230 = vmatpush.bf16.msrb.mxu3 %v4408_v22 }
 0x661   : > { %4599 = vrot.lane.b32.xlu1 %v4598_v24, %s5034_s27  ;;  %v4407_v24 = vld [vmem:[%s5337_s8 + $0x20] sm:$0xff]  ;;  %v2106_v25 = vadd.f32 %v4676_v17, %v2105_v23 }
 0x663   : > { %v5654_v26 = vsel %vm2107_vm4, %v4676_v17, %v2106_v25  ;;  %v4140_v25 = vld [vmem:[%s5339_s2 + $0x78] sm:$0xf0] }
 0x664   : > { %2231 = vmatpush.bf16.msrb.mxu3 %v4407_v24  ;;  %v4425_v24 = vld [vmem:[%s5339_s2 + $0x74] sm:$0xf] }
 0x668   : > { %2232 = vmatpush.bf16.msrb.mxu3 %v4406_v58  ;;  %v4423_v58 = vld [vmem:[%s5339_s2 + $0x64] sm:$0xf] }
 0x66c   : > { %2233 = vmatpush.bf16.msrb.mxu3 %v4405_v27  ;;  %v4143_v27 = vor.u32 %v4425_v24, %v4140_v25 }
 0x66e   : > { %2359 = vmatpush.bf16.msra.mxu1 %v4143_v27 }
 0x6cb   : > { %v4595_v28 = vpop.permute.xlu0 %4594 }
 0x6cc   : > { %v4597_v30 = vunpack.i.h.bf16 %v4595_v28  ;;  %v4596_v31 = vunpack.i.l.bf16 %v4595_v28 }
 0x6ce   : > { %v2007_v37 = vsel %vm2005_vm2, %v2004_v33, %v4597_v30  ;;  %v2006_v38 = vsel %vm2005_vm2, %v2003_v34, %v4596_v31  ;;  %v4403_v34 = vld [vmem:[%s5337_s8] sm:$0xff] }
 0x6d3   : > { %v4600_v32 = vpop.permute.xlu1 %4599 }
 0x6d4   : > { %v4602_v35 = vunpack.i.h.bf16 %v4600_v32  ;;  %v4601_v36 = vunpack.i.l.bf16 %v4600_v32  ;;  %v4404_v32 = vld [vmem:[%s5337_s8 + $0x8] sm:$0xff]  ;;  %s6054_s8 = scalar_lea.vmem %s6053_s30, %s5355_s25 }
 0x6d5   : > { %2234 = vmatpush.bf16.msrb.mxu3 %v4404_v32  ;;  %v4124_v32 = vld [vmem:[%s5339_s2 + $0x58] sm:$0xf0] }
 0x6d6   : > { %v2009_v39 = vsel %vm2008_vm3, %v2006_v38, %v4601_v36  ;;  %v2010_v41 = vsel %vm2008_vm3, %v2007_v37, %v4602_v35 }
 0x6d7   : > { %v2028_v43 = vpack.c.bf16 %v2010_v41, %v2009_v39 }
 0x6d9   : > { %2088 = vmatmul.bf16.vlgmr.msrb.gmra.mxu2 %v2028_v43  ;;  %2235 = vmatpush.bf16.msrb.mxu3 %v4403_v34 }
 0x75c   : > { %v2089_v4 = vpop.f32.mrf.mxu2 }
 0x75d   : > { %v2090_v5 = vadd.f32 %v4633_v0, %v2089_v4 }
 0x75f   : > { %v5625_v7 = vadd.f32 %v2090_v5, %v5455_v49 }
 0x761   : > { %2098 = vadd.xlane.f32.xlu0 %v5625_v7  ;;  %v2111_v62 = vmul.f32 %v5625_v7, %v5625_v7 }
 0x763   : > { %2113 = vadd.xlane.f32.xlu1 %v2111_v62 }
 0x764   : > { %v2091_v10 = vpop.f32.mrf.mxu2 }
 0x765   : > { %v2092_v11 = vadd.f32 %v4633_v0, %v2091_v10  ;;  %v5682_v10 = vld [vmem:[%s5387_s22] sm:$0x3] }
 0x767   : > { %v5633_v12 = vadd.f32 %v2092_v11, %v5457_v50  ;;  %v1253_v50 = vld [vmem:[%s6042_s20 + $0x8] sm:$0xff]  ;;  %v2261_v11 = vperm.slane %v5682_v10, 0 }
 0x768   : > { %v5646_v16 = vpack.c.bf16 %v1253_v50, %v1252_v14 }
 0x769   : > { %2100 = vadd.xlane.f32.xlu2 %v5633_v12  ;;  %v2112_v49 = vmul.f32 %v5633_v12, %v5633_v12 }
 0x76a   : > { %2353 = vmatmul.bf16.vlgmr.msrb.gmra.mxu0 %v5646_v16 }
 0x76b   : > { %2115 = vadd.xlane.f32.xlu0 %v2112_v49 }
 0x7d4   : > { %v2099_v28 = vpop.xlane.xlu0 %2098 }
 0x7d5   : > { %v2109_v29 = vmul.f32 %v5654_v26, %v2099_v28  ;;  %v4132_v28 = vld [vmem:[%s5339_s2 + $0x68] sm:$0xf0] }
 0x7d6   : > { %v2114_v59 = vpop.xlane.xlu1 %2113 }
 0x7d7   : > { %v2119_v30 = vmul.f32 %v2109_v29, %v2109_v29  ;;  %v2117_v31 = vmul.f32 %v2114_v59, %v5654_v26  ;;  %v2145_v56 = vsub.f32 %v5625_v7, %v2109_v29  ;;  %v4635_v7 = vld [vmem:[%s6046_s12] ss:$0 sm:$0xff]  ;;  %v4135_v29 = vor.u32 %v4423_v58, %v4132_v28 }
 0x7d9   : > { %v2121_v33 = vsub.f32 %v2117_v31, %v2119_v30  ;;  %v4421_v31 = vld [vmem:[%s5339_s2 + $0x54] sm:$0xf]  ;;  %2360 = vmatpush.bf16.msra.mxu1 %v4135_v29 }
 0x7da   : > { %v4127_v34 = vor.u32 %v4421_v31, %v4124_v32 }
 0x7db   : > { %v2123_v35 = vadd.f32 1e-05, %v2121_v33 }
 0x7dc   : > { %v2101_v36 = vpop.xlane.xlu2 %2100 }
 0x7dd   : > { %4677 = vrsqrt.f32 %v2123_v35  ;;  %v2110_v37 = vmul.f32 %v5654_v26, %v2101_v36  ;;  %vm2131_vm6 = vweird.f32 %v2123_v35  ;;  %v4116_v36 = vld [vmem:[%s5339_s2 + $0x48] sm:$0xf0]  ;;  %2361 = vmatpush.bf16.msra.mxu1 %v4127_v34 }
 0x7de   : > { %v2116_v38 = vpop.xlane.xlu0 %2115 }
 0x7df   : > { %v2120_v39 = vmul.f32 %v2110_v37, %v2110_v37  ;;  %v2118_v41 = vmul.f32 %v2116_v38, %v5654_v26  ;;  %v2146_v3 = vsub.f32 %v5633_v12, %v2110_v37 }
 0x7e1   : > { %v2122_v43 = vsub.f32 %v2118_v41, %v2120_v39 }
 0x7e3   : > { %v4678_v60 = vpop.eup %4677  ;;  %v2124_v57 = vadd.f32 1e-05, %v2122_v43 }
 0x7e4   : > { %v2126_v44 = vmul.f32 %v4678_v60, %v2123_v35  ;;  %vm2132_vm5 = vweird.f32 %v4678_v60  ;;  %v4419_v35 = vld [vmem:[%s5339_s2 + $0x44] sm:$0xf] }
 0x7e5   : > { %4679 = vrsqrt.f32 %v2124_v57  ;;  %vm2133_vm7 = vmor %vm2131_vm6, %vm2132_vm5  ;;  %vm2141_vm9 = vweird.f32 %v2124_v57  ;;  %v4119_v37 = vor.u32 %v4419_v35, %v4116_v36 }
 0x7e6   : > { %v2127_v45 = vmul.f32 %v4678_v60, %v2126_v44 }
 0x7e7   : > { %v2354_v12 = vpop.f32.mrf.mxu0  ;;  %2362 = vmatpush.bf16.msra.mxu1 %v4119_v37 }
 0x7e8   : > { %v2128_v46 = vmul.f32 0.5, %v2127_v45  ;;  %v2355_v49 = vadd.f32 %v2354_v12, %v2261_v11  ;;  %v4417_v45 = vld [vmem:[%s5339_s2 + $0x34] sm:$0xf] }
 0x7ea   : > { %v2129_v47 = vsub.f32 1.5, %v2128_v46  ;;  %4144 = vmatpush.xpose.msk.msra.mxu2 %vm1465_vm0, %v2355_v49  ;;  %2495 = vrot.lane.b32.xlu2 %v2355_v49, %s5034_s27  ;;  %v4108_v46 = vld [vmem:[%s5339_s2 + $0x38] sm:$0xf0] }
 0x7eb   : > { %v4680_v48 = vpop.eup %4679  ;;  %2627 = vrot.lane.b32.xlu0 %v2355_v49, %s5035_s9 }
 0x7ec   : > { %v2130_v51 = vmul.f32 %v4678_v60, %v2129_v47  ;;  %v2136_v52 = vmul.f32 %v4680_v48, %v2124_v57  ;;  %vm2142_vm8 = vweird.f32 %v4680_v48  ;;  %v4111_v47 = vor.u32 %v4417_v45, %v4108_v46 }
 0x7ed   : > { %vm2143_vm10 = vmor %vm2141_vm9, %vm2142_vm8 }
 0x7ee   : > { %v2137_v53 = vmul.f32 %v4680_v48, %v2136_v52  ;;  %v2134_v54 = vsel %vm2133_vm7, %v4678_v60, %v2130_v51  ;;  %v4100_v51 = vld [vmem:[%s5339_s2 + $0x28] sm:$0xf0]  ;;  %2363 = vmatpush.bf16.msra.mxu1 %v4111_v47 }
 0x7ef   : > { %v2147_v0 = vmul.f32 %v2145_v56, %v2134_v54  ;;  %v2356_v63 = vpop.f32.mrf.mxu0  ;;  %v4092_v54 = vld [vmem:[%s5339_s2 + $0x18] sm:$0xf0]  ;;  %v4411_v56 = vld [vmem:[%s5339_s2 + $0x4] sm:$0xf] }
 0x7f0   : > { %v2138_v55 = vmul.f32 0.5, %v2137_v53  ;;  %v2357_v42 = vadd.f32 %v2356_v63, %v2261_v11  ;;  %v4413_v53 = vld [vmem:[%s5339_s2 + $0x14] sm:$0xf] }
 0x7f1   : > { %v2152_v6 = vmul.f32 %v4634_v1, %v2147_v0 }
 0x7f2   : > { %v2139_v61 = vsub.f32 1.5, %v2138_v55  ;;  %2523 = vrot.lane.b32.xlu1 %v2357_v42, %s5034_s27  ;;  %4146 = vmatpush.xpose.msk.msra.mxu3 %vm1465_vm0, %v2357_v42  ;;  %v4095_v55 = vor.u32 %v4413_v53, %v4092_v54 }
 0x7f3   : > { %v5675_v40 = vadd.f32 %v4635_v7, %v2152_v6 }
 0x7f4   : > { %v2140_v2 = vmul.f32 %v4680_v48, %v2139_v61  ;;  %v4084_v61 = vld [vmem:[%s5339_s2 + $0x8] sm:$0xf0] }
 0x7f5   : > { %v4087_v0 = vor.u32 %v4411_v56, %v4084_v61 }
 0x7f6   : > { %v2144_v4 = vsel %vm2143_vm10, %v4680_v48, %v2140_v2  ;;  %v4415_v48 = vld [vmem:[%s5339_s2 + $0x24] sm:$0xf]  ;;  %s6049_s2 = sld [smem:[#allocation28_spill]] }
 0x7f7   : > { %v2148_v5 = vmul.f32 %v2146_v3, %v2144_v4  ;;  %v4103_v52 = vor.u32 %v4415_v48, %v4100_v51 }
 0x7f9   : > { %v2153_v8 = vmul.f32 %v4634_v1, %v2148_v5  ;;  %2364 = vmatpush.bf16.msra.mxu1 %v4103_v52 }
 0x7fa   : > { %2655 = vrot.lane.b32.xlu1 %v2357_v42, %s5035_s9 }
 0x7fb   : > { %v5677_v62 = vadd.f32 %v4635_v7, %v2153_v8 }
 0x7fd   : > { %v2176_v9 = vpack.c.bf16 %v5677_v62, %v5675_v40  ;;  %2365 = vmatpush.bf16.msra.mxu1 %v4095_v55 }
 0x7ff   : > { %2236 = vmatmul.bf16.vlgmr.msrb.gmra.mxu3 %v2176_v9 }
 0x801   : > { %2366 = vmatpush.bf16.msra.mxu1 %v4087_v0 }
 0x802   : > { %2757 = vrot.lane.b32.xlu1 %v2355_v49, %s5036_s24 }
 0x804   : > { %2367 = vmatmul.bf16.vlgmr.msra.gmra.mxu1 %v5646_v16 }
 0x844   : > { %v2496_v18 = vpop.permute.xlu2 %2495 }
 0x845   : > { %4150 = vmatpush.xpose.msk.msrb.mxu2 %vm1465_vm0, %v2496_v18 }
 0x85d   : > { %v2628_v19 = vpop.permute.xlu0 %2627 }
 0x864   : > { %v2524_v20 = vpop.permute.xlu1 %2523 }
 0x865   : > { %4152 = vmatpush.xpose.msk.msrb.mxu3 %vm1465_vm0, %v2524_v20 }
 0x86c   : > { %v2656_v21 = vpop.permute.xlu1 %2655 }
 0x874   : > { %v2758_v33 = vpop.permute.xlu1 %2757 }
 0x881   : > { %v2368_v20 = vpop.f32.mrf.mxu1 }
 0x882   : > { %v2237_v14 = vpop.f32.mrf.mxu3 }
 0x883   : > { %v2238_v50 = vadd.f32 %v4636_v13, %v2237_v14 }
 0x885   : > { %2493 = vrot.lane.b32.xlu0 %v2238_v50, %s5034_s27  ;;  %4145 = vmatmul.msk.f32.vlgmr.msra.gmra.mxu2 %vm1465_vm0, %v2238_v50 }
 0x886   : > { %4156 = vmatpush.xpose.msk.msra.mxu2 %vm1465_vm0, %v2628_v19 }
 0x889   : > { %v2370_v58 = vpop.f32.mrf.mxu1 }
 0x88a   : > { %v2239_v15 = vpop.f32.mrf.mxu3 }
 0x88b   : > { %v2240_v17 = vadd.f32 %v4636_v13, %v2239_v15 }
 0x88d   : > { %2783 = vrot.lane.b32.xlu1 %v2240_v17, %s5036_s24  ;;  %2521 = vrot.lane.b32.xlu2 %v2240_v17, %s5034_s27 }
 0x88e   : > { %4147 = vmatmul.msk.f32.vlgmr.msra.gmra.mxu3 %vm1465_vm0, %v2240_v17  ;;  %2653 = vrot.lane.b32.xlu0 %v2240_v17, %s5035_s9 }
 0x88f   : > { %4158 = vmatpush.xpose.msk.msra.mxu3 %vm1465_vm0, %v2656_v21  ;;  %v2262_v21 = vperm.slane %v5682_v10, 1 }
 0x891   : > { %v2371_v27 = vadd.f32 %v2370_v58, %v2262_v21 }
 0x893   : > { %2488 = vmatpush.msrb.mxu1 %v2371_v27 }
 0x895   : > { %2625 = vrot.lane.b32.xlu2 %v2238_v50, %s5035_s9 }
 0x896   : > { %2755 = vrot.lane.b32.xlu0 %v2238_v50, %s5036_s24 }
 0x89d   : > { %2785 = vrot.lane.b32.xlu2 %v2357_v42, %s5036_s24 }
 0x8e7   : > { %v2522_v22 = vpop.permute.xlu2 %2521 }
 0x8e8   : > { %4153 = vmatmul.msk.f32.vlgmr.msrb.gmra.mxu3 %vm1465_vm0, %v2522_v22 }
 0x8ef   : > { %v2626_v23 = vpop.permute.xlu2 %2625 }
 0x8f7   : > { %v2786_v59 = vpop.permute.xlu2 %2785  ;;  %v2494_v30 = vpop.permute.xlu0 %2493 }
 0x8f8   : > { %4151 = vmatmul.msk.f32.vlgmr.msrb.gmra.mxu2 %vm1465_vm0, %v2494_v30  ;;  %4164 = vmatpush.xpose.msk.msrb.mxu3 %vm1465_vm0, %v2786_v59 }
 0x8f9   : > { %4162 = vmatpush.xpose.msk.msrb.mxu2 %vm1465_vm0, %v2758_v33 }
 0x8ff   : > { %v2784_v39 = vpop.permute.xlu1 %2783 }
 0x900   : > { %v2654_v38 = vpop.permute.xlu0 %2653  ;;  %4157 = vmatmul.msk.f32.vlgmr.msra.gmra.mxu2 %vm1465_vm0, %v2626_v23  ;;  %v2369_v23 = vadd.f32 %v2368_v20, %v2262_v21 }
 0x901   : > { %4159 = vmatmul.msk.f32.vlgmr.msra.gmra.mxu3 %vm1465_vm0, %v2654_v38 }
 0x902   : > { %2465 = vmatpush.msra.mxu0 %v2369_v23 }
 0x908   : > { %v2756_v41 = vpop.permute.xlu0 %2755  ;;  %v2396_v43 = vpop.f32.mrf.mxu2 }
 0x909   : > { %4163 = vmatmul.msk.f32.vlgmr.msrb.gmra.mxu2 %vm1465_vm0, %v2756_v41  ;;  %4165 = vmatmul.msk.f32.vlgmr.msrb.gmra.mxu3 %vm1465_vm0, %v2784_v39  ;;  %v2425_v60 = vsel %vm1518_vm1, %v2396_v43, -inf }
 0x90a   : > { %2426 = vmax.xlane.f32.xlu2 %v2425_v60 }
 0x911   : > { %v2422_v57 = vpop.f32.mrf.mxu3 }
 0x912   : > { %v2428_v44 = vsel %vm1518_vm1, %v2422_v57, -inf }
 0x913   : > { %2429 = vmax.xlane.f32.xlu0 %v2428_v44 }
 0x96b   : > { %v2546_v1 = vpop.f32.mrf.mxu3 }
 0x96c   : > { %v2552_v2 = vsel %vm1518_vm1, %v2546_v1, -inf }
 0x96d   : > { %2553 = vmax.xlane.f32.xlu2 %v2552_v2 }
 0x97b   : > { %v2518_v3 = vpop.f32.mrf.mxu2 }
 0x97c   : > { %v2549_v4 = vsel %vm1518_vm1, %v2518_v3, -inf }
 0x97d   : > { %2550 = vmax.xlane.f32.xlu1 %v2549_v4  ;;  %v2427_v5 = vpop.xlane.xlu2 %2426 }
 0x97e   : > { %v2431_v6 = vsub.f32 %v2396_v43, %v2427_v5 }
 0x980   : > { %v2433_v7 = vmul.f32 1.442695, %v2431_v6 }
 0x982   : > { %4681 = vpow2.f32 %v2433_v7 }
 0x983   : > { %v2650_v8 = vpop.f32.mrf.mxu2 }
 0x984   : > { %v2678_v9 = vpop.f32.mrf.mxu3  ;;  %v2681_v11 = vsel %vm1518_vm1, %v2650_v8, -inf }
 0x985   : > { %2682 = vmax.xlane.f32.xlu0 %v2681_v11  ;;  %v2684_v12 = vsel %vm1518_vm1, %v2678_v9, -inf }
 0x986   : > { %v2430_v16 = vpop.xlane.xlu0 %2429  ;;  %2685 = vmax.xlane.f32.xlu1 %v2684_v12 }
 0x987   : > { %v2432_v49 = vsub.f32 %v2422_v57, %v2430_v16  ;;  %v4603_v57 = vpack.i.bf16 %v2371_v27, %v2369_v23 }
 0x988   : > { %v4682_v42 = vpop.eup %4681 }
 0x989   : > { %v2435_v63 = vmul.f32 1.442695, %v2432_v49  ;;  %v2437_v50 = vsel %vm1518_vm1, %v4682_v42, 0.0 }
 0x98b   : > { %4683 = vpow2.f32 %v2435_v63 }
 0x98c   : > { %v2780_v13 = vpop.f32.mrf.mxu2  ;;  %v2808_v14 = vpop.f32.mrf.mxu3 }
 0x98d   : > { %v2811_v15 = vsel %vm1518_vm1, %v2780_v13, -inf  ;;  %v2814_v17 = vsel %vm1518_vm1, %v2808_v14, -inf }
 0x98e   : > { %2438 = vadd.xlane.f32.xlu1 %v2437_v50  ;;  %2812 = vmax.xlane.f32.xlu2 %v2811_v15 }
 0x98f   : > { %2815 = vmax.xlane.f32.xlu0 %v2814_v17 }
 0x991   : > { %v4684_v18 = vpop.eup %4683 }
 0x992   : > { %v2440_v19 = vsel %vm1518_vm1, %v4684_v18, 0.0 }
 0x996   : > { %2441 = vadd.xlane.f32.xlu2 %v2440_v19 }
 0x9e0   : > { %v2554_v22 = vpop.xlane.xlu2 %2553 }
 0x9e1   : > { %v2556_v24 = vsub.f32 %v2546_v1, %v2554_v22 }
 0x9e3   : > { %v2559_v25 = vmul.f32 1.442695, %v2556_v24 }
 0x9e5   : > { %4685 = vpow2.f32 %v2559_v25 }
 0x9eb   : > { %v4686_v28 = vpop.eup %4685 }
 0x9ec   : > { %v2564_v29 = vsel %vm1518_vm1, %v4686_v28, 0.0 }
 0x9ed   : > { %2565 = vadd.xlane.f32.xlu1 %v2564_v29 }
 0x9f0   : > { %v2551_v59 = vpop.xlane.xlu1 %2550 }
 0x9f1   : > { %v2555_v30 = vsub.f32 %v2518_v3, %v2551_v59 }
 0x9f3   : > { %v2557_v31 = vmul.f32 1.442695, %v2555_v30 }
 0x9f5   : > { %4687 = vpow2.f32 %v2557_v31  ;;  %v4434_v31 = vld [vmem:[%s6049_s2 + $0x38] sm:$0xff] }
 0x9f6   : > { %2984 = vmatpush.bf16.msra.mxu2 %v4434_v31 }
 0x9f8   : > { %v2683_v32 = vpop.xlane.xlu0 %2682 }
 0x9f9   : > { %v2687_v33 = vsub.f32 %v2650_v8, %v2683_v32  ;;  %v2686_v10 = vpop.xlane.xlu1 %2685 }
 0x9fa   : > { %v2688_v34 = vsub.f32 %v2678_v9, %v2686_v10  ;;  %v4432_v10 = vld [vmem:[%s6049_s2 + $0x28] sm:$0xff] }
 0x9fb   : > { %v4688_v35 = vpop.eup %4687  ;;  %v2689_v36 = vmul.f32 1.442695, %v2687_v33  ;;  %v4433_v33 = vld [vmem:[%s6049_s2 + $0x30] sm:$0xff] }
 0x9fc   : > { %v2691_v37 = vmul.f32 1.442695, %v2688_v34  ;;  %v2561_v38 = vsel %vm1518_vm1, %v4688_v35, 0.0  ;;  %2985 = vmatpush.bf16.msra.mxu2 %v4433_v33 }
 0x9fd   : > { %4689 = vpow2.f32 %v2689_v36  ;;  %2562 = vadd.xlane.f32.xlu0 %v2561_v38 }
 0x9fe   : > { %4691 = vpow2.f32 %v2691_v37 }
 0xa00   : > { %2986 = vmatpush.bf16.msra.mxu2 %v4432_v10 }
 0xa01   : > { %v2813_v39 = vpop.xlane.xlu2 %2812  ;;  %v2439_v41 = vpop.xlane.xlu1 %2438 }
 0xa02   : > { %v2817_v43 = vsub.f32 %v2780_v13, %v2813_v39  ;;  %v2816_v60 = vpop.xlane.xlu0 %2815  ;;  %4693 = vrcp.f32 %v2439_v41  ;;  %v4431_v41 = vld [vmem:[%s6049_s2 + $0x20] sm:$0xff] }
 0xa03   : > { %v4690_v44 = vpop.eup %4689  ;;  %v2818_v45 = vsub.f32 %v2808_v14, %v2816_v60  ;;  %v4429_v60 = vld [vmem:[%s6049_s2 + $0x10] sm:$0xff] }
 0xa04   : > { %v4692_v46 = vpop.eup %4691  ;;  %v2819_v47 = vmul.f32 1.442695, %v2817_v43  ;;  %v2693_v48 = vsel %vm1518_vm1, %v4690_v44, 0.0  ;;  %2987 = vmatpush.bf16.msra.mxu2 %v4431_v41  ;;  %v4430_v43 = vld [vmem:[%s6049_s2 + $0x18] sm:$0xff] }
 0xa05   : > { %v2821_v51 = vmul.f32 1.442695, %v2818_v45  ;;  %2694 = vadd.xlane.f32.xlu2 %v2693_v48  ;;  %v2696_v52 = vsel %vm1518_vm1, %v4692_v46, 0.0 }
 0xa06   : > { %4695 = vpow2.f32 %v2819_v47  ;;  %2697 = vadd.xlane.f32.xlu0 %v2696_v52  ;;  %4604 = vrot.lane.b32.xlu1 %v4603_v57, %s5034_s27 }
 0xa07   : > { %4697 = vpow2.f32 %v2821_v51 }
 0xa08   : > { %v4694_v53 = vpop.eup %4693  ;;  %2988 = vmatpush.bf16.msra.mxu2 %v4430_v43 }
 0xa09   : > { %v2445_v54 = vmul.f32 %v4694_v53, %v4682_v42  ;;  %v2442_v55 = vpop.xlane.xlu2 %2441 }
 0xa0a   : > { %4699 = vrcp.f32 %v2442_v55 }
 0xa0b   : > { %4148 = vmatmul.msk.f32.vlgmr.msra.gmra.mxu0 %vm1518_vm1, %v2445_v54 }
 0xa0c   : > { %v4696_v56 = vpop.eup %4695  ;;  %2989 = vmatpush.bf16.msra.mxu2 %v4429_v60 }
 0xa0d   : > { %v4698_v61 = vpop.eup %4697  ;;  %v2823_v0 = vsel %vm1518_vm1, %v4696_v56, 0.0 }
 0xa0e   : > { %2824 = vadd.xlane.f32.xlu2 %v2823_v0  ;;  %v2826_v1 = vsel %vm1518_vm1, %v4698_v61, 0.0 }
 0xa0f   : > { %2827 = vadd.xlane.f32.xlu0 %v2826_v1 }
 0xa10   : > { %v4700_v2 = vpop.eup %4699 }
 0xa11   : > { %v2446_v3 = vmul.f32 %v4700_v2, %v4684_v18 }
 0xa13   : > { %4149 = vmatmul.msk.f32.vlgmr.msrb.gmra.mxu1 %vm1518_vm1, %v2446_v3 }
 0xa23   : > { %4614 = vrot.lane.b32.xlu0 %v4603_v57, %s5036_s24 }
 0xa26   : > { %4609 = vrot.lane.b32.xlu2 %v4603_v57, %s5035_s9  ;;  %v4428_v57 = vld [vmem:[%s6049_s2 + $0x8] sm:$0xff] }
 0xa27   : > { %2990 = vmatpush.bf16.msra.mxu2 %v4428_v57 }
 0xa60   : > { %v2566_v4 = vpop.xlane.xlu1 %2565 }
 0xa61   : > { %4701 = vrcp.f32 %v2566_v4 }
 0xa67   : > { %v4702_v6 = vpop.eup %4701 }
 0xa68   : > { %v2570_v16 = vmul.f32 %v4702_v6, %v4686_v28 }
 0xa70   : > { %v2563_v5 = vpop.xlane.xlu0 %2562 }
 0xa71   : > { %4703 = vrcp.f32 %v2563_v5  ;;  %v4637_v5 = vld [vmem:[%s6052_s3] ss:$0 sm:$0xff] }
 0xa77   : > { %v4704_v7 = vpop.eup %4703 }
 0xa78   : > { %v2695_v8 = vpop.xlane.xlu2 %2694  ;;  %v4605_v9 = vpop.permute.xlu1 %4604  ;;  %v2569_v49 = vmul.f32 %v4704_v7, %v4688_v35 }
 0xa79   : > { %v4607_v11 = vunpack.i.h.bf16 %v4605_v9  ;;  %v4606_v12 = vunpack.i.l.bf16 %v4605_v9  ;;  %v2698_v63 = vpop.xlane.xlu0 %2697  ;;  %4705 = vrcp.f32 %v2695_v8 }
 0xa7a   : > { %4707 = vrcp.f32 %v2698_v63 }
 0xa7b   : > { %2593 = vmatpush.msrb.mxu0 %v4606_v12  ;;  %2620 = vmatpush.msra.mxu1 %v4607_v11 }
 0xa7c   : > { %4154 = vmatmul.msk.f32.vlgmr.msrb.gmra.mxu0 %vm1518_vm1, %v2569_v49  ;;  %4155 = vmatmul.msk.f32.vlgmr.msra.gmra.mxu1 %vm1518_vm1, %v2570_v16 }
 0xa7f   : > { %v4706_v13 = vpop.eup %4705 }
 0xa80   : > { %v4708_v14 = vpop.eup %4707  ;;  %v2701_v18 = vmul.f32 %v4706_v13, %v4690_v44  ;;  %v4427_v44 = vld [vmem:[%s6049_s2] sm:$0xff] }
 0xa81   : > { %v2825_v42 = vpop.xlane.xlu2 %2824  ;;  %v2702_v19 = vmul.f32 %v4708_v14, %v4692_v46  ;;  %2991 = vmatpush.bf16.msra.mxu2 %v4427_v44 }
 0xa82   : > { %v2828_v20 = vpop.xlane.xlu0 %2827  ;;  %4709 = vrcp.f32 %v2825_v42 }
 0xa83   : > { %4711 = vrcp.f32 %v2828_v20 }
 0xa88   : > { %v4710_v21 = vpop.eup %4709  ;;  %v2467_v28 = vpop.f32.mrf.mxu0 }
 0xa89   : > { %v4610_v50 = vpop.permute.xlu2 %4609  ;;  %v4712_v22 = vpop.eup %4711  ;;  %v2831_v58 = vmul.f32 %v4710_v21, %v4696_v56 }
 0xa8a   : > { %v4612_v15 = vunpack.i.h.bf16 %v4610_v50  ;;  %v4611_v17 = vunpack.i.l.bf16 %v4610_v50  ;;  %v2832_v27 = vmul.f32 %v4712_v22, %v4698_v61 }
 0xa8c   : > { %2724 = vmatpush.msra.mxu0 %v4611_v17  ;;  %2750 = vmatpush.msrb.mxu1 %v4612_v15 }
 0xa8d   : > { %4160 = vmatmul.msk.f32.vlgmr.msra.gmra.mxu0 %vm1518_vm1, %v2701_v18  ;;  %4161 = vmatmul.msk.f32.vlgmr.msrb.gmra.mxu1 %vm1518_vm1, %v2702_v19 }
 0xa90   : > { %v2490_v29 = vpop.f32.mrf.mxu1 }
 0xa95   : > { %v4615_v23 = vpop.permute.xlu0 %4614 }
 0xa96   : > { %v4617_v24 = vunpack.i.h.bf16 %v4615_v23  ;;  %v4616_v25 = vunpack.i.l.bf16 %v4615_v23 }
 0xa98   : > { %2854 = vmatpush.msrb.mxu0 %v4616_v25  ;;  %2880 = vmatpush.msra.mxu1 %v4617_v24 }
 0xa99   : > { %4166 = vmatmul.msk.f32.vlgmr.msrb.gmra.mxu0 %vm1518_vm1, %v2831_v58  ;;  %4167 = vmatmul.msk.f32.vlgmr.msra.gmra.mxu1 %vm1518_vm1, %v2832_v27 }
 0xaf9   : > { %v2595_v59 = vpop.f32.mrf.mxu0  ;;  %v2622_v30 = vpop.f32.mrf.mxu1 }
 0xafa   : > { %v4618_v32 = vpack.i.bf16 %v2622_v30, %v2595_v59 }
 0xafc   : > { %4619 = vrot.lane.b32.xlu1 %v4618_v32, %s5036_s24 }
 0xb0a   : > { %v2726_v34 = vpop.f32.mrf.mxu0  ;;  %v2752_v35 = vpop.f32.mrf.mxu1 }
 0xb0b   : > { %v4623_v36 = vpack.i.bf16 %v2752_v35, %v2726_v34 }
 0xb0d   : > { %4624 = vrot.lane.b32.xlu0 %v4623_v36, %s5035_s9 }
 0xb16   : > { %v2856_v37 = vpop.f32.mrf.mxu0  ;;  %v2882_v38 = vpop.f32.mrf.mxu1 }
 0xb17   : > { %v4628_v39 = vpack.i.bf16 %v2882_v38, %v2856_v37 }
 0xb19   : > { %4629 = vrot.lane.b32.xlu2 %v4628_v39, %s5034_s27  ;;  %s6050_s27 = sld [smem:[#allocation29_spill]] }
 0xb1f   : > { %v4258_v49 = vld [vmem:[%s6050_s27 + $0x70] sm:$0xf]  ;;  %v4450_v63 = vld [vmem:[%s6050_s27 + $0x74] sm:$0xf0]  ;;  %v4449_v42 = vld [vmem:[%s6050_s27 + $0x74] sm:$0xf] }
 0xb20   : > { %v4259_v13 = vor.u32 %v4450_v63, %v4258_v49  ;;  %v4260_v14 = vld [vmem:[%s6050_s27 + $0x78] sm:$0xf0]  ;;  %v4448_v15 = vld [vmem:[%s6050_s27 + $0x64] sm:$0xf0]  ;;  %v4447_v17 = vld [vmem:[%s6050_s27 + $0x64] sm:$0xf] }
 0xb21   : > { %v4263_v50 = vor.u32 %v4449_v42, %v4260_v14  ;;  %v4252_v19 = vld [vmem:[%s6050_s27 + $0x68] sm:$0xf0]  ;;  %v4242_v21 = vld [vmem:[%s6050_s27 + $0x50] sm:$0xf]  ;;  %v4446_v22 = vld [vmem:[%s6050_s27 + $0x54] sm:$0xf0] }
 0xb22   : > { %3159 = vmatpush.bf16.msra.mxu3 %v4259_v13  ;;  %v4255_v20 = vor.u32 %v4447_v17, %v4252_v19  ;;  %v4445_v23 = vld [vmem:[%s6050_s27 + $0x54] sm:$0xf]  ;;  %v4243_v24 = vor.u32 %v4446_v22, %v4242_v21  ;;  %v4244_v25 = vld [vmem:[%s6050_s27 + $0x58] sm:$0xf0]  ;;  %v4234_v27 = vld [vmem:[%s6050_s27 + $0x40] sm:$0xf] }
 0xb23   : > { %3173 = vmatpush.bf16.msra.mxu0 %v4263_v50  ;;  %v4247_v58 = vor.u32 %v4445_v23, %v4244_v25  ;;  %v4236_v30 = vld [vmem:[%s6050_s27 + $0x48] sm:$0xf0]  ;;  %v4226_v32 = vld [vmem:[%s6050_s27 + $0x30] sm:$0xf]  ;;  %v4442_v33 = vld [vmem:[%s6050_s27 + $0x34] sm:$0xf0] }
 0xb24   : > { %v4441_v10 = vld [vmem:[%s6050_s27 + $0x34] sm:$0xf]  ;;  %v4227_v34 = vor.u32 %v4442_v33, %v4226_v32  ;;  %v4228_v35 = vld [vmem:[%s6050_s27 + $0x38] sm:$0xf0]  ;;  %v4218_v37 = vld [vmem:[%s6050_s27 + $0x20] sm:$0xf] }
 0xb25   : > { %v4231_v36 = vor.u32 %v4441_v10, %v4228_v35  ;;  %v4440_v38 = vld [vmem:[%s6050_s27 + $0x24] sm:$0xf0]  ;;  %v4439_v39 = vld [vmem:[%s6050_s27 + $0x24] sm:$0xf]  ;;  %v4220_v43 = vld [vmem:[%s6050_s27 + $0x28] sm:$0xf0] }
 0xb26   : > { %v4219_v41 = vor.u32 %v4440_v38, %v4218_v37  ;;  %v4223_v57 = vor.u32 %v4439_v39, %v4220_v43  ;;  %v4458_v49 = vld [vmem:[%s5414_s1 + $0x38] sm:$0xff]  ;;  %v4465_v42 = vld [vmem:[%s5414_s1 + $0x70] sm:$0xff]  ;;  %v4456_v17 = vld [vmem:[%s5414_s1 + $0x28] sm:$0xff] }
 0xb27   : > { %3174 = vmatpush.bf16.msra.mxu0 %v4255_v20  ;;  %3325 = vmatpush.bf16.msrb.mxu1 %v4458_v49  ;;  %v4457_v13 = vld [vmem:[%s5414_s1 + $0x30] sm:$0xff]  ;;  %v4463_v20 = vld [vmem:[%s5414_s1 + $0x60] sm:$0xff]  ;;  %v4454_v43 = vld [vmem:[%s5414_s1 + $0x18] sm:$0xff] }
 0xb28   : > { %v4455_v39 = vld [vmem:[%s5414_s1 + $0x20] sm:$0xff] }
 0xb2b   : > { %3175 = vmatpush.bf16.msra.mxu0 %v4247_v58  ;;  %3326 = vmatpush.bf16.msrb.mxu1 %v4457_v13 }
 0xb2f   : > { %3327 = vmatpush.bf16.msrb.mxu1 %v4456_v17 }
 0xb33   : > { %3328 = vmatpush.bf16.msrb.mxu1 %v4455_v39  ;;  %v4642_v39 = vld [vmem:[%s1240_s14] ss:$0 sm:$0xff]  ;;  %s6059_s14 = sld [smem:[#allocation52_spill]] (!%p4328_p1) }
 0xb37   : > { %3329 = vmatpush.bf16.msrb.mxu1 %v4454_v43 }
 0xb6e   : > { %v4620_v45 = vpop.permute.xlu1 %4619 }
 0xb6f   : > { %v4622_v46 = vunpack.i.h.bf16 %v4620_v45  ;;  %v4621_v47 = vunpack.i.l.bf16 %v4620_v45 }
 0xb71   : > { %v2910_v54 = vsel %vm1465_vm0, %v2490_v29, %v4622_v46  ;;  %v2909_v55 = vsel %vm1465_vm0, %v2467_v28, %v4621_v47  ;;  %v4444_v28 = vld [vmem:[%s6050_s27 + $0x44] sm:$0xf0]  ;;  %v4443_v29 = vld [vmem:[%s6050_s27 + $0x44] sm:$0xf]  ;;  %v4210_v46 = vld [vmem:[%s6050_s27 + $0x10] sm:$0xf] }
 0xb72   : > { %v4235_v59 = vor.u32 %v4444_v28, %v4234_v27  ;;  %v4239_v31 = vor.u32 %v4443_v29, %v4236_v30  ;;  %v4438_v47 = vld [vmem:[%s6050_s27 + $0x14] sm:$0xf0]  ;;  %v4638_v30 = vld [vmem:[%s6054_s8] ss:$0 sm:$0xff] }
 0xb73   : > { %v4630_v48 = vpop.permute.xlu2 %4629 }
 0xb74   : > { %v4632_v56 = vunpack.i.h.bf16 %v4630_v48  ;;  %v4631_v61 = vunpack.i.l.bf16 %v4630_v48  ;;  %3176 = vmatpush.bf16.msra.mxu0 %v4239_v31  ;;  %v4437_v48 = vld [vmem:[%s6050_s27 + $0x14] sm:$0xf] }
 0xb78   : > { %3177 = vmatpush.bf16.msra.mxu0 %v4231_v36 }
 0xb7c   : > { %3178 = vmatpush.bf16.msra.mxu0 %v4223_v57  ;;  %v4453_v57 = vld [vmem:[%s5414_s1 + $0x10] sm:$0xff] }
 0xb7d   : > { %3330 = vmatpush.bf16.msrb.mxu1 %v4453_v57 }
 0xb7f   : > { %v4625_v51 = vpop.permute.xlu0 %4624 }
 0xb80   : > { %v4627_v52 = vunpack.i.h.bf16 %v4625_v51  ;;  %v4626_v53 = vunpack.i.l.bf16 %v4625_v51 }
 0xb82   : > { %v2912_v0 = vsel %vm2005_vm2, %v2910_v54, %v4627_v52  ;;  %v2911_v1 = vsel %vm2005_vm2, %v2909_v55, %v4626_v53  ;;  %v4211_v53 = vor.u32 %v4438_v47, %v4210_v46  ;;  %v4212_v54 = vld [vmem:[%s6050_s27 + $0x18] sm:$0xf0]  ;;  %v4202_v55 = vld [vmem:[%s6050_s27] sm:$0xf]  ;;  %v4451_v46 = vld [vmem:[%s5414_s1] sm:$0xff] }
 0xb83   : > { %v2913_v2 = vsel %vm2008_vm3, %v2911_v1, %v4631_v61  ;;  %v2914_v3 = vsel %vm2008_vm3, %v2912_v0, %v4632_v56  ;;  %v4436_v56 = vld [vmem:[%s6050_s27 + $0x4] sm:$0xf0]  ;;  %v4215_v61 = vor.u32 %v4437_v48, %v4212_v54  ;;  %v4435_v0 = vld [vmem:[%s6050_s27 + $0x4] sm:$0xf]  ;;  %v4204_v1 = vld [vmem:[%s6050_s27 + $0x8] sm:$0xf0] }
 0xb84   : > { %v2932_v4 = vpack.c.bf16 %v2914_v3, %v2913_v2  ;;  %v4203_v3 = vor.u32 %v4436_v56, %v4202_v55  ;;  %v3072_v47 = vld [vmem:[%s5400_s26] sm:$0x3] }
 0xb85   : > { %3179 = vmatpush.bf16.msra.mxu0 %v4215_v61  ;;  %v3075_v55 = vperm.slane %v3072_v47, 0 }
 0xb86   : > { %2992 = vmatmul.bf16.vlgmr.msra.gmra.mxu2 %v2932_v4  ;;  %v4207_v4 = vor.u32 %v4435_v0, %v4204_v1 }
 0xb89   : > { %3180 = vmatpush.bf16.msra.mxu0 %v4207_v4 }
 0xc09   : > { %v2993_v6 = vpop.f32.mrf.mxu2 }
 0xc0a   : > { %v2994_v7 = vadd.f32 %v4637_v5, %v2993_v6 }
 0xc0c   : > { %v5786_v8 = vadd.f32 %v2994_v7, %v5675_v40 }
 0xc0e   : > { %3002 = vadd.xlane.f32.xlu1 %v5786_v8  ;;  %v3008_v9 = vmul.f32 %v5786_v8, %v5786_v8 }
 0xc10   : > { %3010 = vadd.xlane.f32.xlu2 %v3008_v9 }
 0xc11   : > { %v2995_v11 = vpop.f32.mrf.mxu2 }
 0xc12   : > { %v2996_v12 = vadd.f32 %v4637_v5, %v2995_v11 }
 0xc14   : > { %v5792_v16 = vadd.f32 %v2996_v12, %v5677_v62  ;;  %v4250_v62 = vld [vmem:[%s6050_s27 + $0x60] sm:$0xf] }
 0xc15   : > { %v4251_v18 = vor.u32 %v4448_v15, %v4250_v62  ;;  %v4464_v15 = vld [vmem:[%s5414_s1 + $0x68] sm:$0xff] }
 0xc16   : > { %3004 = vadd.xlane.f32.xlu0 %v5792_v16  ;;  %v3009_v40 = vmul.f32 %v5792_v16, %v5792_v16 }
 0xc17   : > { %3160 = vmatpush.bf16.msra.mxu3 %v4251_v18 }
 0xc18   : > { %3012 = vadd.xlane.f32.xlu1 %v3009_v40  ;;  %v4466_v40 = vld [vmem:[%s5414_s1 + $0x78] sm:$0xff] }
 0xc19   : > { %3339 = vmatpush.bf16.msrb.mxu2 %v4466_v40 }
 0xc1b   : > { %3161 = vmatpush.bf16.msra.mxu3 %v4243_v24 }
 0xc1d   : > { %3340 = vmatpush.bf16.msrb.mxu2 %v4465_v42 }
 0xc1f   : > { %3162 = vmatpush.bf16.msra.mxu3 %v4235_v59 }
 0xc21   : > { %3341 = vmatpush.bf16.msrb.mxu2 %v4464_v15 }
 0xc23   : > { %3163 = vmatpush.bf16.msra.mxu3 %v4227_v34  ;;  %v4639_v34 = vld [vmem:[%s1227_s4] ss:$0 sm:$0xff] }
 0xc25   : > { %3342 = vmatpush.bf16.msrb.mxu2 %v4463_v20 }
 0xc27   : > { %3164 = vmatpush.bf16.msra.mxu3 %v4219_v41  ;;  %v4461_v41 = vld [vmem:[%s5414_s1 + $0x50] sm:$0xff] }
 0xc2b   : > { %3165 = vmatpush.bf16.msra.mxu3 %v4211_v53 }
 0xc2f   : > { %3166 = vmatpush.bf16.msra.mxu3 %v4203_v3 }
 0xc81   : > { %v3003_v60 = vpop.xlane.xlu1 %3002 }
 0xc82   : > { %v5822_v44 = vmul.f32 %v3003_v60, %v5654_v26  ;;  %v4460_v60 = vld [vmem:[%s5414_s1 + $0x48] sm:$0xff] }
 0xc83   : > { %v3011_v45 = vpop.xlane.xlu2 %3010 }
 0xc84   : > { %v3016_v51 = vmul.f32 %v5822_v44, %v5822_v44  ;;  %v3014_v52 = vmul.f32 %v3011_v45, %v5654_v26  ;;  %v3042_v28 = vsub.f32 %v5786_v8, %v5822_v44  ;;  %v4459_v44 = vld [vmem:[%s5414_s1 + $0x40] sm:$0xff]  ;;  %v4452_v45 = vld [vmem:[%s5414_s1 + $0x8] sm:$0xff] }
 0xc85   : > { %3331 = vmatpush.bf16.msrb.mxu1 %v4452_v45 }
 0xc86   : > { %v3018_v2 = vsub.f32 %v3014_v52, %v3016_v51  ;;  %v3076_v51 = vperm.slane %v3072_v47, 1 }
 0xc88   : > { %v3020_v5 = vadd.f32 1e-05, %v3018_v2 }
 0xc89   : > { %v3005_v6 = vpop.xlane.xlu0 %3004  ;;  %3332 = vmatpush.bf16.msrb.mxu1 %v4451_v46 }
 0xc8a   : > { %4713 = vrsqrt.f32 %v3020_v5  ;;  %v3007_v7 = vmul.f32 %v3005_v6, %v5654_v26  ;;  %vm3028_vm12 = vweird.f32 %v3020_v5 }
 0xc8b   : > { %v3013_v9 = vpop.xlane.xlu1 %3012 }
 0xc8c   : > { %v3017_v11 = vmul.f32 %v3007_v7, %v3007_v7  ;;  %v3015_v12 = vmul.f32 %v3013_v9, %v5654_v26  ;;  %v3043_v32 = vsub.f32 %v5792_v16, %v3007_v7  ;;  %v4462_v16 = vld [vmem:[%s5414_s1 + $0x58] sm:$0xff]  ;;  %v4640_v9 = vld [vmem:[%s1234_s13] ss:$0 sm:$0xff] }
 0xc8d   : > { %3343 = vmatpush.bf16.msrb.mxu2 %v4462_v16 }
 0xc8e   : > { %v3019_v63 = vsub.f32 %v3015_v12, %v3017_v11 }
 0xc90   : > { %v4714_v14 = vpop.eup %4713  ;;  %v3021_v50 = vadd.f32 1e-05, %v3019_v63 }
 0xc91   : > { %v3023_v62 = vmul.f32 %v4714_v14, %v3020_v5  ;;  %vm3029_vm11 = vweird.f32 %v4714_v14  ;;  %3344 = vmatpush.bf16.msrb.mxu2 %v4461_v41 }
 0xc92   : > { %4715 = vrsqrt.f32 %v3021_v50  ;;  %vm3030_vm13 = vmor %vm3028_vm12, %vm3029_vm11  ;;  %vm3038_vm15 = vweird.f32 %v3021_v50 }
 0xc93   : > { %v3024_v18 = vmul.f32 %v4714_v14, %v3023_v62 }
 0xc95   : > { %v3025_v19 = vmul.f32 0.5, %v3024_v18  ;;  %3345 = vmatpush.bf16.msrb.mxu2 %v4460_v60 }
 0xc97   : > { %v3026_v21 = vsub.f32 1.5, %v3025_v19 }
 0xc98   : > { %v4716_v22 = vpop.eup %4715 }
 0xc99   : > { %v3027_v23 = vmul.f32 %v4714_v14, %v3026_v21  ;;  %v3033_v24 = vmul.f32 %v4716_v22, %v3021_v50  ;;  %vm3039_vm14 = vweird.f32 %v4716_v22  ;;  %3346 = vmatpush.bf16.msrb.mxu2 %v4459_v44 }
 0xc9a   : > { %vm3040_vm0 = vmor %vm3038_vm15, %vm3039_vm14 }
 0xc9b   : > { %v3034_v25 = vmul.f32 %v4716_v22, %v3033_v24  ;;  %v3031_v58 = vsel %vm3030_vm13, %v4714_v14, %v3027_v23 }
 0xc9c   : > { %v3044_v59 = vmul.f32 %v3042_v28, %v3031_v58 }
 0xc9d   : > { %v3035_v27 = vmul.f32 0.5, %v3034_v25 }
 0xc9e   : > { %v3049_v8 = vmul.f32 %v4638_v30, %v3044_v59 }
 0xc9f   : > { %v3036_v29 = vsub.f32 1.5, %v3035_v27 }
 0xca0   : > { %v3054_v36 = vadd.f32 %v4639_v34, %v3049_v8 }
 0xca1   : > { %v3037_v31 = vmul.f32 %v4716_v22, %v3036_v29 }
 0xca3   : > { %v3041_v33 = vsel %vm3040_vm0, %v4716_v22, %v3037_v31 }
 0xca4   : > { %v3045_v10 = vmul.f32 %v3043_v32, %v3041_v33 }
 0xca6   : > { %v3050_v35 = vmul.f32 %v4638_v30, %v3045_v10 }
 0xca8   : > { %v3055_v37 = vadd.f32 %v4639_v34, %v3050_v35 }
 0xcaa   : > { %v3073_v38 = vpack.c.bf16 %v3055_v37, %v3054_v36 }
 0xcac   : > { %3167 = vmatmul.bf16.vlgmr.msra.gmra.mxu3 %v3073_v38  ;;  %3181 = vmatmul.bf16.vlgmr.msra.gmra.mxu0 %v3073_v38 }
 0xd29   : > { %v3182_v48 = vpop.f32.mrf.mxu0 }
 0xd2a   : > { %v3183_v53 = vadd.f32 %v3182_v48, %v3076_v51 }
 0xd2c   : > { %v3188_v61 = vmax.f32 %v3183_v53, 0.0 }
 0xd2f   : > { %v3168_v52 = vpop.f32.mrf.mxu3 }
 0xd30   : > { %v3169_v1 = vadd.f32 %v3168_v52, %v3075_v55 }
 0xd31   : > { %v3184_v54 = vpop.f32.mrf.mxu0 }
 0xd32   : > { %v3185_v56 = vadd.f32 %v3184_v54, %v3076_v51  ;;  %v3187_v5 = vmax.f32 %v3169_v1, 0.0 }
 0xd34   : > { %v3190_v0 = vmax.f32 %v3185_v56, 0.0 }
 0xd36   : > { %v3225_v2 = vpack.c.bf16 %v3190_v0, %v3188_v61 }
 0xd37   : > { %v3170_v3 = vpop.f32.mrf.mxu3 }
 0xd38   : > { %v3171_v4 = vadd.f32 %v3170_v3, %v3075_v55  ;;  %3347 = vmatmul.bf16.vlgmr.msrb.gmra.mxu2 %v3225_v2 }
 0xd3a   : > { %v3189_v6 = vmax.f32 %v3171_v4, 0.0 }
 0xd3c   : > { %v3224_v7 = vpack.c.bf16 %v3189_v6, %v3187_v5 }
 0xd3e   : > { %3333 = vmatmul.bf16.vlgmr.msrb.gmra.mxu1 %v3224_v7 }
 0xdbb   : > { %v3334_v11 = vpop.f32.mrf.mxu1  ;;  %v3348_v12 = vpop.f32.mrf.mxu2 }
 0xdbc   : > { %v3335_v40 = vadd.f32 %v4640_v9, %v3334_v11 }
 0xdbe   : > { %v3349_v49 = vadd.f32 %v3348_v12, %v3335_v40 }
 0xdc0   : > { %v3355_v63 = vadd.f32 %v3349_v49, %v3054_v36 }
 0xdc2   : > { %3357 = vadd.xlane.f32.xlu2 %v3355_v63  ;;  %v3363_v42 = vmul.f32 %v3355_v63, %v3355_v63 }
 0xdc3   : > { %v3336_v13 = vpop.f32.mrf.mxu1  ;;  %v3350_v50 = vpop.f32.mrf.mxu2 }
 0xdc4   : > { %v3337_v14 = vadd.f32 %v4640_v9, %v3336_v13  ;;  %3365 = vadd.xlane.f32.xlu1 %v3363_v42 }
 0xdc6   : > { %v3351_v62 = vadd.f32 %v3350_v50, %v3337_v14 }
 0xdc8   : > { %v3356_v15 = vadd.f32 %v3351_v62, %v3055_v37 }
 0xdca   : > { %3359 = vadd.xlane.f32.xlu0 %v3356_v15  ;;  %v3364_v17 = vmul.f32 %v3356_v15, %v3356_v15 }
 0xdcc   : > { %3367 = vadd.xlane.f32.xlu2 %v3364_v17 }
 0xe35   : > { %v3358_v18 = vpop.xlane.xlu2 %3357 }
 0xe36   : > { %v3361_v19 = vmul.f32 %v3358_v18, %v5654_v26 }
 0xe37   : > { %v3366_v20 = vpop.xlane.xlu1 %3365 }
 0xe38   : > { %v3371_v21 = vmul.f32 %v3361_v19, %v3361_v19  ;;  %v3369_v22 = vmul.f32 %v3366_v20, %v5654_v26  ;;  %v3397_v37 = vsub.f32 %v3355_v63, %v3361_v19 }
 0xe3a   : > { %v3373_v23 = vsub.f32 %v3369_v22, %v3371_v21 }
 0xe3c   : > { %v3375_v24 = vadd.f32 1e-05, %v3373_v23 }
 0xe3d   : > { %v3360_v25 = vpop.xlane.xlu0 %3359 }
 0xe3e   : > { %4717 = vrsqrt.f32 %v3375_v24  ;;  %v3362_v58 = vmul.f32 %v3360_v25, %v5654_v26  ;;  %vm3383_vm2 = vweird.f32 %v3375_v24 }
 0xe3f   : > { %v3368_v27 = vpop.xlane.xlu2 %3367 }
 0xe40   : > { %v3372_v28 = vmul.f32 %v3362_v58, %v3362_v58  ;;  %v3370_v29 = vmul.f32 %v3368_v27, %v5654_v26  ;;  %v4641_v26 = vld [vmem:[%s1237_s10] ss:$0 sm:$0xff]  ;;  %v3398_v46 = vsub.f32 %v3356_v15, %v3362_v58 }
 0xe42   : > { %v3374_v59 = vsub.f32 %v3370_v29, %v3372_v28 }
 0xe44   : > { %v4718_v30 = vpop.eup %4717  ;;  %v3376_v31 = vadd.f32 1e-05, %v3374_v59 }
 0xe45   : > { %v3378_v32 = vmul.f32 %v4718_v30, %v3375_v24  ;;  %vm3384_vm1 = vweird.f32 %v4718_v30 }
 0xe46   : > { %4719 = vrsqrt.f32 %v3376_v31  ;;  %vm3385_vm3 = vmor %vm3383_vm2, %vm3384_vm1  ;;  %vm3393_vm5 = vweird.f32 %v3376_v31 }
 0xe47   : > { %v3379_v33 = vmul.f32 %v4718_v30, %v3378_v32 }
 0xe49   : > { %v3380_v10 = vmul.f32 0.5, %v3379_v33 }
 0xe4b   : > { %v3381_v8 = vsub.f32 1.5, %v3380_v10 }
 0xe4c   : > { %v4720_v34 = vpop.eup %4719 }
 0xe4d   : > { %v3382_v35 = vmul.f32 %v4718_v30, %v3381_v8  ;;  %v3388_v36 = vmul.f32 %v4720_v34, %v3376_v31  ;;  %vm3394_vm4 = vweird.f32 %v4720_v34 }
 0xe4e   : > { %vm3395_vm6 = vmor %vm3393_vm5, %vm3394_vm4 }
 0xe4f   : > { %v3386_v38 = vsel %vm3385_vm3, %v4718_v30, %v3382_v35  ;;  %v3389_v16 = vmul.f32 %v4720_v34, %v3388_v36 }
 0xe50   : > { %v3399_v41 = vmul.f32 %v3397_v37, %v3386_v38 }
 0xe51   : > { %v3390_v43 = vmul.f32 0.5, %v3389_v16 }
 0xe52   : > { %v3404_v60 = vmul.f32 %v4641_v26, %v3399_v41 }
 0xe53   : > { %v3391_v57 = vsub.f32 1.5, %v3390_v43 }
 0xe54   : > { %v3409_v44 = vadd.f32 %v4642_v39, %v3404_v60 }
 0xe55   : > { %v3392_v45 = vmul.f32 %v4720_v34, %v3391_v57 }
 0xe56   : > { %3411 = vst [vmem:[#allocation2] sm:$0xff] %v3409_v44 }
 0xe57   : > { %v3396_v47 = vsel %vm3395_vm6, %v4720_v34, %v3392_v45 }
 0xe58   : > { %v3400_v48 = vmul.f32 %v3398_v46, %v3396_v47 }
 0xe5a   : > { %v3405_v51 = vmul.f32 %v4641_v26, %v3400_v48  ;;  %3416 = sbr.rel (%p4328_p1) target bundleno = 3848 (0xf08), region = 152 }
 0xe5c   : > { %v3410_v52 = vadd.f32 %v4642_v39, %v3405_v51 }
 0xe5e   : > { %3412 = vst [vmem:[#allocation2 + $0x8] sm:$0xff] %v3410_v52 }
 0xe5f   : > { %v4474_v53 = vld [vmem:[%s6059_s14 + $0x38] sm:$0xff]  ;;  %v4473_v54 = vld [vmem:[%s6059_s14 + $0x30] sm:$0xff]  ;;  %v4472_v55 = vld [vmem:[%s6059_s14 + $0x28] sm:$0xff]  ;;  %v3434_v3 = vpack.c.bf16 %v3410_v52, %v3409_v44 }
 0xe60   : > { %3486 = vmatpush.bf16.msra.mxu0 %v4474_v53  ;;  %v4471_v56 = vld [vmem:[%s6059_s14 + $0x20] sm:$0xff]  ;;  %v4470_v61 = vld [vmem:[%s6059_s14 + $0x18] sm:$0xff]  ;;  %v4469_v0 = vld [vmem:[%s6059_s14 + $0x10] sm:$0xff] }
 0xe61   : > { %v4468_v1 = vld [vmem:[%s6059_s14 + $0x8] sm:$0xff]  ;;  %v4467_v2 = vld [vmem:[%s6059_s14] sm:$0xff] }
 0xe62   : > { %v4721_v4 = vld [vmem:[%s6060_s7] ss:$0 sm:$0xff] }
 0xe64   : > { %3487 = vmatpush.bf16.msra.mxu0 %v4473_v54 }
 0xe68   : > { %3488 = vmatpush.bf16.msra.mxu0 %v4472_v55 }
 0xe6c   : > { %3489 = vmatpush.bf16.msra.mxu0 %v4471_v56 }
 0xe70   : > { %3490 = vmatpush.bf16.msra.mxu0 %v4470_v61 }
 0xe74   : > { %3491 = vmatpush.bf16.msra.mxu0 %v4469_v0 }
 0xe78   : > { %3492 = vmatpush.bf16.msra.mxu0 %v4468_v1 }
 0xe7c   : > { %3493 = vmatpush.bf16.msra.mxu0 %v4467_v2 }
 0xe7f   : > { %3494 = vmatmul.bf16.vlgmr.msra.gmra.mxu0 %v3434_v3 }
 0xefc   : > { %v3495_v5 = vpop.f32.mrf.mxu0 }
 0xefd   : > { %v3496_v6 = vadd.f32 %v4721_v4, %v3495_v5 }
 0xeff   : > { %3500 = vst [vmem:[#allocation15] sm:$0xff] %v3496_v6 }
 0xf04   : > { %v3497_v7 = vpop.f32.mrf.mxu0 }
 0xf05   : > { %v3498_v9 = vadd.f32 %v4721_v4, %v3497_v7 }
 0xf07   : > { %3501 = vst [vmem:[#allocation15 + $0x8] sm:$0xff] %v3498_v9 }
 0xf08 PF: > { %s6061_s26 = sld [smem:[#allocation25_spill]]  ;;  %s5038_s29 = smov [#allocation15]  }
 0xf09   : > { %s6062_s13 = sld [smem:[#allocation54_spill]]  ;;  %s3510_s23 = sshll.u32 %s5038_s29, 4  ;;  %s3511_s23 = int_to_ptr.vmem [resolvable:$true] %s3510_s23 }
 0xf0a   : > { %s5039_s12 = smov 128   ;;  %s5040_s22 = smov 8  }
 0xf0e   : > { %p4520_p2 = scmp.eq.s32.totalorder %s6061_s26, 1 }
 0xf0f   : > { %s3512_s11 = sshll.u32 %s6062_s13, 4  ;;  %s3513_s11 = int_to_ptr.hbm [resolvable:$true] %s3512_s11 }
 0xf10   : > { %4494 = dma.vmem_to_hbm [thread:$0]  (%p4520_p2), %s3511_s23, 256, %s3513_s11, [#allocation5], %s5039_s12, %s5039_s12, %s5040_s22  }
 0xf11   : > { %5001 = dma.done.wait (%p4520_p2), [#allocation5], 256  }
 0xf12   : > { %5003 = vsyncadd (%p4520_p2), [#allocation5], 4294967040 }
 0xf13 PF: > { %s6063_s10 = sld [smem:[#allocation24_spill]] }
 0xf14   : > { %s6064_s5 = sld [smem:[#allocation21_spill]] }
 0xf15   : > { %s6065_s26 = sld [smem:[#allocation22_spill]] }
 0xf16   : > { %s6066_s27 = sld [smem:[#allocation27_spill]] }
 0xf17   : > { %s6067_s28 = sld [smem:[#allocation23_spill]] }
 0xf18   : > { %s6068_s6 = sld [smem:[#allocation26_spill]] }
 0xf19   : > { %s47_s2 = sadd.s32 1, %s6063_s10  }
 0xf1a   : > { %p44_p3 = scmp.ge.s32.totalorder %s47_s2, 4  }
 0xf1c   :  { %46 = sbr.rel (!%p44_p3) target bundleno = 37 (0x25), region = 279 }
 0xf21   :  { %3529 = vsyncpa [#allocation4], 1 }
 0xf22   :  { %3531 = vsyncpa [#allocation4 + $0x1], 1 }
 0xf23   :  { %3532 = vsyncpa [#allocation7], 1 }
 0xf24   :  { %3534 = vsyncpa [#allocation7 + $0x1], 1 }
 0xf25   :  { %3535 = vsyncpa [#allocation10], 1 }
 0xf26   :  { %3537 = vsyncpa [#allocation10 + $0x1], 1 }
 0xf27   :  { %3538 = vsyncpa [#allocation13], 1 }
 0xf28   :  { %3540 = vsyncpa [#allocation13 + $0x1], 1 }
 0xf29   :  { %3541 = vsyncpa [#allocation5], 1 }
 0xf2a   :  { %3543 = vsyncpa [#allocation5 + $0x1], 1 }

</bundles_post_ra>
